<compile_context>
chip_gen: v6e
topology: v6e:2x2x1
jax: 0.10.0
libtpu: 0.0.40
codegen_flags: <defaults>
</compile_context>

<pallas_src>
import functools

import numpy as np

import jax
import jax.numpy as jnp
from jax import lax
from jax.experimental import pallas as pl
from jax.experimental.pallas import tpu as pltpu

BN_EPS = 1e-5


# ----------------------------- fused kernel -------------------------------- #

def _fused_kernel(xc_ref, wc_ref, g_ref, bt_ref, s4_ref, thr_ref, sel_ref,
                  out_ref, s2_ref, *, N, Q, Q_pad, M, K, inv_count):
    # ---- all four 1x1 convs + folded bias as ONE MXU matmul -----------------
    # xc row 6 = "real pixel" indicator (1 on real pixels, 0 on lane padding),
    # wc col 6 = bias  ->  y padding lanes are exactly 0.
    y = jnp.dot(wc_ref[...], xc_ref[...],
                preferred_element_type=jnp.float32,
                precision=lax.Precision.HIGHEST)           # (16, N*Q_pad)

    # ---- fused BN stats: one sum + one sum-of-squares pass ------------------
    sum1 = jnp.sum(y, axis=1, keepdims=True)                # (16, 1)
    sum2 = jnp.sum(y * y, axis=1, keepdims=True)            # (16, 1)
    mean = sum1 * inv_count
    var = sum2 * inv_count - mean * mean
    inv = lax.rsqrt(var + BN_EPS)
    n = (y - mean) * inv                                    # normalized (16, N*Q_pad)

    g = g_ref[...]      # (8, 3) per-channel gamma, column j = bn_{j+1}
    bt = bt_ref[...]    # (8, 3) per-channel beta
    n3 = n[0:8, :]      # normalized v3 = conv1(x1)+conv2(x2)
    n8 = n[8:16, :]     # normalized v8 = conv3(x1)+conv4(x2)
    v4 = n3 * g[:, 0:1] + bt[:, 0:1]    # bn1(v3)
    v5 = n3 * g[:, 1:2] + bt[:, 1:2]    # bn2(v3)
    v9 = n8 * g[:, 2:3] + bt[:, 2:3]    # bn3(v8)

    # ---- lane-dense stacked output (24, N*Q_pad) ----------------------------
    out_ref[0:8, :] = v4
    out_ref[8:16, :] = v5
    out_ref[16:24, :] = v9

    # ---- s2: flat segment sums of s1 -----------------------------------------
    # s1_flat[u*Q + q] = v9[b(u), c(u), q] * v4[b(u), a(u), q],  u = (a*N+b)*8+c
    # Rows of A[u, q]: z9 is an 8x sublane replication (no matmul needed),
    # z4 is a tiny 0/1 selection matmul.
    v9s = jnp.concatenate([v9[:, b * Q_pad:(b + 1) * Q_pad] for b in range(N)],
                          axis=0)                                   # (8N, Q_pad)
    v4s = jnp.concatenate([v4[:, b * Q_pad:(b + 1) * Q_pad] for b in range(N)],
                          axis=0)                                   # (8N, Q_pad)
    z9 = jnp.concatenate([v9s] * 8, axis=0)                         # (M, Q_pad)
    z4 = jnp.dot(s4_ref[...], v4s, preferred_element_type=jnp.float32)
    a_mat = z9 * z4                                                 # = s1 rows

    # Flat segment r = (u*Q + q) // M.  Row u covers at most K consecutive segments;
    # per-row cumulative sums (thresholds thr) give the chunk sums, and a precomputed
    # (K*M, Q_pad) scatter matrix (1/Wp folded in) places them into a lane-dense
    # (1, Q_pad) row via broadcast-multiply + sublane reduce (no tiny MXU chain).
    qidx = lax.broadcasted_iota(jnp.int32, (M, Q_pad), 1)
    s2 = jnp.zeros((1, Q_pad), jnp.float32)
    c_prev = jnp.zeros((M, 1), jnp.float32)
    for k in range(K):
        ck = jnp.sum(jnp.where(qidx < thr_ref[:, k:k + 1], a_mat, 0.0),
                     axis=1, keepdims=True)                 # (M, 1) cumulative sums
        pk = ck - c_prev                                    # chunk-k partial sums
        s2 = s2 + jnp.sum(sel_ref[k * M:(k + 1) * M, :] * pk,
                          axis=0, keepdims=True)            # scatter -> (1, Q_pad)
        c_prev = ck
    s2_ref[...] = s2


# ----------------------------- glue / wrapper ------------------------------ #

def init_params(key):
    ks = jax.random.split(key, 7)
    return {
        "w1": jax.random.normal(ks[0], (8, 3), jnp.float32) * 0.2,
        "b1": jax.random.normal(ks[1], (8,), jnp.float32) * 0.1,
        "w2": jax.random.normal(ks[2], (8, 3), jnp.float32) * 0.2,
        "b2": jax.random.normal(ks[3], (8,), jnp.float32) * 0.1,
        "w3": jax.random.normal(ks[4], (8, 3), jnp.float32) * 0.2,   # conv3: bias=False
        "w4": jax.random.normal(ks[5], (8, 3), jnp.float32) * 0.2,
        "b4": jax.random.normal(ks[6], (8,), jnp.float32) * 0.1,
        "bn_gamma": jnp.ones((3, 8), jnp.float32),    # bn1/bn2/bn3 default weight
        "bn_beta": jnp.zeros((3, 8), jnp.float32),    # bn1/bn2/bn3 default bias
    }


def model_forward(params, x1, x2):
    N, C, H, W = x1.shape
    assert C == 3
    Hp, Wp = H + 2, W + 2
    Q = Hp * Wp
    Q_pad = ((Q + 127) // 128) * 128
    P2 = N * Q_pad                  # lane-padded pixel axis
    M = 64 * N                      # flat segment length of the s1 reshape
    K = (M - 1 + Q - 1) // M + 1    # max segments touched by one s1 "row"

    # ---- pack both inputs with ONE pad / transpose / reshape chain ----------
    x = jnp.concatenate([x1, x2], axis=1).astype(jnp.float32)       # (N, 6, H, W)
    x = jnp.pad(x, ((0, 0), (0, 0), (1, 1), (1, 1)))                # (N, 6, Hp, Wp)
    x = jnp.pad(x.reshape(N, 6, Q), ((0, 0), (0, 0), (0, Q_pad - Q)))
    x = jnp.transpose(x, (1, 0, 2)).reshape(6, P2)                  # (6, P2)
    # row 6 = real-pixel indicator (folds the conv bias), row 7 = zeros
    pmz = np.zeros((2, N, Q_pad), np.float32)
    pmz[0, :, :Q] = 1.0
    xc = jnp.concatenate([x, jnp.asarray(pmz.reshape(2, P2))], axis=0)   # (8, P2)

    # combined conv weight (16,8): rows 0..7 -> v3 channels, 8..15 -> v8 channels,
    # column 6 = folded bias, column 7 = 0.
    z81 = jnp.zeros((8, 1), jnp.float32)
    top = jnp.concatenate([params["w1"], params["w2"],
                           (params["b1"] + params["b2"])[:, None], z81], axis=1)
    bot = jnp.concatenate([params["w3"], params["w4"],
                           params["b4"][:, None], z81], axis=1)
    wc = jnp.concatenate([top, bot], axis=0)                         # (16, 8)

    gammas = jnp.transpose(params["bn_gamma"])   # (8, 3)
    betas = jnp.transpose(params["bn_beta"])     # (8, 3)

    # ---- static constants (numpy, trace time only) ---------------------------
    u = np.arange(M)
    a_u, b_u = u // (8 * N), (u // 8) % N
    off = (u * Q) % M
    base = (u * Q) // M
    thr = np.zeros((M, K), np.int32)
    sel = np.zeros((K * M, Q_pad), np.float32)
    for k in range(K):
        lo = np.clip(k * M - off, 0, Q)
        hi = np.clip((k + 1) * M - off, 0, Q)
        thr[:, k] = hi
        valid = hi > lo
        sel[k * M + u[valid], (base + k)[valid]] = 1.0 / Wp          # 1/Wp folded in
    s4 = np.zeros((M, 8 * N), np.float32)
    s4[u, b_u * 8 + a_u] = 1.0                                       # picks v4[b(u), a(u), :]

    def full(shp):
        return pl.BlockSpec(shp, lambda i, _n=len(shp): (0,) * _n)

    kernel = functools.partial(_fused_kernel, N=N, Q=Q, Q_pad=Q_pad, M=M, K=K,
                               inv_count=1.0 / float(N * Q))

    out, s2row = pl.pallas_call(
        kernel,
        grid=(1,),
        in_specs=[full((8, P2)), full((16, 8)), full((8, 3)), full((8, 3)),
                  full((M, 8 * N)), full((M, K)), full((K * M, Q_pad))],
        out_specs=[full((24, P2)), full((1, Q_pad))],
        out_shape=[jax.ShapeDtypeStruct((24, P2), jnp.float32),
                   jax.ShapeDtypeStruct((1, Q_pad), jnp.float32)],
        compiler_params=pltpu.CompilerParams(
            dimension_semantics=("arbitrary",),
            vmem_limit_bytes=32 * 1024 * 1024),
    )(xc, wc, gammas, betas, jnp.asarray(s4), jnp.asarray(thr), jnp.asarray(sel))

    # un-pad / relayout in the wrapper (kernel outputs stay lane-dense)
    out = out.reshape(3, 8, N, Q_pad)[:, :, :, :Q]
    out = jnp.transpose(out, (0, 2, 1, 3)).reshape(3, N, 8, Hp, Wp)
    v4, v5, v9 = out[0], out[1], out[2]
    s2 = s2row[0, :Q].reshape(Hp, Wp)
    return v4, v9, v5, s2


# ----------------------------- pure-JAX reference -------------------------- #

def reference(params, x1, x2):
    def conv(x, w, b):
        xp = jnp.pad(x, ((0, 0), (0, 0), (1, 1), (1, 1)))
        y = jnp.sum(w[None, :, :, None, None] * xp[:, None, :, :, :], axis=2)
        if b is not None:
            y = y + b[None, :, None, None]
        return y

    v3 = conv(x1, params["w1"], params["b1"]) + conv(x2, params["w2"], params["b2"])
    v8 = conv(x1, params["w3"], None) + conv(x2, params["w4"], params["b4"])

    def bn(v, g, b):
        m = jnp.mean(v, axis=(0, 2, 3), keepdims=True)
        var = jnp.mean((v - m) ** 2, axis=(0, 2, 3), keepdims=True)
        return (v - m) / jnp.sqrt(var + BN_EPS) * g[None, :, None, None] \
            + b[None, :, None, None]

    g, bt = params["bn_gamma"], params["bn_beta"]
    v4 = bn(v3, g[0], bt[0])
    v5 = bn(v3, g[1], bt[1])
    v9 = bn(v8, g[2], bt[2])

    s1 = v9[None] * jnp.transpose(v4[None], (2, 1, 0, 3, 4))
    Hp, Wp = v4.shape[-2:]
    s2 = s1.reshape(Hp, Wp, -1).sum(-1) / Wp
    return v4, v9, v5, s2


if __name__ == "__main__":
    key = jax.random.PRNGKey(0)
    k1, k2, kp = jax.random.split(key, 3)
    N, H, W = 2, 16, 16
    x1 = jax.random.normal(k1, (N, 3, H, W), jnp.float32)
    x2 = jax.random.normal(k2, (N, 3, H, W), jnp.float32)
    params = init_params(kp)

    fwd = jax.jit(model_forward)
    outs = jax.block_until_ready(fwd(params, x1, x2))
    v4, v9, v5, s2 = outs

    Hp, Wp = H + 2, W + 2
    assert v4.shape == (N, 8, Hp, Wp)
    assert v9.shape == (N, 8, Hp, Wp)
    assert v5.shape == (N, 8, Hp, Wp)
    assert s2.shape == (Hp, Wp)
    assert all(bool(jnp.all(jnp.isfinite(o))) for o in (v4, v9, v5, s2))

    r4, r9, r5, rs2 = reference(params, x1, x2)
    np.testing.assert_allclose(np.asarray(v4), np.asarray(r4), rtol=2e-2, atol=2e-2)
    np.testing.assert_allclose(np.asarray(v5), np.asarray(r5), rtol=2e-2, atol=2e-2)
    np.testing.assert_allclose(np.asarray(v9), np.asarray(r9), rtol=2e-2, atol=2e-2)
    np.testing.assert_allclose(np.asarray(s2), np.asarray(rs2), rtol=5e-2, atol=5e-2)

    print("KERNEL_OK")
</pallas_src>

<mosaic_0001>
module attributes {stable_mosaic.version = 11 : i64} {
  func.func @_fused_kernel(%arg0: i32, %arg1: memref<8x768xf32, #tpu.memory_space<vmem>>, %arg2: memref<16x8xf32, #tpu.memory_space<vmem>>, %arg3: memref<8x3xf32, #tpu.memory_space<vmem>>, %arg4: memref<8x3xf32, #tpu.memory_space<vmem>>, %arg5: memref<128x16xf32, #tpu.memory_space<vmem>>, %arg6: memref<128x4xi32, #tpu.memory_space<vmem>>, %arg7: memref<512x384xf32, #tpu.memory_space<vmem>>, %arg8: memref<24x768xf32, #tpu.memory_space<vmem>>, %arg9: memref<1x384xf32, #tpu.memory_space<vmem>>) attributes {dimension_semantics = [#tpu.dimension_semantics<arbitrary>], iteration_bounds = array<i64: 1>, scalar_prefetch = 0 : i64, scratch_operands = 0 : i64, tpu.core_type = #tpu.core_type<tc>, window_params = [{pipeline_mode = #tpu.pipeline_mode<synchronous>, transform_indices = @transform_0, window_bounds = array<i64: 8, 768>}, {pipeline_mode = #tpu.pipeline_mode<synchronous>, transform_indices = @transform_1, window_bounds = array<i64: 16, 8>}, {pipeline_mode = #tpu.pipeline_mode<synchronous>, transform_indices = @transform_2, window_bounds = array<i64: 8, 3>}, {pipeline_mode = #tpu.pipeline_mode<synchronous>, transform_indices = @transform_3, window_bounds = array<i64: 8, 3>}, {pipeline_mode = #tpu.pipeline_mode<synchronous>, transform_indices = @transform_4, window_bounds = array<i64: 128, 16>}, {pipeline_mode = #tpu.pipeline_mode<synchronous>, transform_indices = @transform_5, window_bounds = array<i64: 128, 4>}, {pipeline_mode = #tpu.pipeline_mode<synchronous>, transform_indices = @transform_6, window_bounds = array<i64: 512, 384>}, {pipeline_mode = #tpu.pipeline_mode<synchronous>, transform_indices = @transform_7, window_bounds = array<i64: 24, 768>}, {pipeline_mode = #tpu.pipeline_mode<synchronous>, transform_indices = @transform_8, window_bounds = array<i64: 1, 384>}]} {
    %c0 = arith.constant 0 : index
    %c0_0 = arith.constant 0 : index
    %0 = vector.load %arg2[%c0, %c0_0] : memref<16x8xf32, #tpu.memory_space<vmem>>, vector<16x8xf32>
    %c0_1 = arith.constant 0 : index
    %c0_2 = arith.constant 0 : index
    %1 = vector.load %arg1[%c0_1, %c0_2] : memref<8x768xf32, #tpu.memory_space<vmem>>, vector<8x768xf32>
    %cst = arith.constant dense<0.000000e+00> : vector<16x768xf32>
    %2 = tpu.matmul %0, %1, %cst {dimension_numbers = #tpu.dot_dimension_numbers<[1], [0], [0], [1], [0, 0, 1, 1], [], []>, precision = #tpu.contract_precision<fp32>} : vector<16x8xf32>, vector<8x768xf32>, vector<16x768xf32> -> vector<16x768xf32>
    %cst_3 = arith.constant dense<0.000000e+00> : vector<16xf32>
    %3 = vector.multi_reduction <add>, %2, %cst_3 [1] : vector<16x768xf32> to vector<16xf32>
    %4 = vector.shape_cast %3 : vector<16xf32> to vector<16x1xf32>
    %5 = arith.mulf %2, %2 : vector<16x768xf32>
    %cst_4 = arith.constant dense<0.000000e+00> : vector<16xf32>
    %6 = vector.multi_reduction <add>, %5, %cst_4 [1] : vector<16x768xf32> to vector<16xf32>
    %7 = vector.shape_cast %6 : vector<16xf32> to vector<16x1xf32>
    %cst_5 = arith.constant 0.00154320989 : f32
    %8 = vector.broadcast %cst_5 : f32 to vector<16x1xf32>
    %9 = arith.mulf %4, %8 : vector<16x1xf32>
    %cst_6 = arith.constant 0.00154320989 : f32
    %10 = vector.broadcast %cst_6 : f32 to vector<16x1xf32>
    %11 = arith.mulf %7, %10 : vector<16x1xf32>
    %12 = arith.mulf %9, %9 : vector<16x1xf32>
    %13 = arith.subf %11, %12 : vector<16x1xf32>
    %cst_7 = arith.constant 9.99999974E-6 : f32
    %14 = vector.broadcast %cst_7 : f32 to vector<16x1xf32>
    %15 = arith.addf %13, %14 : vector<16x1xf32>
    %16 = math.rsqrt %15 : vector<16x1xf32>
    %17 = vector.broadcast %9 : vector<16x1xf32> to vector<16x768xf32>
    %18 = arith.subf %2, %17 : vector<16x768xf32>
    %19 = vector.broadcast %16 : vector<16x1xf32> to vector<16x768xf32>
    %20 = arith.mulf %18, %19 : vector<16x768xf32>
    %c0_8 = arith.constant 0 : index
    %c0_9 = arith.constant 0 : index
    %21 = vector.load %arg3[%c0_8, %c0_9] : memref<8x3xf32, #tpu.memory_space<vmem>>, vector<8x3xf32>
    %c0_10 = arith.constant 0 : index
    %c0_11 = arith.constant 0 : index
    %22 = vector.load %arg4[%c0_10, %c0_11] : memref<8x3xf32, #tpu.memory_space<vmem>>, vector<8x3xf32>
    %23 = vector.extract_strided_slice %20 {offsets = [0, 0], sizes = [8, 768], strides = [1, 1]} : vector<16x768xf32> to vector<8x768xf32>
    %24 = vector.extract_strided_slice %20 {offsets = [8, 0], sizes = [8, 768], strides = [1, 1]} : vector<16x768xf32> to vector<8x768xf32>
    %25 = vector.extract_strided_slice %21 {offsets = [0, 0], sizes = [8, 1], strides = [1, 1]} : vector<8x3xf32> to vector<8x1xf32>
    %26 = vector.broadcast %25 : vector<8x1xf32> to vector<8x768xf32>
    %27 = arith.mulf %23, %26 : vector<8x768xf32>
    %28 = vector.extract_strided_slice %22 {offsets = [0, 0], sizes = [8, 1], strides = [1, 1]} : vector<8x3xf32> to vector<8x1xf32>
    %29 = vector.broadcast %28 : vector<8x1xf32> to vector<8x768xf32>
    %30 = arith.addf %27, %29 : vector<8x768xf32>
    %31 = vector.extract_strided_slice %21 {offsets = [0, 1], sizes = [8, 1], strides = [1, 1]} : vector<8x3xf32> to vector<8x1xf32>
    %32 = vector.broadcast %31 : vector<8x1xf32> to vector<8x768xf32>
    %33 = arith.mulf %23, %32 : vector<8x768xf32>
    %34 = vector.extract_strided_slice %22 {offsets = [0, 1], sizes = [8, 1], strides = [1, 1]} : vector<8x3xf32> to vector<8x1xf32>
    %35 = vector.broadcast %34 : vector<8x1xf32> to vector<8x768xf32>
    %36 = arith.addf %33, %35 : vector<8x768xf32>
    %37 = vector.extract_strided_slice %21 {offsets = [0, 2], sizes = [8, 1], strides = [1, 1]} : vector<8x3xf32> to vector<8x1xf32>
    %38 = vector.broadcast %37 : vector<8x1xf32> to vector<8x768xf32>
    %39 = arith.mulf %24, %38 : vector<8x768xf32>
    %40 = vector.extract_strided_slice %22 {offsets = [0, 2], sizes = [8, 1], strides = [1, 1]} : vector<8x3xf32> to vector<8x1xf32>
    %41 = vector.broadcast %40 : vector<8x1xf32> to vector<8x768xf32>
    %42 = arith.addf %39, %41 : vector<8x768xf32>
    %c0_12 = arith.constant 0 : index
    %c0_13 = arith.constant 0 : index
    %43 = vector.load %arg8[%c0_12, %c0_13] : memref<24x768xf32, #tpu.memory_space<vmem>>, vector<8x768xf32>
    tpu.vector_store %arg8[%c0_12, %c0_13], %30 {strides = array<i32>} : memref<24x768xf32, #tpu.memory_space<vmem>>, vector<8x768xf32>,
    %c8 = arith.constant 8 : index
    %c0_14 = arith.constant 0 : index
    %44 = vector.load %arg8[%c8, %c0_14] : memref<24x768xf32, #tpu.memory_space<vmem>>, vector<8x768xf32>
    tpu.vector_store %arg8[%c8, %c0_14], %36 {strides = array<i32>} : memref<24x768xf32, #tpu.memory_space<vmem>>, vector<8x768xf32>,
    %c16 = arith.constant 16 : index
    %c0_15 = arith.constant 0 : index
    %45 = vector.load %arg8[%c16, %c0_15] : memref<24x768xf32, #tpu.memory_space<vmem>>, vector<8x768xf32>
    tpu.vector_store %arg8[%c16, %c0_15], %42 {strides = array<i32>} : memref<24x768xf32, #tpu.memory_space<vmem>>, vector<8x768xf32>,
    %46 = vector.extract_strided_slice %42 {offsets = [0, 0], sizes = [8, 384], strides = [1, 1]} : vector<8x768xf32> to vector<8x384xf32>
    %47 = vector.extract_strided_slice %42 {offsets = [0, 384], sizes = [8, 384], strides = [1, 1]} : vector<8x768xf32> to vector<8x384xf32>
    %48 = tpu.concatenate %46, %47 in 0 : vector<8x384xf32>, vector<8x384xf32> -> vector<16x384xf32>
    %49 = vector.extract_strided_slice %30 {offsets = [0, 0], sizes = [8, 384], strides = [1, 1]} : vector<8x768xf32> to vector<8x384xf32>
    %50 = vector.extract_strided_slice %30 {offsets = [0, 384], sizes = [8, 384], strides = [1, 1]} : vector<8x768xf32> to vector<8x384xf32>
    %51 = tpu.concatenate %49, %50 in 0 : vector<8x384xf32>, vector<8x384xf32> -> vector<16x384xf32>
    %52 = tpu.concatenate %48, %48, %48, %48, %48, %48, %48, %48 in 0 : vector<16x384xf32>, vector<16x384xf32>, vector<16x384xf32>, vector<16x384xf32>, vector<16x384xf32>, vector<16x384xf32>, vector<16x384xf32>, vector<16x384xf32> -> vector<128x384xf32>
    %c0_16 = arith.constant 0 : index
    %c0_17 = arith.constant 0 : index
    %53 = vector.load %arg5[%c0_16, %c0_17] : memref<128x16xf32, #tpu.memory_space<vmem>>, vector<128x16xf32>
    %cst_18 = arith.constant dense<0.000000e+00> : vector<128x384xf32>
    %54 = tpu.matmul %53, %51, %cst_18 {dimension_numbers = #tpu.dot_dimension_numbers<[1], [0], [0], [1], [0, 0, 1, 1], [], []>} : vector<128x16xf32>, vector<16x384xf32>, vector<128x384xf32> -> vector<128x384xf32>
    %55 = arith.mulf %52, %54 : vector<128x384xf32>
    %56 = tpu.iota {dimensions = array<i32: 1>} : vector<128x384xi32>
    %cst_19 = arith.constant 0.000000e+00 : f32
    %57 = vector.broadcast %cst_19 : f32 to vector<1x384xf32>
    %cst_20 = arith.constant 0.000000e+00 : f32
    %58 = vector.broadcast %cst_20 : f32 to vector<128x1xf32>
    %c0_21 = arith.constant 0 : index
    %c0_22 = arith.constant 0 : index
    %59 = vector.load %arg6[%c0_21, %c0_22] : memref<128x4xi32, #tpu.memory_space<vmem>>, vector<128x1xi32>
    %60 = vector.broadcast %59 : vector<128x1xi32> to vector<128x384xi32>
    %61 = arith.cmpi slt, %56, %60 : vector<128x384xi32>
    %cst_23 = arith.constant 0.000000e+00 : f32
    %62 = vector.broadcast %cst_23 : f32 to vector<128x384xf32>
    %63 = arith.select %61, %55, %62 : vector<128x384xi1>, vector<128x384xf32>
    %cst_24 = arith.constant dense<0.000000e+00> : vector<128xf32>
    %64 = vector.multi_reduction <add>, %63, %cst_24 [1] : vector<128x384xf32> to vector<128xf32>
    %65 = vector.shape_cast %64 : vector<128xf32> to vector<128x1xf32>
    %66 = arith.subf %65, %58 : vector<128x1xf32>
    %c0_25 = arith.constant 0 : index
    %c0_26 = arith.constant 0 : index
    %67 = vector.load %arg7[%c0_25, %c0_26] : memref<512x384xf32, #tpu.memory_space<vmem>>, vector<128x384xf32>
    %68 = vector.broadcast %66 : vector<128x1xf32> to vector<128x384xf32>
    %69 = arith.mulf %67, %68 : vector<128x384xf32>
    %cst_27 = arith.constant dense<0.000000e+00> : vector<384xf32>
    %70 = vector.multi_reduction <add>, %69, %cst_27 [0] : vector<128x384xf32> to vector<384xf32>
    %71 = vector.shape_cast %70 : vector<384xf32> to vector<1x384xf32>
    %72 = arith.addf %57, %71 : vector<1x384xf32>
    %c0_28 = arith.constant 0 : index
    %c1 = arith.constant 1 : index
    %73 = vector.load %arg6[%c0_28, %c1] : memref<128x4xi32, #tpu.memory_space<vmem>>, vector<128x1xi32>
    %74 = vector.broadcast %73 : vector<128x1xi32> to vector<128x384xi32>
    %75 = arith.cmpi slt, %56, %74 : vector<128x384xi32>
    %cst_29 = arith.constant 0.000000e+00 : f32
    %76 = vector.broadcast %cst_29 : f32 to vector<128x384xf32>
    %77 = arith.select %75, %55, %76 : vector<128x384xi1>, vector<128x384xf32>
    %cst_30 = arith.constant dense<0.000000e+00> : vector<128xf32>
    %78 = vector.multi_reduction <add>, %77, %cst_30 [1] : vector<128x384xf32> to vector<128xf32>
    %79 = vector.shape_cast %78 : vector<128xf32> to vector<128x1xf32>
    %80 = arith.subf %79, %65 : vector<128x1xf32>
    %c128 = arith.constant 128 : index
    %c0_31 = arith.constant 0 : index
    %81 = vector.load %arg7[%c128, %c0_31] : memref<512x384xf32, #tpu.memory_space<vmem>>, vector<128x384xf32>
    %82 = vector.broadcast %80 : vector<128x1xf32> to vector<128x384xf32>
    %83 = arith.mulf %81, %82 : vector<128x384xf32>
    %cst_32 = arith.constant dense<0.000000e+00> : vector<384xf32>
    %84 = vector.multi_reduction <add>, %83, %cst_32 [0] : vector<128x384xf32> to vector<384xf32>
    %85 = vector.shape_cast %84 : vector<384xf32> to vector<1x384xf32>
    %86 = arith.addf %72, %85 : vector<1x384xf32>
    %c0_33 = arith.constant 0 : index
    %c2 = arith.constant 2 : index
    %87 = vector.load %arg6[%c0_33, %c2] : memref<128x4xi32, #tpu.memory_space<vmem>>, vector<128x1xi32>
    %88 = vector.broadcast %87 : vector<128x1xi32> to vector<128x384xi32>
    %89 = arith.cmpi slt, %56, %88 : vector<128x384xi32>
    %cst_34 = arith.constant 0.000000e+00 : f32
    %90 = vector.broadcast %cst_34 : f32 to vector<128x384xf32>
    %91 = arith.select %89, %55, %90 : vector<128x384xi1>, vector<128x384xf32>
    %cst_35 = arith.constant dense<0.000000e+00> : vector<128xf32>
    %92 = vector.multi_reduction <add>, %91, %cst_35 [1] : vector<128x384xf32> to vector<128xf32>
    %93 = vector.shape_cast %92 : vector<128xf32> to vector<128x1xf32>
    %94 = arith.subf %93, %79 : vector<128x1xf32>
    %c256 = arith.constant 256 : index
    %c0_36 = arith.constant 0 : index
    %95 = vector.load %arg7[%c256, %c0_36] : memref<512x384xf32, #tpu.memory_space<vmem>>, vector<128x384xf32>
    %96 = vector.broadcast %94 : vector<128x1xf32> to vector<128x384xf32>
    %97 = arith.mulf %95, %96 : vector<128x384xf32>
    %cst_37 = arith.constant dense<0.000000e+00> : vector<384xf32>
    %98 = vector.multi_reduction <add>, %97, %cst_37 [0] : vector<128x384xf32> to vector<384xf32>
    %99 = vector.shape_cast %98 : vector<384xf32> to vector<1x384xf32>
    %100 = arith.addf %86, %99 : vector<1x384xf32>
    %c0_38 = arith.constant 0 : index
    %c3 = arith.constant 3 : index
    %101 = vector.load %arg6[%c0_38, %c3] : memref<128x4xi32, #tpu.memory_space<vmem>>, vector<128x1xi32>
    %102 = vector.broadcast %101 : vector<128x1xi32> to vector<128x384xi32>
    %103 = arith.cmpi slt, %56, %102 : vector<128x384xi32>
    %cst_39 = arith.constant 0.000000e+00 : f32
    %104 = vector.broadcast %cst_39 : f32 to vector<128x384xf32>
    %105 = arith.select %103, %55, %104 : vector<128x384xi1>, vector<128x384xf32>
    %cst_40 = arith.constant dense<0.000000e+00> : vector<128xf32>
    %106 = vector.multi_reduction <add>, %105, %cst_40 [1] : vector<128x384xf32> to vector<128xf32>
    %107 = vector.shape_cast %106 : vector<128xf32> to vector<128x1xf32>
    %108 = arith.subf %107, %93 : vector<128x1xf32>
    %c384 = arith.constant 384 : index
    %c0_41 = arith.constant 0 : index
    %109 = vector.load %arg7[%c384, %c0_41] : memref<512x384xf32, #tpu.memory_space<vmem>>, vector<128x384xf32>
    %110 = vector.broadcast %108 : vector<128x1xf32> to vector<128x384xf32>
    %111 = arith.mulf %109, %110 : vector<128x384xf32>
    %cst_42 = arith.constant dense<0.000000e+00> : vector<384xf32>
    %112 = vector.multi_reduction <add>, %111, %cst_42 [0] : vector<128x384xf32> to vector<384xf32>
    %113 = vector.shape_cast %112 : vector<384xf32> to vector<1x384xf32>
    %114 = arith.addf %100, %113 : vector<1x384xf32>
    %c0_43 = arith.constant 0 : index
    %c0_44 = arith.constant 0 : index
    %115 = vector.load %arg9[%c0_43, %c0_44] : memref<1x384xf32, #tpu.memory_space<vmem>>, vector<1x384xf32>
    tpu.vector_store %arg9[%c0_43, %c0_44], %114 {strides = array<i32>} : memref<1x384xf32, #tpu.memory_space<vmem>>, vector<1x384xf32>,
    return
  }
  func.func @transform_0(%arg0: i32) -> (i32, i32) {
    %c0_i32 = arith.constant 0 : i32
    %c0_i32_0 = arith.constant 0 : i32
    %c0_i32_1 = arith.constant 0 : i32
    return %c0_i32, %c0_i32_0 : i32, i32
  }
  func.func @transform_1(%arg0: i32) -> (i32, i32) {
    %c0_i32 = arith.constant 0 : i32
    %c0_i32_0 = arith.constant 0 : i32
    %c0_i32_1 = arith.constant 0 : i32
    return %c0_i32, %c0_i32_0 : i32, i32
  }
  func.func @transform_2(%arg0: i32) -> (i32, i32) {
    %c0_i32 = arith.constant 0 : i32
    %c0_i32_0 = arith.constant 0 : i32
    %c0_i32_1 = arith.constant 0 : i32
    return %c0_i32, %c0_i32_0 : i32, i32
  }
  func.func @transform_3(%arg0: i32) -> (i32, i32) {
    %c0_i32 = arith.constant 0 : i32
    %c0_i32_0 = arith.constant 0 : i32
    %c0_i32_1 = arith.constant 0 : i32
    return %c0_i32, %c0_i32_0 : i32, i32
  }
  func.func @transform_4(%arg0: i32) -> (i32, i32) {
    %c0_i32 = arith.constant 0 : i32
    %c0_i32_0 = arith.constant 0 : i32
    %c0_i32_1 = arith.constant 0 : i32
    return %c0_i32, %c0_i32_0 : i32, i32
  }
  func.func @transform_5(%arg0: i32) -> (i32, i32) {
    %c0_i32 = arith.constant 0 : i32
    %c0_i32_0 = arith.constant 0 : i32
    %c0_i32_1 = arith.constant 0 : i32
    return %c0_i32, %c0_i32_0 : i32, i32
  }
  func.func @transform_6(%arg0: i32) -> (i32, i32) {
    %c0_i32 = arith.constant 0 : i32
    %c0_i32_0 = arith.constant 0 : i32
    %c0_i32_1 = arith.constant 0 : i32
    return %c0_i32, %c0_i32_0 : i32, i32
  }
  func.func @transform_7(%arg0: i32) -> (i32, i32) {
    %c0_i32 = arith.constant 0 : i32
    %c0_i32_0 = arith.constant 0 : i32
    %c0_i32_1 = arith.constant 0 : i32
    return %c0_i32, %c0_i32_0 : i32, i32
  }
  func.func @transform_8(%arg0: i32) -> (i32, i32) {
    %c0_i32 = arith.constant 0 : i32
    %c0_i32_0 = arith.constant 0 : i32
    %c0_i32_1 = arith.constant 0 : i32
    return %c0_i32, %c0_i32_0 : i32, i32
  }
}

</mosaic_0001>

<bundles_post_ra>
// kernel: squeeze.4
= control target key start
LH: loop header
LB: loop body
LE: loop exit
PB: predicated region body
PF: predicated region fallthrough
CT: control target
= control target key end

     0   :  { %s703_s10 = smov 112   ;;  %s704_s11 = smov 114   ;;  %vm401_vm0 = vcmask 1014784   ;;  %vm452_vm1 = vcmask 1031168   ;;  %vm3_vm2 = vcmask 146432   ;;  %vm405_vm3 = vcmask 31744   ;;  %s1399_s0 = inlined_call_operand.vmem [shape: f32[1,2,8,324], index: 0, kind: input, shape index: {}]   ;;  %s1400_s1 = inlined_call_operand.vmem [shape: f32[2,8,18,18], index: 1, kind: output, shape index: {}]  }
   0x1   :  { %v733_v0 = vld.sshfl [vmem:[%s1399_s0 + $0x8] sm:$0xff pattern:$0x67452301]   ;;  %v503_v1 = vld.sshfl [vmem:[%s1399_s0 + $0x10] sm:$0xff pattern:$0x67452301]  }
   0x2   :  { %41 = vrot.lane.b32.xlu1 %v733_v0, %s703_s10  ;;  %15 = vrot.lane.b32.xlu0 %v503_v1, %s704_s11  ;;  %v518_v2 = vld.sshfl [vmem:[%s1399_s0 + $0x20] sm:$0xff pattern:$0x67452301]   ;;  %v508_v3 = vld.sshfl [vmem:[%s1399_s0 + $0x28] sm:$0xff pattern:$0x67452301]   ;;  %v402_v4 = vsel %vm401_vm0, %v503_v1, %v733_v0 }
   0x3   :  { %v65_v5 = vld.sshfl [vmem:[%s1399_s0] sm:$0xff pattern:$0x56741230]   ;;  %v667_v6 = vld.sshfl [vmem:[%s1399_s0 + $0x8] sm:$0xff pattern:$0x56741230]   ;;  %v428_v8 = vsel %vm401_vm0, %v508_v3, %v518_v2 }
   0x4   :  { %s705_s20 = smov 4   ;;  %s706_s21 = smov 110   ;;  %v453_v7 = vsel %vm452_vm1, %v667_v6, %v65_v5  ;;  %v527_v9 = vld.sshfl [vmem:[%s1399_s0 + $0x18] sm:$0xff pattern:$0x56741230]   ;;  %v2_v14 = vld [vmem:[%s1399_s0] sm:$0xff]  }
   0x5   :  { %v677_v10 = vld.sshfl [vmem:[%s1399_s0 + $0x20] sm:$0xff pattern:$0x56741230]   ;;  %s707_s26 = smov 2   ;;  %s708_s2 = smov 96   ;;  %v500_v15 = vld [vmem:[%s1399_s0 + $0x18] sm:$0xff]  }
   0x6   :  { %54 = vrot.lane.b32.xlu1 %v518_v2, %s703_s10  ;;  %28 = vrot.lane.b32.xlu0 %v508_v3, %s704_s11  ;;  %v479_v11 = vsel %vm452_vm1, %v677_v10, %v527_v9  ;;  %v537_v12 = vld.sshfl [vmem:[%s1399_s0 + $0x28] sm:$0xff pattern:$0x74563012]   ;;  %v532_v13 = vld.sshfl [vmem:[%s1399_s0 + $0x10] sm:$0xff pattern:$0x74563012]  }
   0x7   :  { %s709_s3 = smov 94   ;;  %s710_s4 = smov 92   ;;  %4 = vst.msk [vmem:[%s1400_s1] ss:$24 sm:$0xf] %vm3_vm2, %v2_v14   ;;  %vm414_vm4 = vcmask 146464  }
   0x8   :  { %s711_s5 = smov 78   ;;  %s712_s6 = smov 76   ;;  %5 = vst.msk [vmem:[%s1400_s1] ss:$24 sm:$0xf0] %vm3_vm2, %v2_v14   ;;  %vm456_vm5 = vcmask 15360  }
   0x9   :  { %s713_s7 = smov 74   ;;  %s714_s8 = smov 58   ;;  %501 = vst.msk [vmem:[%s1400_s1 + $0xc0] ss:$24 sm:$0xf] %vm3_vm2, %v500_v15   ;;  %vm465_vm6 = vcmask 146448  }
   0xa   :  { %403 = vrot.lane.b32.xlu1 %v402_v4, %s705_s20  ;;  %66 = vrot.lane.b32.xlu0 %v65_v5, %s706_s21  ;;  %s715_s9 = smov 56   ;;  %502 = vst.msk [vmem:[%s1400_s1 + $0xc0] ss:$24 sm:$0xf0] %vm3_vm2, %v500_v15   ;;  %s717_s22 = smov 38  }
   0xb   :  { %s718_s23 = smov 22   ;;  %s719_s24 = smov 20  }
   0xe   :  { %454 = vrot.lane.b32.xlu1 %v453_v7, %s707_s26  ;;  %429 = vrot.lane.b32.xlu0 %v428_v8, %s705_s20 }
  0x12   :  { %79 = vrot.lane.b32.xlu1 %v527_v9, %s706_s21  ;;  %480 = vrot.lane.b32.xlu0 %v479_v11, %s707_s26  ;;  %s716_s21 = smov 40  }
  0x16   :  { %105 = vrot.lane.b32.xlu1 %v537_v12, %s708_s2  ;;  %92 = vrot.lane.b32.xlu0 %v532_v13, %s708_s2 }
  0x1a   :  { %131 = vrot.lane.b32.xlu1 %v518_v2, %s709_s3  ;;  %118 = vrot.lane.b32.xlu0 %v733_v0, %s709_s3 }
  0x1e   :  { %156 = vrot.lane.b32.xlu1 %v527_v9, %s710_s4  ;;  %143 = vrot.lane.b32.xlu0 %v65_v5, %s710_s4 }
  0x22   :  { %182 = vrot.lane.b32.xlu1 %v537_v12, %s711_s5  ;;  %169 = vrot.lane.b32.xlu0 %v532_v13, %s711_s5 }
  0x26   :  { %208 = vrot.lane.b32.xlu1 %v518_v2, %s712_s6  ;;  %195 = vrot.lane.b32.xlu0 %v733_v0, %s712_s6 }
  0x2a   :  { %233 = vrot.lane.b32.xlu1 %v527_v9, %s713_s7  ;;  %220 = vrot.lane.b32.xlu0 %v65_v5, %s713_s7 }
  0x2e   :  { %259 = vrot.lane.b32.xlu1 %v518_v2, %s714_s8  ;;  %246 = vrot.lane.b32.xlu0 %v733_v0, %s714_s8 }
  0x32   :  { %284 = vrot.lane.b32.xlu1 %v527_v9, %s715_s9  ;;  %271 = vrot.lane.b32.xlu0 %v65_v5, %s715_s9 }
  0x36   :  { %310 = vrot.lane.b32.xlu1 %v518_v2, %s716_s21  ;;  %297 = vrot.lane.b32.xlu0 %v733_v0, %s716_s21 }
  0x3a   :  { %335 = vrot.lane.b32.xlu1 %v527_v9, %s717_s22  ;;  %322 = vrot.lane.b32.xlu0 %v65_v5, %s717_s22 }
  0x3e   :  { %361 = vrot.lane.b32.xlu1 %v518_v2, %s718_s23  ;;  %348 = vrot.lane.b32.xlu0 %v733_v0, %s718_s23 }
  0x42   :  { %386 = vrot.lane.b32.xlu1 %v527_v9, %s719_s24  ;;  %373 = vrot.lane.b32.xlu0 %v65_v5, %s719_s24 }
  0x74   :  { %v42_v16 = vpop.permute.xlu1 %41   ;;  %v16_v17 = vpop.permute.xlu0 %15  }
  0x75   :  { %514 = vst.msk [vmem:[%s1400_s1 + $0x20] ss:$-24 sm:$0x3] %vm3_vm2, %v42_v16   ;;  %515 = vst.msk [vmem:[%s1400_s1 + $0x80] ss:$-24 sm:$0xc] %vm3_vm2, %v42_v16  }
  0x76   :  { %516 = vst.msk [vmem:[%s1400_s1 + $0xe0] ss:$-24 sm:$0x30] %vm3_vm2, %v42_v16   ;;  %517 = vst.msk [vmem:[%s1400_s1 + $0x140] ss:$-24 sm:$0xc0] %vm3_vm2, %v42_v16  }
  0x77   :  { %504 = vst.msk [vmem:[%s1400_s1 + $0x27] ss:$-24 sm:$0x3] %vm3_vm2, %v16_v17   ;;  %505 = vst.msk [vmem:[%s1400_s1 + $0x87] ss:$-24 sm:$0xc] %vm3_vm2, %v16_v17  }
  0x78   :  { %506 = vst.msk [vmem:[%s1400_s1 + $0xe7] ss:$-24 sm:$0x30] %vm3_vm2, %v16_v17   ;;  %507 = vst.msk [vmem:[%s1400_s1 + $0x147] ss:$-24 sm:$0xc0] %vm3_vm2, %v16_v17   ;;  %v55_v18 = vpop.permute.xlu1 %54   ;;  %v29_v19 = vpop.permute.xlu0 %28  }
  0x79   :  { %519 = vst.msk [vmem:[%s1400_s1 + $0xe0] ss:$-24 sm:$0x3] %vm3_vm2, %v55_v18   ;;  %520 = vst.msk [vmem:[%s1400_s1 + $0x140] ss:$-24 sm:$0xc] %vm3_vm2, %v55_v18  }
  0x7a   :  { %521 = vst.msk [vmem:[%s1400_s1 + $0x1a0] ss:$-24 sm:$0x30] %vm3_vm2, %v55_v18   ;;  %522 = vst.msk [vmem:[%s1400_s1 + $0x200] ss:$-24 sm:$0xc0] %vm3_vm2, %v55_v18  }
  0x7b   :  { %509 = vst.msk [vmem:[%s1400_s1 + $0xe7] ss:$-24 sm:$0x3] %vm3_vm2, %v29_v19   ;;  %510 = vst.msk [vmem:[%s1400_s1 + $0x147] ss:$-24 sm:$0xc] %vm3_vm2, %v29_v19  }
  0x7c   :  { %511 = vst.msk [vmem:[%s1400_s1 + $0x1a7] ss:$-24 sm:$0x30] %vm3_vm2, %v29_v19   ;;  %512 = vst.msk [vmem:[%s1400_s1 + $0x207] ss:$-24 sm:$0xc0] %vm3_vm2, %v29_v19   ;;  %v404_v20 = vpop.permute.xlu1 %403   ;;  %v67_v21 = vpop.permute.xlu0 %66  }
  0x7d   :  { %649 = vst.msk [vmem:[%s1400_s1 + $0x26] ss:$-24 sm:$0x3] %vm405_vm3, %v404_v20   ;;  %650 = vst.msk [vmem:[%s1400_s1 + $0x86] ss:$-24 sm:$0xc] %vm405_vm3, %v404_v20  }
  0x7e   :  { %651 = vst.msk [vmem:[%s1400_s1 + $0xe6] ss:$-24 sm:$0x30] %vm405_vm3, %v404_v20   ;;  %652 = vst.msk [vmem:[%s1400_s1 + $0x146] ss:$-24 sm:$0xc0] %vm405_vm3, %v404_v20  }
  0x7f   :  { %523 = vst.msk [vmem:[%s1400_s1 + $0x1] ss:$72 sm:$0x3] %vm3_vm2, %v67_v21   ;;  %524 = vst.msk [vmem:[%s1400_s1 + $0x61] ss:$-24 sm:$0xc] %vm3_vm2, %v67_v21  }
  0x80   :  { %525 = vst.msk [vmem:[%s1400_s1 - $0xbf] ss:$72 sm:$0x30] %vm3_vm2, %v67_v21   ;;  %526 = vst.msk [vmem:[%s1400_s1 + $0x121] ss:$-24 sm:$0xc0] %vm3_vm2, %v67_v21   ;;  %v455_v22 = vpop.permute.xlu1 %454   ;;  %v430_v23 = vpop.permute.xlu0 %429  }
  0x81   :  { %653 = vst.msk [vmem:[%s1400_s1 + $0x26] ss:$-24 sm:$0x3] %vm414_vm4, %v404_v20   ;;  %654 = vst.msk [vmem:[%s1400_s1 + $0x86] ss:$-24 sm:$0xc] %vm414_vm4, %v404_v20  }
  0x82   :  { %655 = vst.msk [vmem:[%s1400_s1 + $0xe6] ss:$-24 sm:$0x30] %vm414_vm4, %v404_v20   ;;  %656 = vst.msk [vmem:[%s1400_s1 + $0x146] ss:$-24 sm:$0xc0] %vm414_vm4, %v404_v20  }
  0x83   :  { %668 = vst.msk [vmem:[%s1400_s1 + $0x7] ss:$72 sm:$0x3] %vm456_vm5, %v455_v22   ;;  %669 = vst.msk [vmem:[%s1400_s1 + $0x67] ss:$-24 sm:$0xc] %vm456_vm5, %v455_v22  }
  0x84   :  { %670 = vst.msk [vmem:[%s1400_s1 - $0xb9] ss:$72 sm:$0x30] %vm456_vm5, %v455_v22   ;;  %671 = vst.msk [vmem:[%s1400_s1 + $0x127] ss:$-24 sm:$0xc0] %vm456_vm5, %v455_v22   ;;  %v80_v24 = vpop.permute.xlu1 %79   ;;  %v481_v25 = vpop.permute.xlu0 %480  }
  0x85   :  { %659 = vst.msk [vmem:[%s1400_s1 + $0xe6] ss:$-24 sm:$0x3] %vm405_vm3, %v430_v23   ;;  %660 = vst.msk [vmem:[%s1400_s1 + $0x146] ss:$-24 sm:$0xc] %vm405_vm3, %v430_v23  }
  0x86   :  { %661 = vst.msk [vmem:[%s1400_s1 + $0x1a6] ss:$-24 sm:$0x30] %vm405_vm3, %v430_v23   ;;  %662 = vst.msk [vmem:[%s1400_s1 + $0x206] ss:$-24 sm:$0xc0] %vm405_vm3, %v430_v23  }
  0x87   :  { %672 = vst.msk [vmem:[%s1400_s1 + $0x7] ss:$72 sm:$0x3] %vm465_vm6, %v455_v22   ;;  %673 = vst.msk [vmem:[%s1400_s1 + $0x67] ss:$-24 sm:$0xc] %vm465_vm6, %v455_v22  }
  0x88   :  { %674 = vst.msk [vmem:[%s1400_s1 - $0xb9] ss:$72 sm:$0x30] %vm465_vm6, %v455_v22   ;;  %675 = vst.msk [vmem:[%s1400_s1 + $0x127] ss:$-24 sm:$0xc0] %vm465_vm6, %v455_v22   ;;  %v106_v26 = vpop.permute.xlu1 %105   ;;  %v93_v27 = vpop.permute.xlu0 %92  }
  0x89   :  { %663 = vst.msk [vmem:[%s1400_s1 + $0xe6] ss:$-24 sm:$0x3] %vm414_vm4, %v430_v23   ;;  %664 = vst.msk [vmem:[%s1400_s1 + $0x146] ss:$-24 sm:$0xc] %vm414_vm4, %v430_v23  }
  0x8a   :  { %665 = vst.msk [vmem:[%s1400_s1 + $0x1a6] ss:$-24 sm:$0x30] %vm414_vm4, %v430_v23   ;;  %666 = vst.msk [vmem:[%s1400_s1 + $0x206] ss:$-24 sm:$0xc0] %vm414_vm4, %v430_v23  }
  0x8b   :  { %528 = vst.msk [vmem:[%s1400_s1 + $0xc1] ss:$72 sm:$0x3] %vm3_vm2, %v80_v24   ;;  %529 = vst.msk [vmem:[%s1400_s1 + $0x121] ss:$-24 sm:$0xc] %vm3_vm2, %v80_v24  }
  0x8c   :  { %530 = vst.msk [vmem:[%s1400_s1 + $0x1] ss:$72 sm:$0x30] %vm3_vm2, %v80_v24   ;;  %531 = vst.msk [vmem:[%s1400_s1 + $0x1e1] ss:$-24 sm:$0xc0] %vm3_vm2, %v80_v24   ;;  %v132_v28 = vpop.permute.xlu1 %131   ;;  %v119_v29 = vpop.permute.xlu0 %118  }
  0x8d   :  { %678 = vst.msk [vmem:[%s1400_s1 + $0xc7] ss:$72 sm:$0x3] %vm456_vm5, %v481_v25   ;;  %679 = vst.msk [vmem:[%s1400_s1 + $0x127] ss:$-24 sm:$0xc] %vm456_vm5, %v481_v25  }
  0x8e   :  { %680 = vst.msk [vmem:[%s1400_s1 + $0x7] ss:$72 sm:$0x30] %vm456_vm5, %v481_v25   ;;  %681 = vst.msk [vmem:[%s1400_s1 + $0x1e7] ss:$-24 sm:$0xc0] %vm456_vm5, %v481_v25  }
  0x8f   :  { %682 = vst.msk [vmem:[%s1400_s1 + $0xc7] ss:$72 sm:$0x3] %vm465_vm6, %v481_v25   ;;  %683 = vst.msk [vmem:[%s1400_s1 + $0x127] ss:$-24 sm:$0xc] %vm465_vm6, %v481_v25  }
  0x90   :  { %684 = vst.msk [vmem:[%s1400_s1 + $0x7] ss:$72 sm:$0x30] %vm465_vm6, %v481_v25   ;;  %685 = vst.msk [vmem:[%s1400_s1 + $0x1e7] ss:$-24 sm:$0xc0] %vm465_vm6, %v481_v25   ;;  %v157_v30 = vpop.permute.xlu1 %156   ;;  %v144_v31 = vpop.permute.xlu0 %143  }
  0x91   :  { %538 = vst.msk [vmem:[%s1400_s1 + $0x100] ss:$-24 sm:$0x7] %vm3_vm2, %v106_v26   ;;  %539 = vst.msk [vmem:[%s1400_s1 + $0x40] ss:$72 sm:$0x18] %vm3_vm2, %v106_v26  }
  0x92   :  { %540 = vst.msk [vmem:[%s1400_s1 + $0x1c0] ss:$-24 sm:$0x60] %vm3_vm2, %v106_v26   ;;  %541 = vst.msk [vmem:[%s1400_s1 + $0x171] sm:$0x80] %vm3_vm2, %v106_v26  }
  0x93   :  { %533 = vst.msk [vmem:[%s1400_s1 + $0x40] ss:$-24 sm:$0x7] %vm3_vm2, %v93_v27   ;;  %534 = vst.msk [vmem:[%s1400_s1 - $0x80] ss:$72 sm:$0x18] %vm3_vm2, %v93_v27  }
  0x94   :  { %535 = vst.msk [vmem:[%s1400_s1 + $0x100] ss:$-24 sm:$0x60] %vm3_vm2, %v93_v27   ;;  %536 = vst.msk [vmem:[%s1400_s1 + $0xb1] sm:$0x80] %vm3_vm2, %v93_v27   ;;  %v183_v32 = vpop.permute.xlu1 %182   ;;  %v170_v33 = vpop.permute.xlu0 %169  }
  0x95   :  { %548 = vst.msk [vmem:[%s1400_s1 + $0xe1] ss:$-24 sm:$0x3] %vm3_vm2, %v132_v28   ;;  %549 = vst.msk [vmem:[%s1400_s1 + $0x141] ss:$-24 sm:$0xc] %vm3_vm2, %v132_v28  }
  0x96   :  { %550 = vst.msk [vmem:[%s1400_s1 + $0x1a1] ss:$-24 sm:$0x30] %vm3_vm2, %v132_v28   ;;  %551 = vst.msk [vmem:[%s1400_s1 + $0x201] ss:$-24 sm:$0xc0] %vm3_vm2, %v132_v28  }
  0x97   :  { %543 = vst.msk [vmem:[%s1400_s1 + $0x21] ss:$-24 sm:$0x3] %vm3_vm2, %v119_v29   ;;  %544 = vst.msk [vmem:[%s1400_s1 + $0x81] ss:$-24 sm:$0xc] %vm3_vm2, %v119_v29  }
  0x98   :  { %545 = vst.msk [vmem:[%s1400_s1 + $0xe1] ss:$-24 sm:$0x30] %vm3_vm2, %v119_v29   ;;  %546 = vst.msk [vmem:[%s1400_s1 + $0x141] ss:$-24 sm:$0xc0] %vm3_vm2, %v119_v29   ;;  %v209_v34 = vpop.permute.xlu1 %208   ;;  %v196_v35 = vpop.permute.xlu0 %195  }
  0x99   :  { %557 = vst.msk [vmem:[%s1400_s1 + $0xc2] ss:$72 sm:$0x3] %vm3_vm2, %v157_v30   ;;  %558 = vst.msk [vmem:[%s1400_s1 + $0x122] ss:$-24 sm:$0xc] %vm3_vm2, %v157_v30  }
  0x9a   :  { %559 = vst.msk [vmem:[%s1400_s1 + $0x2] ss:$72 sm:$0x30] %vm3_vm2, %v157_v30   ;;  %560 = vst.msk [vmem:[%s1400_s1 + $0x1e2] ss:$-24 sm:$0xc0] %vm3_vm2, %v157_v30  }
  0x9b   :  { %552 = vst.msk [vmem:[%s1400_s1 + $0x2] ss:$72 sm:$0x3] %vm3_vm2, %v144_v31   ;;  %553 = vst.msk [vmem:[%s1400_s1 + $0x62] ss:$-24 sm:$0xc] %vm3_vm2, %v144_v31  }
  0x9c   :  { %554 = vst.msk [vmem:[%s1400_s1 - $0xbe] ss:$72 sm:$0x30] %vm3_vm2, %v144_v31   ;;  %555 = vst.msk [vmem:[%s1400_s1 + $0x122] ss:$-24 sm:$0xc0] %vm3_vm2, %v144_v31   ;;  %v234_v36 = vpop.permute.xlu1 %233   ;;  %v221_v37 = vpop.permute.xlu0 %220  }
  0x9d   :  { %567 = vst.msk [vmem:[%s1400_s1 + $0x101] ss:$-24 sm:$0x7] %vm3_vm2, %v183_v32   ;;  %568 = vst.msk [vmem:[%s1400_s1 + $0x41] ss:$72 sm:$0x18] %vm3_vm2, %v183_v32  }
  0x9e   :  { %569 = vst.msk [vmem:[%s1400_s1 + $0x1c1] ss:$-24 sm:$0x60] %vm3_vm2, %v183_v32   ;;  %570 = vst.msk [vmem:[%s1400_s1 + $0x172] sm:$0x80] %vm3_vm2, %v183_v32  }
  0x9f   :  { %562 = vst.msk [vmem:[%s1400_s1 + $0x41] ss:$-24 sm:$0x7] %vm3_vm2, %v170_v33   ;;  %563 = vst.msk [vmem:[%s1400_s1 - $0x7f] ss:$72 sm:$0x18] %vm3_vm2, %v170_v33  }
  0xa0   :  { %564 = vst.msk [vmem:[%s1400_s1 + $0x101] ss:$-24 sm:$0x60] %vm3_vm2, %v170_v33   ;;  %565 = vst.msk [vmem:[%s1400_s1 + $0xb2] sm:$0x80] %vm3_vm2, %v170_v33   ;;  %v260_v38 = vpop.permute.xlu1 %259   ;;  %v247_v39 = vpop.permute.xlu0 %246  }
  0xa1   :  { %577 = vst.msk [vmem:[%s1400_s1 + $0xe2] ss:$-24 sm:$0x3] %vm3_vm2, %v209_v34   ;;  %578 = vst.msk [vmem:[%s1400_s1 + $0x142] ss:$-24 sm:$0xc] %vm3_vm2, %v209_v34  }
  0xa2   :  { %579 = vst.msk [vmem:[%s1400_s1 + $0x1a2] ss:$-24 sm:$0x30] %vm3_vm2, %v209_v34   ;;  %580 = vst.msk [vmem:[%s1400_s1 + $0x202] ss:$-24 sm:$0xc0] %vm3_vm2, %v209_v34  }
  0xa3   :  { %572 = vst.msk [vmem:[%s1400_s1 + $0x22] ss:$-24 sm:$0x3] %vm3_vm2, %v196_v35   ;;  %573 = vst.msk [vmem:[%s1400_s1 + $0x82] ss:$-24 sm:$0xc] %vm3_vm2, %v196_v35  }
  0xa4   :  { %574 = vst.msk [vmem:[%s1400_s1 + $0xe2] ss:$-24 sm:$0x30] %vm3_vm2, %v196_v35   ;;  %575 = vst.msk [vmem:[%s1400_s1 + $0x142] ss:$-24 sm:$0xc0] %vm3_vm2, %v196_v35   ;;  %v285_v40 = vpop.permute.xlu1 %284   ;;  %v272_v41 = vpop.permute.xlu0 %271  }
  0xa5   :  { %586 = vst.msk [vmem:[%s1400_s1 + $0xc3] ss:$72 sm:$0x3] %vm3_vm2, %v234_v36   ;;  %587 = vst.msk [vmem:[%s1400_s1 + $0x123] ss:$-24 sm:$0xc] %vm3_vm2, %v234_v36  }
  0xa6   :  { %588 = vst.msk [vmem:[%s1400_s1 + $0x3] ss:$72 sm:$0x30] %vm3_vm2, %v234_v36   ;;  %589 = vst.msk [vmem:[%s1400_s1 + $0x1e3] ss:$-24 sm:$0xc0] %vm3_vm2, %v234_v36  }
  0xa7   :  { %581 = vst.msk [vmem:[%s1400_s1 + $0x3] ss:$72 sm:$0x3] %vm3_vm2, %v221_v37   ;;  %582 = vst.msk [vmem:[%s1400_s1 + $0x63] ss:$-24 sm:$0xc] %vm3_vm2, %v221_v37  }
  0xa8   :  { %583 = vst.msk [vmem:[%s1400_s1 - $0xbd] ss:$72 sm:$0x30] %vm3_vm2, %v221_v37   ;;  %584 = vst.msk [vmem:[%s1400_s1 + $0x123] ss:$-24 sm:$0xc0] %vm3_vm2, %v221_v37   ;;  %v311_v42 = vpop.permute.xlu1 %310   ;;  %v298_v43 = vpop.permute.xlu0 %297  }
  0xa9   :  { %596 = vst.msk [vmem:[%s1400_s1 + $0xe3] ss:$-24 sm:$0x3] %vm3_vm2, %v260_v38   ;;  %597 = vst.msk [vmem:[%s1400_s1 + $0x143] ss:$-24 sm:$0xc] %vm3_vm2, %v260_v38  }
  0xaa   :  { %598 = vst.msk [vmem:[%s1400_s1 + $0x1a3] ss:$-24 sm:$0x30] %vm3_vm2, %v260_v38   ;;  %599 = vst.msk [vmem:[%s1400_s1 + $0x203] ss:$-24 sm:$0xc0] %vm3_vm2, %v260_v38  }
  0xab   :  { %591 = vst.msk [vmem:[%s1400_s1 + $0x23] ss:$-24 sm:$0x3] %vm3_vm2, %v247_v39   ;;  %592 = vst.msk [vmem:[%s1400_s1 + $0x83] ss:$-24 sm:$0xc] %vm3_vm2, %v247_v39  }
  0xac   :  { %593 = vst.msk [vmem:[%s1400_s1 + $0xe3] ss:$-24 sm:$0x30] %vm3_vm2, %v247_v39   ;;  %594 = vst.msk [vmem:[%s1400_s1 + $0x143] ss:$-24 sm:$0xc0] %vm3_vm2, %v247_v39   ;;  %v336_v44 = vpop.permute.xlu1 %335   ;;  %v323_v45 = vpop.permute.xlu0 %322  }
  0xad   :  { %605 = vst.msk [vmem:[%s1400_s1 + $0xc4] ss:$72 sm:$0x3] %vm3_vm2, %v285_v40   ;;  %606 = vst.msk [vmem:[%s1400_s1 + $0x124] ss:$-24 sm:$0xc] %vm3_vm2, %v285_v40  }
  0xae   :  { %607 = vst.msk [vmem:[%s1400_s1 + $0x4] ss:$72 sm:$0x30] %vm3_vm2, %v285_v40   ;;  %608 = vst.msk [vmem:[%s1400_s1 + $0x1e4] ss:$-24 sm:$0xc0] %vm3_vm2, %v285_v40  }
  0xaf   :  { %600 = vst.msk [vmem:[%s1400_s1 + $0x4] ss:$72 sm:$0x3] %vm3_vm2, %v272_v41   ;;  %601 = vst.msk [vmem:[%s1400_s1 + $0x64] ss:$-24 sm:$0xc] %vm3_vm2, %v272_v41  }
  0xb0   :  { %602 = vst.msk [vmem:[%s1400_s1 - $0xbc] ss:$72 sm:$0x30] %vm3_vm2, %v272_v41   ;;  %603 = vst.msk [vmem:[%s1400_s1 + $0x124] ss:$-24 sm:$0xc0] %vm3_vm2, %v272_v41   ;;  %v362_v46 = vpop.permute.xlu1 %361   ;;  %v349_v47 = vpop.permute.xlu0 %348  }
  0xb1   :  { %615 = vst.msk [vmem:[%s1400_s1 + $0xe4] ss:$-24 sm:$0x3] %vm3_vm2, %v311_v42   ;;  %616 = vst.msk [vmem:[%s1400_s1 + $0x144] ss:$-24 sm:$0xc] %vm3_vm2, %v311_v42  }
  0xb2   :  { %617 = vst.msk [vmem:[%s1400_s1 + $0x1a4] ss:$-24 sm:$0x30] %vm3_vm2, %v311_v42   ;;  %618 = vst.msk [vmem:[%s1400_s1 + $0x204] ss:$-24 sm:$0xc0] %vm3_vm2, %v311_v42  }
  0xb3   :  { %610 = vst.msk [vmem:[%s1400_s1 + $0x24] ss:$-24 sm:$0x3] %vm3_vm2, %v298_v43   ;;  %611 = vst.msk [vmem:[%s1400_s1 + $0x84] ss:$-24 sm:$0xc] %vm3_vm2, %v298_v43  }
  0xb4   :  { %612 = vst.msk [vmem:[%s1400_s1 + $0xe4] ss:$-24 sm:$0x30] %vm3_vm2, %v298_v43   ;;  %613 = vst.msk [vmem:[%s1400_s1 + $0x144] ss:$-24 sm:$0xc0] %vm3_vm2, %v298_v43   ;;  %v387_v48 = vpop.permute.xlu1 %386   ;;  %v374_v49 = vpop.permute.xlu0 %373  }
  0xb5   :  { %624 = vst.msk [vmem:[%s1400_s1 + $0xc5] ss:$72 sm:$0x3] %vm3_vm2, %v336_v44   ;;  %625 = vst.msk [vmem:[%s1400_s1 + $0x125] ss:$-24 sm:$0xc] %vm3_vm2, %v336_v44  }
  0xb6   :  { %626 = vst.msk [vmem:[%s1400_s1 + $0x5] ss:$72 sm:$0x30] %vm3_vm2, %v336_v44   ;;  %627 = vst.msk [vmem:[%s1400_s1 + $0x1e5] ss:$-24 sm:$0xc0] %vm3_vm2, %v336_v44  }
  0xb7   :  { %619 = vst.msk [vmem:[%s1400_s1 + $0x5] ss:$72 sm:$0x3] %vm3_vm2, %v323_v45   ;;  %620 = vst.msk [vmem:[%s1400_s1 + $0x65] ss:$-24 sm:$0xc] %vm3_vm2, %v323_v45  }
  0xb8   :  { %621 = vst.msk [vmem:[%s1400_s1 - $0xbb] ss:$72 sm:$0x30] %vm3_vm2, %v323_v45   ;;  %622 = vst.msk [vmem:[%s1400_s1 + $0x125] ss:$-24 sm:$0xc0] %vm3_vm2, %v323_v45  }
  0xb9   :  { %634 = vst.msk [vmem:[%s1400_s1 + $0xe5] ss:$-24 sm:$0x3] %vm3_vm2, %v362_v46   ;;  %635 = vst.msk [vmem:[%s1400_s1 + $0x145] ss:$-24 sm:$0xc] %vm3_vm2, %v362_v46  }
  0xba   :  { %636 = vst.msk [vmem:[%s1400_s1 + $0x1a5] ss:$-24 sm:$0x30] %vm3_vm2, %v362_v46   ;;  %637 = vst.msk [vmem:[%s1400_s1 + $0x205] ss:$-24 sm:$0xc0] %vm3_vm2, %v362_v46  }
  0xbb   :  { %629 = vst.msk [vmem:[%s1400_s1 + $0x25] ss:$-24 sm:$0x3] %vm3_vm2, %v349_v47   ;;  %630 = vst.msk [vmem:[%s1400_s1 + $0x85] ss:$-24 sm:$0xc] %vm3_vm2, %v349_v47  }
  0xbc   :  { %631 = vst.msk [vmem:[%s1400_s1 + $0xe5] ss:$-24 sm:$0x30] %vm3_vm2, %v349_v47   ;;  %632 = vst.msk [vmem:[%s1400_s1 + $0x145] ss:$-24 sm:$0xc0] %vm3_vm2, %v349_v47  }
  0xbd   :  { %643 = vst.msk [vmem:[%s1400_s1 + $0xc6] ss:$72 sm:$0x3] %vm3_vm2, %v387_v48   ;;  %644 = vst.msk [vmem:[%s1400_s1 + $0x126] ss:$-24 sm:$0xc] %vm3_vm2, %v387_v48  }
  0xbe   :  { %645 = vst.msk [vmem:[%s1400_s1 + $0x6] ss:$72 sm:$0x30] %vm3_vm2, %v387_v48   ;;  %646 = vst.msk [vmem:[%s1400_s1 + $0x1e6] ss:$-24 sm:$0xc0] %vm3_vm2, %v387_v48  }
  0xbf   :  { %638 = vst.msk [vmem:[%s1400_s1 + $0x6] ss:$72 sm:$0x3] %vm3_vm2, %v374_v49   ;;  %639 = vst.msk [vmem:[%s1400_s1 + $0x66] ss:$-24 sm:$0xc] %vm3_vm2, %v374_v49  }
  0xc0   :  { %640 = vst.msk [vmem:[%s1400_s1 - $0xba] ss:$72 sm:$0x30] %vm3_vm2, %v374_v49   ;;  %641 = vst.msk [vmem:[%s1400_s1 + $0x126] ss:$-24 sm:$0xc0] %vm3_vm2, %v374_v49  }

// kernel: squeeze.7
= control target key start
LH: loop header
LB: loop body
LE: loop exit
PB: predicated region body
PF: predicated region fallthrough
CT: control target
= control target key end

     0   :  { %s237_s0 = inlined_call_operand.vmem [shape: f32[324], index: 0, kind: input, shape index: {}]   ;;  %s238_s1 = inlined_call_operand.hbm [shape: f32[18,18], index: 1, kind: output, shape index: {}]  }
   0x1   :  { %v6_v0 = vld [vmem:[%s237_s0] sm:$0xf] }
   0x2   :  { %7 = vst [vmem:[#allocation2] sm:$0xf] %v6_v0 }
   0x3   :  { %2 = vsyncpa [#allocation1], 0  ;;  %vm114_vm0 = vcmask 1014784   ;;  %s187_s0 = smov 110   ;;  %s188_s8 = smov 114   ;;  %vm127_vm1 = vcmask 1031168  }
   0x4   :  { %s189_s9 = smov 4   ;;  %s190_s10 = smov 112   ;;  %vm9_vm2 = vcmask 146432   ;;  %vm118_vm3 = vcmask 31744   ;;  %vm121_vm4 = vcmask 146464   ;;  %vm131_vm5 = vcmask 15360  }
   0x5   :  { %s191_s11 = smov 2   ;;  %s192_s12 = smov 96   ;;  %vm134_vm6 = vcmask 146448  }
   0x6   :  { %s193_s13 = smov 94   ;;  %s194_s14 = smov 92  }
   0x7   :  { %s195_s15 = smov 78   ;;  %s196_s16 = smov 76  }
   0x8   :  { %s197_s17 = smov 74   ;;  %s198_s18 = smov 58  }
   0x9   :  { %v25_v1 = vld [vmem:[#allocation2] sm:$0x1]   ;;  %v111_v2 = vld [vmem:[#allocation2 + $0x1] sm:$0x1]   ;;  %v113_v3 = vld [vmem:[#allocation2 + $0x2] sm:$0x1]  }
   0xa   :  { %26 = vrot.lane.b32.xlu0 %v25_v1, %s187_s0  ;;  %v12_v4 = vld [vmem:[#allocation2 + $0x2] sm:$0x1]   ;;  %v115_v5 = vsel %vm114_vm0, %v113_v3, %v111_v2  ;;  %v124_v6 = vld [vmem:[#allocation2] sm:$0x1]   ;;  %v126_v7 = vld [vmem:[#allocation2 + $0x1] sm:$0x1]  }
   0xb   :  { %13 = vrot.lane.b32.xlu1 %v12_v4, %s188_s8  ;;  %v19_v8 = vld [vmem:[#allocation2 + $0x1] sm:$0x1]   ;;  %v128_v9 = vsel %vm127_vm1, %v126_v7, %v124_v6  ;;  %v32_v10 = vld [vmem:[#allocation2 + $0x2] sm:$0x1]   ;;  %v45_v12 = vld [vmem:[#allocation2] sm:$0x1]  }
   0xc   :  { %v39_v11 = vld [vmem:[#allocation2 + $0x1] sm:$0x1]   ;;  %v52_v13 = vld [vmem:[#allocation2 + $0x2] sm:$0x1]   ;;  %v65_v15 = vld [vmem:[#allocation2] sm:$0x1]  }
   0xd   :  { %v59_v14 = vld [vmem:[#allocation2 + $0x1] sm:$0x1]   ;;  %v8_v17 = vld [vmem:[#allocation2] sm:$0x1]   ;;  %s199_s19 = smov 56   ;;  %s200_s20 = smov 40  }
   0xe   :  { %116 = vrot.lane.b32.xlu0 %v115_v5, %s189_s9  ;;  %v72_v16 = vld [vmem:[#allocation2 + $0x1] sm:$0x1]   ;;  %10 = vst.msk [vmem:[#allocation0] sm:$0x1] %vm9_vm2, %v8_v17   ;;  %v78_v18 = vld [vmem:[#allocation2] sm:$0x1]  }
   0xf   :  { %20 = vrot.lane.b32.xlu1 %v19_v8, %s190_s10  ;;  %v85_v19 = vld [vmem:[#allocation2 + $0x1] sm:$0x1]   ;;  %v91_v20 = vld [vmem:[#allocation2] sm:$0x1]   ;;  %s201_s21 = smov 38   ;;  %s202_s22 = smov 22  }
  0x10   :  { %v98_v21 = vld [vmem:[#allocation2 + $0x1] sm:$0x1]   ;;  %v104_v22 = vld [vmem:[#allocation2] sm:$0x1]   ;;  %s203_s23 = smov 20   ;;  %s204_s24 = smov [#allocation0]  }
  0x11   :  { %s141_s25 = sshll.u32 %s204_s24, 4  ;;  %s142_s25 = int_to_ptr.vmem [resolvable:$true] %s141_s25 }
  0x12   :  { %129 = vrot.lane.b32.xlu0 %v128_v9, %s191_s11  ;;  %s165_s26 = scalar_lea.vmem %s142_s25, 384  ;;  %p170_p1 = scmp.lt.s32.totalorder %s142_s25, %s142_s25 }
  0x13   :  { %33 = vrot.lane.b32.xlu1 %v32_v10, %s192_s12  ;;  %p166_p0 = scmp.ne.s32.totalorder %s142_s25, %s165_s26  ;;  %p171_p2 = scmp.lt.s32.totalorder %s165_s26, %s165_s26 }
  0x15   :  { %p172_p3 = por %p171_p2, %p170_p1 }
  0x16   :  { %40 = vrot.lane.b32.xlu0 %v39_v11, %s193_s13 }
  0x17   :  { %46 = vrot.lane.b32.xlu1 %v45_v12, %s194_s14  ;;  %p173_p4 = pnand %p172_p3, %p166_p0 }
  0x1a   :  { %53 = vrot.lane.b32.xlu0 %v52_v13, %s195_s15 }
  0x1b   :  { %60 = vrot.lane.b32.xlu1 %v59_v14, %s196_s16 }
  0x1e   :  { %66 = vrot.lane.b32.xlu0 %v65_v15, %s197_s17 }
  0x1f   :  { %73 = vrot.lane.b32.xlu1 %v72_v16, %s198_s18 }
  0x22   :  { %79 = vrot.lane.b32.xlu0 %v78_v18, %s199_s19 }
  0x23   :  { %86 = vrot.lane.b32.xlu1 %v85_v19, %s200_s20 }
  0x26   :  { %92 = vrot.lane.b32.xlu0 %v91_v20, %s201_s21 }
  0x27   :  { %99 = vrot.lane.b32.xlu1 %v98_v21, %s202_s22 }
  0x2a   :  { %105 = vrot.lane.b32.xlu0 %v104_v22, %s203_s23 }
  0x7c   :  { %v27_v23 = vpop.permute.xlu0 %26  }
  0x7d   :  { %30 = vst.msk [vmem:[#allocation0 + $0x1] sm:$0x1] %vm9_vm2, %v27_v23   ;;  %v14_v24 = vpop.permute.xlu1 %13  }
  0x7e   :  { %17 = vst.msk [vmem:[#allocation0 + $0xf] sm:$0x1] %vm9_vm2, %v14_v24  }
  0x80   :  { %v117_v25 = vpop.permute.xlu0 %116  }
  0x81   :  { %120 = vst.msk [vmem:[#allocation0 + $0xe] sm:$0x1] %vm118_vm3, %v117_v25   ;;  %v21_v26 = vpop.permute.xlu1 %20  }
  0x82   :  { %123 = vst.msk [vmem:[#allocation0 + $0xe] sm:$0x1] %vm121_vm4, %v117_v25  }
  0x83   :  { %24 = vst.msk [vmem:[#allocation0 + $0x8] sm:$0x1] %vm9_vm2, %v21_v26  }
  0x84   :  { %v130_v27 = vpop.permute.xlu0 %129  }
  0x85   :  { %133 = vst.msk [vmem:[#allocation0 + $0x7] sm:$0x1] %vm131_vm5, %v130_v27   ;;  %v34_v28 = vpop.permute.xlu1 %33  }
  0x86   :  { %136 = vst.msk [vmem:[#allocation0 + $0x7] sm:$0x1] %vm134_vm6, %v130_v27  }
  0x87   :  { %37 = vst.msk [vmem:[#allocation0 + $0x10] sm:$0x1] %vm9_vm2, %v34_v28  }
  0x88   :  { %v41_v29 = vpop.permute.xlu0 %40  }
  0x89   :  { %44 = vst.msk [vmem:[#allocation0 + $0x9] sm:$0x1] %vm9_vm2, %v41_v29   ;;  %v47_v30 = vpop.permute.xlu1 %46  }
  0x8a   :  { %50 = vst.msk [vmem:[#allocation0 + $0x2] sm:$0x1] %vm9_vm2, %v47_v30  }
  0x8c   :  { %v54_v31 = vpop.permute.xlu0 %53  }
  0x8d   :  { %57 = vst.msk [vmem:[#allocation0 + $0x11] sm:$0x1] %vm9_vm2, %v54_v31   ;;  %v61_v32 = vpop.permute.xlu1 %60  }
  0x8e   :  { %64 = vst.msk [vmem:[#allocation0 + $0xa] sm:$0x1] %vm9_vm2, %v61_v32  }
  0x90   :  { %v67_v33 = vpop.permute.xlu0 %66  }
  0x91   :  { %70 = vst.msk [vmem:[#allocation0 + $0x3] sm:$0x1] %vm9_vm2, %v67_v33   ;;  %v74_v34 = vpop.permute.xlu1 %73  }
  0x92   :  { %77 = vst.msk [vmem:[#allocation0 + $0xb] sm:$0x1] %vm9_vm2, %v74_v34  }
  0x94   :  { %v80_v35 = vpop.permute.xlu0 %79  }
  0x95   :  { %83 = vst.msk [vmem:[#allocation0 + $0x4] sm:$0x1] %vm9_vm2, %v80_v35   ;;  %v87_v36 = vpop.permute.xlu1 %86  }
  0x96   :  { %90 = vst.msk [vmem:[#allocation0 + $0xc] sm:$0x1] %vm9_vm2, %v87_v36  }
  0x98   :  { %v93_v37 = vpop.permute.xlu0 %92  }
  0x99   :  { %96 = vst.msk [vmem:[#allocation0 + $0x5] sm:$0x1] %vm9_vm2, %v93_v37   ;;  %v100_v38 = vpop.permute.xlu1 %99  }
  0x9a   :  { %103 = vst.msk [vmem:[#allocation0 + $0xd] sm:$0x1] %vm9_vm2, %v100_v38  }
  0x9c   :  { %v106_v39 = vpop.permute.xlu0 %105  }
  0x9d   :  { %109 = vst.msk [vmem:[#allocation0 + $0x6] sm:$0x1] %vm9_vm2, %v106_v39  }
  0x9e   :  { %176 = shalt.err (!%p173_p4)
}
  0x9f   :  { %144 = dma.vmem_to_hbm [thread:$0]  %s142_s25, 384, %s238_s1, [#allocation1]  }
  0xa0   :  { %185 = dma.done.wait [#allocation1], 384  }
  0xa1   :  { %186 = vsyncadd [#allocation1], 4294966912 }
  0xa2   :  { %146 = vsyncpa [#allocation1], 1 }

// kernel: model_forward.1
= control target key start
LH: loop header
LB: loop body
LE: loop exit
PB: predicated region body
PF: predicated region fallthrough
CT: control target
= control target key end

     0   :  { %14 = vsyncpa [#allocation3], 0  ;;  %s3897_s27 = smov [#allocation2]   ;;  %s6556_s0 = inlined_call_operand.vmem [shape: f32[8,768], index: 0, kind: input, shape index: {}]   ;;  %s6557_s1 = inlined_call_operand.vmem [shape: f32[16,8], index: 1, kind: input, shape index: {}]   ;;  %s6558_s2 = inlined_call_operand.vmem [shape: f32[8,3], index: 2, kind: input, shape index: {}]   ;;  %s6559_s3 = inlined_call_operand.vmem [shape: f32[8,3], index: 3, kind: input, shape index: {}]   ;;  %s6560_s4 = inlined_call_operand.vmem [shape: f32[128,16], index: 4, kind: input, shape index: {}]   ;;  %s6561_s5 = inlined_call_operand.vmem [shape: s32[128,4], index: 5, kind: input, shape index: {}]   ;;  %s6562_s6 = inlined_call_operand.hbm [shape: f32[512,384], index: 6, kind: input, shape index: {}]   ;;  %s6563_s7 = inlined_call_operand.vmem [shape: f32[24,768], index: 7, kind: output, shape index: {0}]   ;;  %s6564_s8 = inlined_call_operand.vmem [shape: f32[1,384], index: 8, kind: output, shape index: {1}]  }
   0x1   :  { %s32_s28 = sshll.u32 %s3897_s27, 4  ;;  %s33_s28 = int_to_ptr.vmem [resolvable:$true] %s32_s28 }
   0x2   :  { %s3883_s29 = scalar_lea.vmem %s33_s28, 24576  ;;  %p3888_p1 = scmp.lt.s32.totalorder %s33_s28, %s33_s28 }
   0x3   :  { %p3884_p0 = scmp.ne.s32.totalorder %s33_s28, %s3883_s29  ;;  %p3889_p2 = scmp.lt.s32.totalorder %s3883_s29, %s3883_s29 }
   0x5   :  { %p3890_p3 = por %p3889_p2, %p3888_p1 }
   0x7   :  { %p3891_p4 = pnand %p3890_p3, %p3884_p0 }
   0x9   :  { %3894 = shalt.err (!%p3891_p4)
}
   0xa   :  { %s3898_s30 = smov 384   ;;  %s3899_s9 = smov 24  }
   0xb   :  { %38 = dma.hbm_to_vmem [thread:$0]  %s6562_s6, 24576, %s33_s28, [#allocation3], %s3898_s30, %s3898_s30, %s3899_s9  }
   0xc   :  { %3895 = dma.done.wait [#allocation3], 24576  }
   0xd   :  { %3896 = vsyncadd [#allocation3], 4294942720  ;;  %v3900_v0 = vmov 0.0   ;;  %v3901_v1 = vmov 0   ;;  %vm50_vm0 = vcmask 64512   ;;  %v45_v2 = vld [vmem:[%s6556_s0 + $0x8] sm:$0xff] }
   0xe   :  { %123 = vmatprep.mubr.f32.mxu0 %v3900_v0  ;;  %220 = vmatprep.mubr.f32.mxu1 %v3900_v0  ;;  %v44_v3 = vld [vmem:[%s6556_s0] sm:$0xff]  ;;  %v87_v5 = vand.u32 4294901760, %v45_v2  ;;  %v43_v8 = vld [vmem:[%s6557_s1 + $0x8] sm:$0xff]  ;;  %v47_v9 = vld [vmem:[%s6556_s0 + $0x18] sm:$0xff]  ;;  %v3902_v29 = vmov 1   ;;  %v3903_v43 = vmov 2  }
   0xf   :  { %3857 = vset.pattern.permute.xlu1 %v3901_v1  ;;  %3856 = vset.pattern.permute.xlu0 %v3901_v1  ;;  %v42_v4 = vld [vmem:[%s6557_s1] sm:$0xff]  ;;  %v89_v6 = vand.u32 4294901760, %v44_v3  ;;  %v55_v11 = vsel %vm50_vm0, %v43_v8, 0  ;;  %v3985_v17 = vand.u32 4294901760, %v47_v9  ;;  %v46_v27 = vld [vmem:[%s6556_s0 + $0x10] sm:$0xff]  ;;  %v49_v42 = vld [vmem:[%s6556_s0 + $0x28] sm:$0xff] }
  0x10   :  { %v52_v7 = vsel %vm50_vm0, %v42_v4, 0  ;;  %88 = vmatprep.subr.mxu0 %v87_v5  ;;  %v177_v12 = vsub.f32 %v45_v2, %v87_v5  ;;  %v3975_v14 = vand.u32 4294901760, %v55_v11  ;;  %v3980_v15 = vld [vmem:[%s6559_s3] sm:$0xff]  ;;  %v4016_v34 = vand.u32 4294901760, %v46_v27  ;;  %v4098_v56 = vld [vmem:[%s6561_s5 + $0x8] sm:$0xff]  ;;  %v4113_v58 = vld [vmem:[%s6561_s5 + $0x10] sm:$0xff] }
  0x11   :  { %v3973_v10 = vand.u32 4294901760, %v52_v7  ;;  %v183_v13 = vsub.f32 %v44_v3, %v89_v6  ;;  %90 = vmatpush1.msra.mxu0 %v89_v6  ;;  %1690 = vperm.xlu1 %3857, %v3980_v15   ;;  %v3997_v22 = vld [vmem:[%s6558_s2] sm:$0xff]  ;;  %v4008_v28 = vsub.f32 %v47_v9, %v3985_v17  ;;  %v4051_v45 = vand.u32 4294901760, %v49_v42  ;;  %v4156_v60 = vld [vmem:[%s6561_s5 + $0x30] sm:$0xff] }
  0x12   :  { %v178_v18 = vand.u32 4294901760, %v177_v12  ;;  %v3989_v20 = vsub.f32 %v55_v11, %v3975_v14  ;;  %267 = vmatprep.subr.mxu0 %v177_v12  ;;  %v4026_v37 = vsub.f32 %v46_v27, %v4016_v34  ;;  %v48_v46 = vld [vmem:[%s6556_s0 + $0x20] sm:$0xff]  ;;  %v4169_v62 = vld [vmem:[%s6561_s5 + $0x50] sm:$0xff]  ;;  %vm1773_vm1 = vcmask 130048  }
  0x13   :  { %v3983_v16 = vsub.f32 %v52_v7, %v3973_v10  ;;  %v184_v19 = vand.u32 4294901760, %v183_v13  ;;  %v692_v36 = vand.u32 4294901760, %v4008_v28  ;;  %v1205_v47 = vsub.f32 %v49_v42, %v4051_v45  ;;  %v4082_v52 = vld [vmem:[%s6561_s5] sm:$0xff] }
  0x14   :  { %v179_v23 = vsub.f32 %v177_v12, %v178_v18  ;;  %v4000_v25 = vand.u32 4294901760, %v3989_v20  ;;  %v698_v39 = vand.u32 4294901760, %v4026_v37  ;;  %v4068_v48 = vand.u32 4294901760, %v48_v46  ;;  %v4147_v59 = vld [vmem:[%s6561_s5 + $0x20] sm:$0xff] }
  0x15   :  { %v3992_v21 = vand.u32 4294901760, %v3983_v16  ;;  %v185_v24 = vsub.f32 %v183_v13, %v184_v19  ;;  %3858 = vset.pattern.permute.xlu1 %v3902_v29  ;;  %v693_v38 = vsub.f32 %v4008_v28, %v692_v36  ;;  %v1206_v49 = vand.u32 4294901760, %v1205_v47  ;;  %v4163_v61 = vld [vmem:[%s6561_s5 + $0x40] sm:$0xff] }
  0x16   :  { %v180_v30 = vand.u32 4294901760, %v179_v23  ;;  %v138_v32 = vsub.f32 %v3989_v20, %v4000_v25  ;;  %1700 = vperm.xlu1 %3858, %v3997_v22   ;;  %v699_v41 = vsub.f32 %v4026_v37, %v698_v39  ;;  %v1211_v50 = vsub.f32 %v48_v46, %v4068_v48 }
  0x17   :  { %v127_v26 = vsub.f32 %v3983_v16, %v3992_v21  ;;  %v186_v31 = vand.u32 4294901760, %v185_v24  ;;  %v694_v40 = vand.u32 4294901760, %v693_v38  ;;  %v1207_v51 = vsub.f32 %v1205_v47, %v1206_v49 }
  0x18   :  { %181 = vmatprep.subr.mxu1 %v180_v30  ;;  %v4019_v35 = vand.u32 4294901760, %v138_v32  ;;  %v700_v44 = vand.u32 4294901760, %v699_v41  ;;  %v1212_v53 = vand.u32 4294901760, %v1211_v50 }
  0x19   :  { %v4014_v33 = vand.u32 4294901760, %v127_v26  ;;  %187 = vmatpush1.msra.mxu1 %v186_v31  ;;  %v1208_v54 = vand.u32 4294901760, %v1207_v51 }
  0x1a   :  { %222 = vmatmul.mubr.f32.vlgmr.msra.gmra.mxu1 %v3973_v10  ;;  %351 = vmatprep.subr.mxu1 %v87_v5  ;;  %v1213_v55 = vsub.f32 %v1211_v50, %v1212_v53 }
  0x1b   :  { %129 = vmatmul.mubr.f32.vlgmr.msra.gmra.mxu0 %v4014_v33  ;;  %227 = vmatprep.mubr.f32.mxu1 %v3900_v0 }
  0x1c   :  { %134 = vmatprep.mubr.f32.mxu0 %v3900_v0  ;;  %270 = vmatpush1.msra.mxu0 %v183_v13  ;;  %v1214_v57 = vand.u32 4294901760, %v1213_v55 }
  0x1d   :  { %438 = vmatprep.subr.mxu0 %v178_v18  ;;  %353 = vmatpush1.msra.mxu1 %v89_v6 }
  0x1e   :  { %229 = vmatmul.mubr.f32.gmra.mxu1 %v3975_v14  ;;  %521 = vmatprep.subr.mxu1 %v87_v5 }
  0x1f   :  { %140 = vmatmul.mubr.f32.gmra.mxu0 %v4019_v35  ;;  %386 = vmatprep.mubr.f32.mxu1 %v3900_v0 }
  0x20   :  { %303 = vmatprep.mubr.f32.mxu0 %v3900_v0  ;;  %1710 = vperm.xlu1 %3858, %v3980_v15  }
  0x22   :  { %390 = vmatmul.mubr.f32.vlgmr.msra.gmra.mxu1 %v3992_v21 }
  0x23   :  { %306 = vmatmul.mubr.f32.vlgmr.msra.gmra.mxu0 %v3983_v16  ;;  %395 = vmatprep.mubr.f32.mxu1 %v3900_v0 }
  0x24   :  { %311 = vmatprep.mubr.f32.mxu0 %v3900_v0  ;;  %442 = vmatpush1.msra.mxu0 %v184_v19 }
  0x25   :  { %523 = vmatpush1.msra.mxu1 %v89_v6  ;;  %602 = vmatprep.subr.mxu0 %v3985_v17 }
  0x26   :  { %695 = vmatprep.subr.mxu1 %v694_v40  ;;  %399 = vmatmul.mubr.f32.gmra.mxu1 %v4000_v25 }
  0x27   :  { %314 = vmatmul.mubr.f32.gmra.mxu0 %v3989_v20  ;;  %556 = vmatprep.mubr.f32.mxu1 %v3900_v0 }
  0x28   :  { %475 = vmatprep.mubr.f32.mxu0 %v3900_v0  ;;  %3859 = vset.pattern.permute.xlu1 %v3903_v43 }
  0x29   :  { %1720 = vperm.xlu1 %3859, %v3997_v22  }
  0x2a   :  { %558 = vmatmul.mubr.f32.vlgmr.msra.gmra.mxu1 %v3973_v10 }
  0x2b   :  { %477 = vmatmul.mubr.f32.vlgmr.msra.gmra.mxu0 %v3973_v10  ;;  %563 = vmatprep.mubr.f32.mxu1 %v3900_v0 }
  0x2c   :  { %482 = vmatprep.mubr.f32.mxu0 %v3900_v0  ;;  %604 = vmatpush1.msra.mxu0 %v4016_v34 }
  0x2d   :  { %701 = vmatpush1.msra.mxu1 %v700_v44  ;;  %781 = vmatprep.subr.mxu0 %v4008_v28 }
  0x2e   :  { %865 = vmatprep.subr.mxu1 %v3985_v17  ;;  %565 = vmatmul.mubr.f32.gmra.mxu1 %v3975_v14 }
  0x2f   :  { %484 = vmatmul.mubr.f32.gmra.mxu0 %v3975_v14  ;;  %734 = vmatprep.mubr.f32.mxu1 %v3900_v0 }
  0x30   :  { %637 = vmatprep.mubr.f32.mxu0 %v3900_v0  ;;  %1730 = vperm.xlu1 %3859, %v3980_v15  }
  0x32   :  { %736 = vmatmul.mubr.f32.vlgmr.msra.gmra.mxu1 %v3973_v10 }
  0x33   :  { %643 = vmatmul.mubr.f32.vlgmr.msra.gmra.mxu0 %v4014_v33  ;;  %741 = vmatprep.mubr.f32.mxu1 %v3900_v0 }
  0x34   :  { %648 = vmatprep.mubr.f32.mxu0 %v3900_v0  ;;  %784 = vmatpush1.msra.mxu0 %v4026_v37 }
  0x35   :  { %867 = vmatpush1.msra.mxu1 %v4016_v34  ;;  %952 = vmatprep.subr.mxu0 %v692_v36 }
  0x36   :  { %1035 = vmatprep.subr.mxu1 %v3985_v17  ;;  %743 = vmatmul.mubr.f32.gmra.mxu1 %v3975_v14 }
  0x37   :  { %654 = vmatmul.mubr.f32.gmra.mxu0 %v4019_v35  ;;  %900 = vmatprep.mubr.f32.mxu1 %v3900_v0 }
  0x38   :  { %817 = vmatprep.mubr.f32.mxu0 %v3900_v0  ;;  %3860 = vset.pattern.permute.xlu1 %v3901_v1 }
  0x39   :  { %2197 = vperm.xlu1 %3860, %v4082_v52  }
  0x3a   :  { %904 = vmatmul.mubr.f32.vlgmr.msra.gmra.mxu1 %v3992_v21 }
  0x3b   :  { %820 = vmatmul.mubr.f32.vlgmr.msra.gmra.mxu0 %v3983_v16  ;;  %909 = vmatprep.mubr.f32.mxu1 %v3900_v0 }
  0x3c   :  { %825 = vmatprep.mubr.f32.mxu0 %v3900_v0  ;;  %956 = vmatpush1.msra.mxu0 %v698_v39 }
  0x3d   :  { %1037 = vmatpush1.msra.mxu1 %v4016_v34  ;;  %1116 = vmatprep.subr.mxu0 %v4051_v45 }
  0x3e   :  { %1209 = vmatprep.subr.mxu1 %v1208_v54  ;;  %913 = vmatmul.mubr.f32.gmra.mxu1 %v4000_v25 }
  0x3f   :  { %828 = vmatmul.mubr.f32.gmra.mxu0 %v3989_v20  ;;  %1070 = vmatprep.mubr.f32.mxu1 %v3900_v0 }
  0x40   :  { %989 = vmatprep.mubr.f32.mxu0 %v3900_v0  ;;  %2200 = vperm.xlu1 %3860, %v4098_v56  }
  0x42   :  { %1072 = vmatmul.mubr.f32.vlgmr.msra.gmra.mxu1 %v3973_v10 }
  0x43   :  { %991 = vmatmul.mubr.f32.vlgmr.msra.gmra.mxu0 %v3973_v10  ;;  %1077 = vmatprep.mubr.f32.mxu1 %v3900_v0 }
  0x44   :  { %996 = vmatprep.mubr.f32.mxu0 %v3900_v0  ;;  %1118 = vmatpush1.msra.mxu0 %v4068_v48 }
  0x45   :  { %1215 = vmatpush1.msra.mxu1 %v1214_v57  ;;  %1295 = vmatprep.subr.mxu0 %v1205_v47 }
  0x46   :  { %1379 = vmatprep.subr.mxu1 %v4051_v45  ;;  %1079 = vmatmul.mubr.f32.gmra.mxu1 %v3975_v14 }
  0x47   :  { %998 = vmatmul.mubr.f32.gmra.mxu0 %v3975_v14  ;;  %1248 = vmatprep.mubr.f32.mxu1 %v3900_v0 }
  0x48   :  { %1151 = vmatprep.mubr.f32.mxu0 %v3900_v0  ;;  %2203 = vperm.xlu1 %3860, %v4113_v58  }
  0x4a   :  { %1250 = vmatmul.mubr.f32.vlgmr.msra.gmra.mxu1 %v3973_v10 }
  0x4b   :  { %1157 = vmatmul.mubr.f32.vlgmr.msra.gmra.mxu0 %v4014_v33  ;;  %1255 = vmatprep.mubr.f32.mxu1 %v3900_v0 }
  0x4c   :  { %1162 = vmatprep.mubr.f32.mxu0 %v3900_v0  ;;  %1298 = vmatpush1.msra.mxu0 %v1211_v50 }
  0x4d   :  { %1381 = vmatpush1.msra.mxu1 %v4068_v48  ;;  %1466 = vmatprep.subr.mxu0 %v1206_v49 }
  0x4e   :  { %1549 = vmatprep.subr.mxu1 %v4051_v45  ;;  %1257 = vmatmul.mubr.f32.gmra.mxu1 %v3975_v14 }
  0x4f   :  { %1168 = vmatmul.mubr.f32.gmra.mxu0 %v4019_v35  ;;  %1414 = vmatprep.mubr.f32.mxu1 %v3900_v0 }
  0x50   :  { %1331 = vmatprep.mubr.f32.mxu0 %v3900_v0  ;;  %2209 = vperm.xlu1 %3860, %v4147_v59  }
  0x52   :  { %1418 = vmatmul.mubr.f32.vlgmr.msra.gmra.mxu1 %v3992_v21 }
  0x53   :  { %1334 = vmatmul.mubr.f32.vlgmr.msra.gmra.mxu0 %v3983_v16  ;;  %1423 = vmatprep.mubr.f32.mxu1 %v3900_v0 }
  0x54   :  { %1339 = vmatprep.mubr.f32.mxu0 %v3900_v0  ;;  %1470 = vmatpush1.msra.mxu0 %v1212_v53 }
  0x55   :  { %1551 = vmatpush1.msra.mxu1 %v4068_v48  ;;  %2215 = vperm.xlu1 %3860, %v4156_v60  }
  0x56   :  { %1427 = vmatmul.mubr.f32.gmra.mxu1 %v4000_v25 }
  0x57   :  { %1342 = vmatmul.mubr.f32.gmra.mxu0 %v3989_v20  ;;  %1584 = vmatprep.mubr.f32.mxu1 %v3900_v0 }
  0x58   :  { %1503 = vmatprep.mubr.f32.mxu0 %v3900_v0 }
  0x59   :  { %2221 = vperm.xlu1 %3860, %v4163_v61  }
  0x5a   :  { %1586 = vmatmul.mubr.f32.vlgmr.msra.gmra.mxu1 %v3973_v10 }
  0x5b   :  { %1505 = vmatmul.mubr.f32.vlgmr.msra.gmra.mxu0 %v3973_v10  ;;  %1591 = vmatprep.mubr.f32.mxu1 %v3900_v0 }
  0x5c   :  { %1510 = vmatprep.mubr.f32.mxu0 %v3900_v0 }
  0x5d   :  { %2227 = vperm.xlu1 %3860, %v4169_v62  }
  0x5e   :  { %1593 = vmatmul.mubr.f32.gmra.mxu1 %v3975_v14 }
  0x5f   :  { %1512 = vmatmul.mubr.f32.gmra.mxu0 %v3975_v14  ;;  %1958 = vmatprep.mubr.f32.mxu1 %v3900_v0 }
  0x60   :  { %1886 = vmatprep.mubr.f32.mxu0 %v3900_v0 }
  0xda   :  { %v4174_v1 = vpop.f32.mrf.mxu1 }
  0xdb   :  { %v4172_v63 = vpop.f32.mrf.mxu0 }
  0xdc   :  { %v225_v3 = vpop.f32.mrf.mxu1 }
  0xdd   :  { %v132_v2 = vpop.f32.mrf.mxu0 }
  0xde   :  { %v230_v5 = vpop.f32.mrf.mxu1 }
  0xdf   :  { %v141_v4 = vpop.f32.mrf.mxu0 }
  0xe0   :  { %v231_v6 = vadd.f32 %v230_v5, %v141_v4  ;;  %v232_v8 = vpop.f32.mrf.mxu1 }
  0xe1   :  { %v143_v7 = vpop.f32.mrf.mxu0 }
  0xe2   :  { %v233_v9 = vadd.f32 %v232_v8, %v143_v7  ;;  %v4176_v11 = vpop.f32.mrf.mxu1 }
  0xe3   :  { %v307_v10 = vpop.f32.mrf.mxu0 }
  0xe4   :  { %v4178_v13 = vpop.f32.mrf.mxu1 }
  0xe5   :  { %v309_v12 = vpop.f32.mrf.mxu0 }
  0xe6   :  { %v400_v16 = vpop.f32.mrf.mxu1 }
  0xe7   :  { %v315_v14 = vpop.f32.mrf.mxu0 }
  0xe8   :  { %v316_v15 = vadd.f32 %v315_v14, %v231_v6  ;;  %v402_v20 = vpop.f32.mrf.mxu1 }
  0xe9   :  { %v317_v17 = vpop.f32.mrf.mxu0 }
  0xea   :  { %v401_v18 = vadd.f32 %v400_v16, %v316_v15  ;;  %v318_v19 = vadd.f32 %v317_v17, %v233_v9  ;;  %v4182_v24 = vpop.f32.mrf.mxu1  ;;  %v226_v15 = vadd.f32 %v225_v3, %v132_v2 }
  0xeb   :  { %v4180_v21 = vpop.f32.mrf.mxu0 }
  0xec   :  { %v403_v23 = vadd.f32 %v402_v20, %v318_v19  ;;  %v4184_v26 = vpop.f32.mrf.mxu1  ;;  %v224_v19 = vadd.f32 %v4174_v1, %v4172_v63  ;;  %v310_v20 = vadd.f32 %v309_v12, %v226_v15 }
  0xed   :  { %v480_v25 = vpop.f32.mrf.mxu0 }
  0xee   :  { %v566_v30 = vpop.f32.mrf.mxu1  ;;  %v394_v2 = vadd.f32 %v4178_v13, %v310_v20 }
  0xef   :  { %v485_v27 = vpop.f32.mrf.mxu0 }
  0xf0   :  { %v486_v28 = vadd.f32 %v485_v27, %v401_v18  ;;  %v568_v34 = vpop.f32.mrf.mxu1  ;;  %v481_v1 = vadd.f32 %v480_v25, %v394_v2 }
  0xf1   :  { %v487_v31 = vpop.f32.mrf.mxu0 }
  0xf2   :  { %v4186_v32 = vadd.f32 %v566_v30, %v486_v28  ;;  %v488_v33 = vadd.f32 %v487_v31, %v403_v23  ;;  %v737_v37 = vpop.f32.mrf.mxu1 }
  0xf3   :  { %v644_v35 = vpop.f32.mrf.mxu0 }
  0xf4   :  { %v4188_v36 = vadd.f32 %v568_v34, %v488_v33  ;;  %v739_v39 = vpop.f32.mrf.mxu1  ;;  %v738_v23 = vadd.f32 %v737_v37, %v644_v35  ;;  %v308_v33 = vadd.f32 %v307_v10, %v224_v19 }
  0xf5   :  { %v646_v38 = vpop.f32.mrf.mxu0 }
  0xf6   :  { %v744_v41 = vpop.f32.mrf.mxu1  ;;  %v740_v3 = vadd.f32 %v739_v39, %v646_v38  ;;  %v392_v63 = vadd.f32 %v4176_v11, %v308_v33 }
  0xf7   :  { %v655_v40 = vpop.f32.mrf.mxu0 }
  0xf8   :  { %v745_v42 = vadd.f32 %v744_v41, %v655_v40  ;;  %v746_v45 = vpop.f32.mrf.mxu1 }
  0xf9   :  { %v657_v44 = vpop.f32.mrf.mxu0 }
  0xfa   :  { %v747_v46 = vadd.f32 %v746_v45, %v657_v44  ;;  %v905_v48 = vpop.f32.mrf.mxu1 }
  0xfb   :  { %v821_v47 = vpop.f32.mrf.mxu0 }
  0xfc   :  { %v907_v50 = vpop.f32.mrf.mxu1  ;;  %v822_v34 = vadd.f32 %v821_v47, %v738_v23 }
  0xfd   :  { %v823_v49 = vpop.f32.mrf.mxu0 }
  0xfe   :  { %v914_v54 = vpop.f32.mrf.mxu1  ;;  %v906_v12 = vadd.f32 %v905_v48, %v822_v34  ;;  %v824_v35 = vadd.f32 %v823_v49, %v740_v3 }
  0xff   :  { %v829_v51 = vpop.f32.mrf.mxu0 }
 0x100   :  { %v830_v53 = vadd.f32 %v829_v51, %v745_v42  ;;  %v916_v5 = vpop.f32.mrf.mxu1  ;;  %v479_v51 = vadd.f32 %v4180_v21, %v392_v63  ;;  %v908_v13 = vadd.f32 %v907_v50, %v824_v35 }
 0x101   :  { %v831_v55 = vpop.f32.mrf.mxu0 }
 0x102   :  { %v915_v57 = vadd.f32 %v914_v54, %v830_v53  ;;  %v832_v4 = vadd.f32 %v831_v55, %v747_v46  ;;  %v1073_v8 = vpop.f32.mrf.mxu1  ;;  %v4200_v55 = vadd.f32 %v4184_v26, %v481_v1  ;;  %v4203_v11 = vadd.f32 %v4182_v24, %v479_v51 }
 0x103   :  { %v992_v6 = vpop.f32.mrf.mxu0 }
 0x104   :  { %v917_v7 = vadd.f32 %v916_v5, %v832_v4  ;;  %v1075_v14 = vpop.f32.mrf.mxu1  ;;  %v993_v10 = vadd.f32 %v992_v6, %v906_v12  ;;  %v1599_v50 = vadd.f32 %v4200_v55, %v4203_v11  ;;  %v1613_v24 = vmul.f32 %v4203_v11, %v4203_v11 }
 0x105   :  { %v994_v9 = vpop.f32.mrf.mxu0 }
 0x106   :  { %v1080_v18 = vpop.f32.mrf.mxu1  ;;  %v4205_v25 = vadd.f32 %v1073_v8, %v993_v10  ;;  %v995_v48 = vadd.f32 %v994_v9, %v908_v13  ;;  %v4238_v13 = vld [vmem:[%s6561_s5 + $0x60] sm:$0xff] }
 0x107   :  { %v999_v16 = vpop.f32.mrf.mxu0 }
 0x108   :  { %v1000_v17 = vadd.f32 %v999_v16, %v915_v57  ;;  %v1082_v31 = vpop.f32.mrf.mxu1  ;;  %v1615_v8 = vmul.f32 %v4205_v25, %v4205_v25  ;;  %v4215_v9 = vadd.f32 %v1075_v14, %v995_v48  ;;  %v1600_v19 = vadd.f32 %v1599_v50, %v4205_v25  ;;  %v2191_v48 = vld [vmem:[%s6561_s5 + $0x58] sm:$0xff] }
 0x109   :  { %v1001_v27 = vpop.f32.mrf.mxu0 }
 0x10a   :  { %v4192_v28 = vadd.f32 %v1080_v18, %v1000_v17  ;;  %v1002_v30 = vadd.f32 %v1001_v27, %v917_v7  ;;  %v1251_v42 = vpop.f32.mrf.mxu1  ;;  %v1614_v7 = vmul.f32 %v4200_v55, %v4200_v55  ;;  %v1616_v14 = vmul.f32 %v4215_v9, %v4215_v9 }
 0x10b   :  { %v1158_v40 = vpop.f32.mrf.mxu0  ;;  %v1601_v12 = vadd.f32 %v1600_v19, %v4215_v9 }
 0x10c   :  { %v4194_v41 = vadd.f32 %v1082_v31, %v1002_v30  ;;  %v1253_v45 = vpop.f32.mrf.mxu1  ;;  %v1252_v57 = vadd.f32 %v1251_v42, %v1158_v40  ;;  %v1625_v31 = vadd.f32 %v1614_v7, %v1613_v24 }
 0x10d   :  { %v1160_v44 = vpop.f32.mrf.mxu0 }
 0x10e   :  { %v1258_v46 = vpop.f32.mrf.mxu1  ;;  %v1254_v21 = vadd.f32 %v1253_v45, %v1160_v44  ;;  %v1626_v3 = vadd.f32 %v1625_v31, %v1615_v8 }
 0x10f   :  { %v1169_v37 = vpop.f32.mrf.mxu0 }
 0x110   :  { %v1259_v47 = vadd.f32 %v1258_v46, %v1169_v37  ;;  %v1260_v54 = vpop.f32.mrf.mxu1  ;;  %v1627_v51 = vadd.f32 %v1626_v3, %v1616_v14 }
 0x111   :  { %v1171_v53 = vpop.f32.mrf.mxu0 }
 0x112   :  { %v1261_v38 = vadd.f32 %v1260_v54, %v1171_v53  ;;  %v1419_v4 = vpop.f32.mrf.mxu1 }
 0x113   :  { %v1335_v39 = vpop.f32.mrf.mxu0 }
 0x114   :  { %v1336_v5 = vadd.f32 %v1335_v39, %v1252_v57  ;;  %v1421_v6 = vpop.f32.mrf.mxu1  ;;  %v4250_v39 = vld [vmem:[%s6561_s5 + $0x18] sm:$0xff]  ;;  %v4257_v57 = vld [vmem:[%s6561_s5 + $0x28] sm:$0xff] }
 0x115   :  { %v1337_v49 = vpop.f32.mrf.mxu0 }
 0x116   :  { %v1338_v15 = vadd.f32 %v1337_v49, %v1254_v21  ;;  %v1428_v17 = vpop.f32.mrf.mxu1  ;;  %v1420_v20 = vadd.f32 %v1419_v4, %v1336_v5  ;;  %v4272_v4 = vld [vmem:[%s6561_s5 + $0x48] sm:$0xff]  ;;  %v4290_v21 = vld [vmem:[%s6561_s5 + $0x78] sm:$0xff]  ;;  %v4303_v5 = vpop.permute.xlu1 %1690 }
 0x117   :  { %v1343_v26 = vpop.f32.mrf.mxu0  ;;  %v4283_v49 = vld [vmem:[%s6561_s5 + $0x68] sm:$0xff] }
 0x118   :  { %v1344_v16 = vadd.f32 %v1343_v26, %v1259_v47  ;;  %v1430_v30 = vpop.f32.mrf.mxu1  ;;  %v1422_v34 = vadd.f32 %v1421_v6, %v1338_v15  ;;  %v3904_v26 = vmov 3  }
 0x119   :  { %v1345_v18 = vpop.f32.mrf.mxu0 }
 0x11a   :  { %v4218_v23 = vadd.f32 %v1428_v17, %v1344_v16  ;;  %v1346_v27 = vadd.f32 %v1345_v18, %v1261_v38  ;;  %v1587_v2 = vpop.f32.mrf.mxu1  ;;  %v4244_v38 = vld [vmem:[%s6561_s5 + $0x70] sm:$0xff]  ;;  %v1606_v17 = vadd.f32 %v4188_v36, %v4186_v32 }
 0x11b   :  { %v1506_v33 = vpop.f32.mrf.mxu0 }
 0x11c   :  { %v4220_v40 = vadd.f32 %v1430_v30, %v1346_v27  ;;  %v1507_v42 = vadd.f32 %v1506_v33, %v1420_v20  ;;  %v1589_v1 = vpop.f32.mrf.mxu1 }
 0x11d   :  { %v1508_v44 = vpop.f32.mrf.mxu0 }
 0x11e   :  { %v4224_v45 = vadd.f32 %v1587_v2, %v1507_v42  ;;  %v1509_v63 = vadd.f32 %v1508_v44, %v1422_v34 }
 0x120   :  { %v1617_v35 = vmul.f32 %v4224_v45, %v4224_v45  ;;  %v4229_v37 = vadd.f32 %v1589_v1, %v1509_v63  ;;  %v1602_v46 = vadd.f32 %v1601_v12, %v4224_v45 }
 0x122   :  { %v1603_v10 = vadd.f32 %v1602_v46, %v4229_v37  ;;  %v1618_v47 = vmul.f32 %v4229_v37, %v4229_v37  ;;  %v1628_v53 = vadd.f32 %v1627_v51, %v1617_v35 }
 0x124   :  { %1604 = vadd.xlane.f32.xlu0 %v1603_v10  ;;  %v1629_v54 = vadd.f32 %v1628_v53, %v1618_v47 }
 0x126   :  { %1630 = vadd.xlane.f32.xlu1 %v1629_v54 }
 0x137   :  { %2233 = vperm.xlu1 %3860, %v4238_v13  }
 0x13a   :  { %1679 = vperm.xlu0 %3856, %v3997_v22   ;;  %v4265_v22 = vld [vmem:[%s6561_s5 + $0x38] sm:$0xff] }
 0x13b   :  { %2239 = vperm.xlu1 %3860, %v4244_v38  }
 0x13e   :  { %2206 = vperm.xlu0 %3856, %v4250_v39  }
 0x13f   :  { %3862 = vset.pattern.permute.xlu1 %v3902_v29 }
 0x140   :  { %2570 = vperm.xlu1 %3862, %v4098_v56  }
 0x142   :  { %2212 = vperm.xlu0 %3856, %v4257_v57  }
 0x144   :  { %2573 = vperm.xlu1 %3862, %v4113_v58  }
 0x146   :  { %2218 = vperm.xlu0 %3856, %v4265_v22  }
 0x148   :  { %2576 = vperm.xlu1 %3862, %v4250_v39  }
 0x14a   :  { %2224 = vperm.xlu0 %3856, %v4272_v4  }
 0x14c   :  { %2579 = vperm.xlu1 %3862, %v4147_v59  }
 0x14e   :  { %2230 = vperm.xlu0 %3856, %v2191_v48  }
 0x150   :  { %2582 = vperm.xlu1 %3862, %v4257_v57  }
 0x152   :  { %2236 = vperm.xlu0 %3856, %v4283_v49  }
 0x154   :  { %2585 = vperm.xlu1 %3862, %v4156_v60  }
 0x156   :  { %2242 = vperm.xlu0 %3856, %v4290_v21  }
 0x158   :  { %2588 = vperm.xlu1 %3862, %v4265_v22  }
 0x15a   :  { %3861 = vset.pattern.permute.xlu0 %v3902_v29  ;;  %v4309_v29 = vpop.permute.xlu1 %1700 }
 0x15b   :  { %2567 = vperm.xlu0 %3861, %v4082_v52  }
 0x15c   :  { %2591 = vperm.xlu1 %3862, %v4163_v61  }
 0x15e   :  { %v4314_v6 = vpop.permute.xlu1 %1710 }
 0x15f   :  { %2594 = vperm.xlu0 %3861, %v4272_v4  }
 0x160   :  { %2597 = vperm.xlu1 %3862, %v4169_v62  }
 0x162   :  { %v4318_v7 = vpop.permute.xlu1 %1720 }
 0x163   :  { %2600 = vperm.xlu0 %3861, %v2191_v48  }
 0x164   :  { %2603 = vperm.xlu1 %3862, %v4238_v13  }
 0x166   :  { %v4324_v50 = vpop.permute.xlu1 %1730 }
 0x167   :  { %2606 = vperm.xlu0 %3861, %v4283_v49  }
 0x168   :  { %2609 = vperm.xlu1 %3862, %v4244_v38  }
 0x16a   :  { %v4329_v15 = vpop.permute.xlu1 %2197 }
 0x16b   :  { %2612 = vperm.xlu0 %3861, %v4290_v21  }
 0x16c   :  { %3863 = vset.pattern.permute.xlu1 %v3903_v43 }
 0x16d   :  { %2953 = vperm.xlu1 %3863, %v4082_v52  }
 0x16e   :  { %v4334_v16 = vpop.permute.xlu1 %2200 }
 0x16f   :  { %3864 = vset.pattern.permute.xlu0 %v3903_v43 }
 0x170   :  { %2956 = vperm.xlu0 %3864, %v4098_v56  }
 0x171   :  { %2959 = vperm.xlu1 %3863, %v4113_v58  }
 0x174   :  { %2983 = vperm.xlu0 %3864, %v4169_v62  }
 0x175   :  { %2962 = vperm.xlu1 %3863, %v4250_v39  }
 0x178   :  { %2986 = vperm.xlu0 %3864, %v2191_v48  }
 0x179   :  { %2965 = vperm.xlu1 %3863, %v4147_v59  }
 0x17c   :  { %2995 = vperm.xlu0 %3864, %v4244_v38  }
 0x17d   :  { %2968 = vperm.xlu1 %3863, %v4257_v57  }
 0x180   :  { %3868 = vset.pattern.permute.xlu0 %v3904_v26 }
 0x181   :  { %3342 = vperm.xlu0 %3868, %v4098_v56   ;;  %2971 = vperm.xlu1 %3863, %v4156_v60   ;;  %v4339_v56 = vpop.permute.xlu1 %2203 }
 0x185   :  { %3351 = vperm.xlu0 %3868, %v4147_v59   ;;  %2974 = vperm.xlu1 %3863, %v4265_v22   ;;  %v4342_v59 = vpop.permute.xlu1 %2209 }
 0x189   :  { %3357 = vperm.xlu0 %3868, %v4156_v60   ;;  %2977 = vperm.xlu1 %3863, %v4163_v61   ;;  %v1513_v60 = vpop.f32.mrf.mxu0 }
 0x18a   :  { %v1514_v24 = vadd.f32 %v1513_v60, %v4218_v23 }
 0x18b   :  { %v1515_v8 = vpop.f32.mrf.mxu0 }
 0x18c   :  { %v1516_v18 = vadd.f32 %v1515_v8, %v4220_v40 }
 0x18d   :  { %3363 = vperm.xlu0 %3868, %v4163_v61   ;;  %2980 = vperm.xlu1 %3863, %v4272_v4   ;;  %v4346_v61 = vpop.permute.xlu1 %2215 }
 0x18e   :  { %6621 = vst [vmem:[#allocation5_spill] sm:$0xff] %v4346_v61 }
 0x191   :  { %3372 = vperm.xlu0 %3868, %v2191_v48   ;;  %3865 = vset.pattern.permute.xlu1 %v3904_v26  ;;  %v4356_v20 = vpop.permute.xlu1 %2221 }
 0x192   :  { %3339 = vperm.xlu1 %3865, %v4082_v52   ;;  %v1594_v52 = vpop.f32.mrf.mxu1  ;;  %6622 = vst [vmem:[#allocation6_spill] sm:$0xff] %v4356_v20 }
 0x193   :  { %v4354_v19 = vadd.f32 %v1594_v52, %v1514_v24 }
 0x194   :  { %v1596_v27 = vpop.f32.mrf.mxu1 }
 0x195   :  { %v4360_v31 = vadd.f32 %v1596_v27, %v1516_v18  ;;  %v4364_v33 = vpop.permute.xlu1 %2227 }
 0x196   :  { %3345 = vperm.xlu1 %3865, %v4113_v58   ;;  %v1607_v58 = vadd.f32 %v1606_v17, %v4192_v28  ;;  %6623 = vst [vmem:[#allocation7_spill] sm:$0xff] %v4364_v33 }
 0x198   :  { %v1608_v30 = vadd.f32 %v1607_v58, %v4194_v41 }
 0x19a   :  { %3348 = vperm.xlu1 %3865, %v4250_v39   ;;  %v1609_v23 = vadd.f32 %v1608_v30, %v4354_v19 }
 0x19c   :  { %v1610_v40 = vadd.f32 %v1609_v23, %v4360_v31 }
 0x19e   :  { %3354 = vperm.xlu1 %3865, %v4257_v57  }
 0x1a2   :  { %3360 = vperm.xlu1 %3865, %v4265_v22  }
 0x1a6   :  { %3366 = vperm.xlu1 %3865, %v4272_v4  }
 0x1aa   :  { %3369 = vperm.xlu1 %3865, %v4169_v62  }
 0x1ad   :  { %v1605_v34 = vpop.xlane.xlu0 %1604 }
 0x1ae   :  { %v4366_v42 = vmul.f32 0.0015432099, %v1605_v34  ;;  %3866 = vset.pattern.permute.xlu1 %v3903_v43 }
 0x1af   :  { %2989 = vperm.xlu1 %3866, %v4238_v13   ;;  %v1631_v2 = vpop.xlane.xlu1 %1630 }
 0x1b0   :  { %v1643_v3 = vmul.f32 %v4366_v42, %v4366_v42  ;;  %1611 = vadd.xlane.f32.xlu0 %v1610_v40  ;;  %v1641_v14 = vmul.f32 0.0015432099, %v1631_v2  ;;  %v1655_v46 = vsub.f32 %v4224_v45, %v4366_v42  ;;  %v1654_v51 = vsub.f32 %v4215_v9, %v4366_v42  ;;  %v4440_v40 = vld [vmem:[%s6560_s4 + $0x60] sm:$0xff] }
 0x1b1   :  { %v1652_v10 = vsub.f32 %v4200_v55, %v4366_v42  ;;  %v1651_v47 = vsub.f32 %v4203_v11, %v4366_v42  ;;  %v1653_v52 = vsub.f32 %v4205_v25, %v4366_v42 }
 0x1b2   :  { %v1645_v44 = vsub.f32 %v1641_v14, %v1643_v3 }
 0x1b3   :  { %2992 = vperm.xlu1 %3866, %v4283_v49   ;;  %v4374_v62 = vpop.permute.xlu1 %2233 }
 0x1b4   :  { %6624 = vst [vmem:[#allocation8_spill] sm:$0xff] %v4374_v62  ;;  %v1647_v63 = vadd.f32 1e-05, %v1645_v44 }
 0x1b5   :  { %v1680_v45 = vpop.permute.xlu0 %1679 }
 0x1b6   :  { %3871 = vrsqrt.f32 %v1647_v63 }
 0x1b7   :  { %3867 = vset.pattern.permute.xlu1 %v3904_v26  ;;  %v4377_v1 = vpop.permute.xlu1 %2239 }
 0x1b8   :  { %6625 = vst [vmem:[#allocation9_spill] sm:$0xff] %v4377_v1  ;;  %3375 = vperm.xlu1 %3867, %v4238_v13  }
 0x1bb   :  { %v4380_v12 = vpop.permute.xlu1 %2570 }
 0x1bc   :  { %3378 = vperm.xlu1 %3867, %v4283_v49  }
 0x1bf   :  { %v4383_v35 = vpop.permute.xlu1 %2573 }
 0x1c0   :  { %3869 = vset.pattern.permute.xlu1 %v3903_v43  ;;  %v1656_v43 = vsub.f32 %v4229_v37, %v4366_v42  ;;  %v1757_v42 = vld [vmem:[%s6560_s4] sm:$0xff] }
 0x1c1   :  { %2998 = vperm.xlu1 %3869, %v4290_v21  }
 0x1c3   :  { %v3872_v53 = vpop.eup %3871  ;;  %v4395_v54 = vpop.permute.xlu1 %2576 }
 0x1c4   :  { %v1667_v13 = vmul.f32 %v3872_v53, %v1655_v46  ;;  %v1666_v39 = vmul.f32 %v3872_v53, %v1654_v51  ;;  %v1664_v57 = vmul.f32 %v3872_v53, %v1652_v10  ;;  %v1663_v22 = vmul.f32 %v3872_v53, %v1651_v47  ;;  %v1758_v10 = vld [vmem:[%s6560_s4 + $0x8] sm:$0xff] }
 0x1c5   :  { %v1668_v9 = vmul.f32 %v3872_v53, %v1656_v43  ;;  %3870 = vset.pattern.permute.xlu1 %v3904_v26  ;;  %v1665_v3 = vmul.f32 %v3872_v53, %v1653_v52  ;;  %v1619_v43 = vmul.f32 %v4186_v32, %v4186_v32 }
 0x1c6   :  { %3381 = vperm.xlu0 %3868, %v4244_v38   ;;  %v1686_v4 = vmul.f32 %v1680_v45, %v1667_v13  ;;  %v1707_v55 = vmul.f32 %v4309_v29, %v1667_v13  ;;  %v1685_v48 = vmul.f32 %v1680_v45, %v1666_v39  ;;  %v1706_v11 = vmul.f32 %v4309_v29, %v1666_v39  ;;  %v4501_v39 = vld [vmem:[%s6560_s4 + $0x70] sm:$0xff] }
 0x1c7   :  { %v4403_v49 = vpop.permute.xlu1 %2579  ;;  %v1683_v60 = vmul.f32 %v1680_v45, %v1664_v57  ;;  %v1704_v37 = vmul.f32 %v4309_v29, %v1664_v57  ;;  %v1682_v17 = vmul.f32 %v1680_v45, %v1663_v22  ;;  %v1703_v24 = vmul.f32 %v4309_v29, %v1663_v22 }
 0x1c8   :  { %v1697_v8 = vadd.f32 %v4303_v5, %v1686_v4  ;;  %v1717_v38 = vadd.f32 %v4314_v6, %v1707_v55  ;;  %v1696_v26 = vadd.f32 %v4303_v5, %v1685_v48  ;;  %v1716_v58 = vadd.f32 %v4314_v6, %v1706_v11  ;;  %v1772_v55 = vld [vmem:[%s6560_s4 + $0x78] sm:$0xff]  ;;  %v1761_v11 = vld [vmem:[%s6560_s4 + $0x20] sm:$0xff] }
 0x1c9   :  { %v1694_v18 = vadd.f32 %v4303_v5, %v1683_v60  ;;  %v1714_v27 = vadd.f32 %v4314_v6, %v1704_v37  ;;  %v1693_v25 = vadd.f32 %v4303_v5, %v1682_v17  ;;  %v1713_v30 = vadd.f32 %v4314_v6, %v1703_v24 }
 0x1ca   :  { %1743 = vst [vmem:[%s6563_s7 + $0x20] sm:$0xff] %v1697_v8  ;;  %1850 = vmatprep.subr.mxu0 %v1697_v8  ;;  %3843 = vmatprep.subr.mxu1 %v1697_v8  ;;  %1749 = vst [vmem:[%s6563_s7 + $0x50] sm:$0xff] %v1717_v38  ;;  %v1687_v23 = vmul.f32 %v1680_v45, %v1668_v9  ;;  %v1708_v2 = vmul.f32 %v4309_v29, %v1668_v9  ;;  %v1762_v8 = vld [vmem:[%s6560_s4 + $0x28] sm:$0xff] }
 0x1cb   :  { %v4423_v34 = vpop.permute.xlu1 %2582  ;;  %1742 = vst [vmem:[%s6563_s7 + $0x18] sm:$0xff] %v1696_v26  ;;  %1748 = vst [vmem:[%s6563_s7 + $0x48] sm:$0xff] %v1716_v58  ;;  %1851 = vmatpush1.msra.mxu0 %v1696_v26  ;;  %3845 = vmatpush1.msra.mxu1 %v1696_v26  ;;  %v1684_v63 = vmul.f32 %v1680_v45, %v1665_v3  ;;  %v1705_v46 = vmul.f32 %v4309_v29, %v1665_v3  ;;  %v4473_v29 = vld [vmem:[%s6560_s4 + $0x68] sm:$0xff]  ;;  %v1760_v45 = vld [vmem:[%s6560_s4 + $0x18] sm:$0xff] }
 0x1cc   :  { %1740 = vst [vmem:[%s6563_s7 + $0x8] sm:$0xff] %v1694_v18  ;;  %1746 = vst [vmem:[%s6563_s7 + $0x38] sm:$0xff] %v1714_v27  ;;  %1852 = vmatprep.subr.mxu0 %v1694_v18  ;;  %3844 = vmatprep.subr.mxu1 %v1694_v18  ;;  %v1698_v14 = vadd.f32 %v4303_v5, %v1687_v23  ;;  %v1718_v44 = vadd.f32 %v4314_v6, %v1708_v2  ;;  %v1763_v26 = vld [vmem:[%s6560_s4 + $0x30] sm:$0xff]  ;;  %v1764_v58 = vld [vmem:[%s6560_s4 + $0x38] sm:$0xff] }
 0x1cd   :  { %1739 = vst [vmem:[%s6563_s7] sm:$0xff] %v1693_v25  ;;  %1745 = vst [vmem:[%s6563_s7 + $0x30] sm:$0xff] %v1713_v30  ;;  %1853 = vmatpush1.msra.mxu0 %v1693_v25  ;;  %3846 = vmatpush1.msra.mxu1 %v1693_v25  ;;  %v1695_v51 = vadd.f32 %v4303_v5, %v1684_v63  ;;  %v1715_v47 = vadd.f32 %v4314_v6, %v1705_v46  ;;  %v1759_v6 = vld [vmem:[%s6560_s4 + $0x10] sm:$0xff]  ;;  %v1765_v27 = vld [vmem:[%s6560_s4 + $0x40] sm:$0xff]  ;;  %v4560_v25 = vpop.permute.xlu0 %2206 }
 0x1ce   :  { %3765 = vmatmul.mubr.msk.f32.vlgmr.msra.gmra.mxu0 %vm1773_vm1, %v1757_v42  ;;  %3777 = vmatmul.mubr.msk.f32.vlgmr.msra.gmra.mxu1 %vm1773_vm1, %v4440_v40  ;;  %1744 = vst [vmem:[%s6563_s7 + $0x28] sm:$0xff] %v1698_v14  ;;  %1750 = vst [vmem:[%s6563_s7 + $0x58] sm:$0xff] %v1718_v44  ;;  %v1620_v5 = vmul.f32 %v4188_v36, %v4188_v36  ;;  %v1621_v13 = vmul.f32 %v4192_v28, %v4192_v28  ;;  %v1766_v30 = vld [vmem:[%s6560_s4 + $0x48] sm:$0xff]  ;;  %v1767_v23 = vld [vmem:[%s6560_s4 + $0x50] sm:$0xff] }
 0x1cf   :  { %3815 = vmatprep.subr.mxu1 %v1698_v14  ;;  %1892 = vmatprep.mubr.f32.mxu0 %v3900_v0  ;;  %v4475_v53 = vpop.permute.xlu1 %2585  ;;  %1741 = vst [vmem:[%s6563_s7 + $0x10] sm:$0xff] %v1695_v51  ;;  %1747 = vst [vmem:[%s6563_s7 + $0x40] sm:$0xff] %v1715_v47  ;;  %v1622_v4 = vmul.f32 %v4194_v41, %v4194_v41  ;;  %v1623_v48 = vmul.f32 %v4354_v19, %v4354_v19  ;;  %v1768_v2 = vld [vmem:[%s6560_s4 + $0x58] sm:$0xff] }
 0x1d0   :  { %3816 = vmatpush3.msra.mxu1 %v1698_v14  ;;  %1964 = vmatprep.mubr.f32.mxu1 %v3900_v0  ;;  %v1632_v57 = vadd.f32 %v1620_v5, %v1619_v43  ;;  %v1624_v17 = vmul.f32 %v4360_v31, %v4360_v31 }
 0x1d1   :  { %3817 = vmatprep.subr.mxu1 %v1695_v51  ;;  %v4580_v3 = vpop.permute.xlu0 %2212 }
 0x1d2   :  { %3818 = vmatpush3.msra.mxu1 %v1695_v51  ;;  %3766 = vmatmul.mubr.msk.f32.gmra.mxu0 %vm1773_vm1, %v1758_v10  ;;  %v1633_v9 = vadd.f32 %v1632_v57, %v1621_v13 }
 0x1d3   :  { %3778 = vmatmul.mubr.msk.f32.gmra.mxu1 %vm1773_vm1, %v4473_v29  ;;  %1898 = vmatprep.mubr.f32.mxu0 %v3900_v0  ;;  %v4504_v22 = vpop.permute.xlu1 %2588 }
 0x1d4   :  { %1970 = vmatprep.mubr.f32.mxu1 %v3900_v0  ;;  %6626 = vst [vmem:[#allocation10_spill] sm:$0xff] %v4504_v22  ;;  %v1634_v60 = vadd.f32 %v1633_v9, %v1622_v4 }
 0x1d5   :  { %v4591_v44 = vpop.permute.xlu0 %2218 }
 0x1d6   :  { %3767 = vmatmul.mubr.msk.f32.gmra.mxu0 %vm1773_vm1, %v1759_v6  ;;  %v1635_v24 = vadd.f32 %v1634_v60, %v1623_v48  ;;  %6631 = vst [vmem:[#allocation15_spill] sm:$0xff] %v4591_v44 }
 0x1d7   :  { %3779 = vmatmul.mubr.msk.f32.gmra.mxu1 %vm1773_vm1, %v4501_v39  ;;  %1904 = vmatprep.mubr.f32.mxu0 %v3900_v0  ;;  %v4527_v37 = vpop.permute.xlu1 %2591 }
 0x1d8   :  { %1976 = vmatprep.mubr.f32.mxu1 %v3900_v0  ;;  %6627 = vst [vmem:[#allocation11_spill] sm:$0xff] %v4527_v37  ;;  %v1636_v38 = vadd.f32 %v1635_v24, %v1624_v17 }
 0x1da   :  { %3768 = vmatmul.mubr.msk.f32.gmra.mxu0 %vm1773_vm1, %v1760_v45 }
 0x1db   :  { %3780 = vmatmul.mubr.msk.f32.gmra.mxu1 %vm1773_vm1, %v1772_v55  ;;  %1910 = vmatprep.mubr.f32.mxu0 %v3900_v0  ;;  %v4539_v52 = vpop.permute.xlu1 %2597 }
 0x1dc   :  { %3819 = vmatprep.mubr.msk.f32.mxu1 %vm1773_vm1, %v1757_v42  ;;  %6628 = vst [vmem:[#allocation12_spill] sm:$0xff] %v4539_v52 }
 0x1de   :  { %3769 = vmatmul.mubr.msk.f32.gmra.mxu0 %vm1773_vm1, %v1761_v11 }
 0x1df   :  { %3820 = vmatmul.mubr.msk.f32.vlgmr.msra.gmra.mxu1 %vm1773_vm1, %v1758_v10  ;;  %1916 = vmatprep.mubr.f32.mxu0 %v3900_v0  ;;  %v4554_v18 = vpop.permute.xlu1 %2603 }
 0x1e0   :  { %3822 = vmatprep.mubr.msk.f32.mxu1 %vm1773_vm1, %v1759_v6  ;;  %6629 = vst [vmem:[#allocation13_spill] sm:$0xff] %v4554_v18 }
 0x1e2   :  { %3770 = vmatmul.mubr.msk.f32.gmra.mxu0 %vm1773_vm1, %v1762_v8 }
 0x1e3   :  { %3823 = vmatmul.mubr.msk.f32.gmra.mxu1 %vm1773_vm1, %v1760_v45  ;;  %1922 = vmatprep.mubr.f32.mxu0 %v3900_v0  ;;  %v4572_v42 = vpop.permute.xlu1 %2609 }
 0x1e4   :  { %3825 = vmatprep.mubr.msk.f32.mxu1 %vm1773_vm1, %v1761_v11  ;;  %6630 = vst [vmem:[#allocation14_spill] sm:$0xff] %v4572_v42 }
 0x1e5   :  { %1637 = vadd.xlane.f32.xlu1 %v1636_v38 }
 0x1e6   :  { %3771 = vmatmul.mubr.msk.f32.gmra.mxu0 %vm1773_vm1, %v1763_v26 }
 0x1e7   :  { %3826 = vmatmul.mubr.msk.f32.gmra.mxu1 %vm1773_vm1, %v1762_v8  ;;  %1928 = vmatprep.mubr.f32.mxu0 %v3900_v0 }
 0x1e8   :  { %3828 = vmatprep.mubr.msk.f32.mxu1 %vm1773_vm1, %v1763_v26  ;;  %v4587_v14 = vpop.permute.xlu1 %2953 }
 0x1ea   :  { %3772 = vmatmul.mubr.msk.f32.gmra.mxu0 %vm1773_vm1, %v1764_v58 }
 0x1eb   :  { %3829 = vmatmul.mubr.msk.f32.gmra.mxu1 %vm1773_vm1, %v1764_v58  ;;  %1934 = vmatprep.mubr.f32.mxu0 %v3900_v0 }
 0x1ec   :  { %3831 = vmatprep.mubr.msk.f32.mxu1 %vm1773_vm1, %v1765_v27  ;;  %v4599_v63 = vpop.permute.xlu1 %2959 }
 0x1ee   :  { %3773 = vmatmul.mubr.msk.f32.gmra.mxu0 %vm1773_vm1, %v1765_v27 }
 0x1ef   :  { %3832 = vmatmul.mubr.msk.f32.gmra.mxu1 %vm1773_vm1, %v1766_v30  ;;  %1940 = vmatprep.mubr.f32.mxu0 %v3900_v0 }
 0x1f0   :  { %3834 = vmatprep.mubr.msk.f32.mxu1 %vm1773_vm1, %v1767_v23 }
 0x1f2   :  { %3774 = vmatmul.mubr.msk.f32.gmra.mxu0 %vm1773_vm1, %v1766_v30 }
 0x1f3   :  { %3835 = vmatmul.mubr.msk.f32.gmra.mxu1 %vm1773_vm1, %v1768_v2  ;;  %1946 = vmatprep.mubr.f32.mxu0 %v3900_v0 }
 0x1f4   :  { %3837 = vmatprep.mubr.msk.f32.mxu1 %vm1773_vm1, %v4440_v40  ;;  %v4602_v40 = vpop.permute.xlu0 %2224 }
 0x1f5   :  { %6632 = vst [vmem:[#allocation16_spill] sm:$0xff] %v4602_v40 }
 0x1f6   :  { %3384 = vperm.xlu1 %3870, %v4290_v21   ;;  %3775 = vmatmul.mubr.msk.f32.gmra.mxu0 %vm1773_vm1, %v1767_v23  ;;  %v4604_v21 = vpop.permute.xlu1 %2962 }
 0x1f7   :  { %3838 = vmatmul.mubr.msk.f32.gmra.mxu1 %vm1773_vm1, %v4473_v29  ;;  %1952 = vmatprep.mubr.f32.mxu0 %v3900_v0 }
 0x1f8   :  { %3840 = vmatprep.mubr.msk.f32.mxu1 %vm1773_vm1, %v4501_v39  ;;  %v4606_v46 = vpop.permute.xlu0 %2230 }
 0x1f9   :  { %6633 = vst [vmem:[#allocation17_spill] sm:$0xff] %v4606_v46 }
 0x1fa   :  { %3776 = vmatmul.mubr.msk.f32.gmra.mxu0 %vm1773_vm1, %v1768_v2  ;;  %v4608_v51 = vpop.permute.xlu1 %2965 }
 0x1fb   :  { %3841 = vmatmul.mubr.msk.f32.gmra.mxu1 %vm1773_vm1, %v1772_v55 }
 0x1fc   :  { %v4610_v10 = vpop.permute.xlu0 %2236 }
 0x1fd   :  { %6634 = vst [vmem:[#allocation18_spill] sm:$0xff] %v4610_v10 }
 0x1fe   :  { %v4612_v0 = vpop.permute.xlu1 %2968 }
 0x200   :  { %v4614_v47 = vpop.permute.xlu0 %2242 }
 0x201   :  { %6635 = vst [vmem:[#allocation19_spill] sm:$0xff] %v4614_v47 }
 0x202   :  { %v4616_v29 = vpop.permute.xlu1 %2971 }
 0x204   :  { %v4618_v5 = vpop.permute.xlu0 %2567 }
 0x206   :  { %v4620_v6 = vpop.permute.xlu1 %2974 }
 0x207   :  { %6636 = vst [vmem:[#allocation20_spill] sm:$0xff] %v4620_v6 }
 0x208   :  { %v4622_v43 = vpop.permute.xlu0 %2594 }
 0x209   :  { %6637 = vst [vmem:[#allocation21_spill] sm:$0xff] %v4622_v43 }
 0x20a   :  { %v4624_v13 = vpop.permute.xlu1 %2977 }
 0x20b   :  { %6638 = vst [vmem:[#allocation22_spill] sm:$0xff] %v4624_v13 }
 0x20c   :  { %v4626_v39 = vpop.permute.xlu0 %2600 }
 0x20d   :  { %6639 = vst [vmem:[#allocation23_spill] sm:$0xff] %v4626_v39 }
 0x20e   :  { %v4628_v57 = vpop.permute.xlu1 %2980 }
 0x20f   :  { %6640 = vst [vmem:[#allocation24_spill] sm:$0xff] %v4628_v57 }
 0x210   :  { %v4630_v45 = vpop.permute.xlu0 %2606 }
 0x211   :  { %6641 = vst [vmem:[#allocation25_spill] sm:$0xff] %v4630_v45 }
 0x212   :  { %v4632_v9 = vpop.permute.xlu1 %3339 }
 0x214   :  { %v4634_v4 = vpop.permute.xlu0 %2612 }
 0x215   :  { %6642 = vst [vmem:[#allocation26_spill] sm:$0xff] %v4634_v4 }
 0x216   :  { %v4636_v55 = vpop.permute.xlu1 %3345 }
 0x218   :  { %v4638_v48 = vpop.permute.xlu0 %2956 }
 0x21a   :  { %v4640_v11 = vpop.permute.xlu1 %3348 }
 0x21c   :  { %v4642_v60 = vpop.permute.xlu0 %2983 }
 0x21d   :  { %6643 = vst [vmem:[#allocation27_spill] sm:$0xff] %v4642_v60 }
 0x21e   :  { %v4644_v17 = vpop.permute.xlu1 %3354 }
 0x220   :  { %v4646_v24 = vpop.permute.xlu0 %2986 }
 0x221   :  { %6644 = vst [vmem:[#allocation28_spill] sm:$0xff] %v4646_v24 }
 0x222   :  { %v4648_v8 = vpop.permute.xlu1 %3360 }
 0x223   :  { %6645 = vst [vmem:[#allocation29_spill] sm:$0xff] %v4648_v8 }
 0x224   :  { %v4650_v38 = vpop.permute.xlu0 %2995 }
 0x225   :  { %6646 = vst [vmem:[#allocation30_spill] sm:$0xff] %v4650_v38 }
 0x226   :  { %v4652_v26 = vpop.permute.xlu1 %3366 }
 0x227   :  { %6647 = vst [vmem:[#allocation31_spill] sm:$0xff] %v4652_v26  ;;  %v6587_v26 = vlaneseq }
 0x228   :  { %v4654_v58 = vpop.permute.xlu0 %3342 }
 0x22a   :  { %v4656_v27 = vpop.permute.xlu1 %3369 }
 0x22b   :  { %6648 = vst [vmem:[#allocation32_spill] sm:$0xff] %v4656_v27 }
 0x22c   :  { %v4658_v30 = vpop.permute.xlu0 %3351 }
 0x22d   :  { %6649 = vst [vmem:[#allocation33_spill] sm:$0xff] %v4658_v30 }
 0x22e   :  { %v4660_v23 = vpop.permute.xlu1 %2989 }
 0x22f   :  { %6650 = vst [vmem:[#allocation34_spill] sm:$0xff] %v4660_v23 }
 0x230   :  { %v4662_v2 = vpop.permute.xlu0 %3357 }
 0x231   :  { %6651 = vst [vmem:[#allocation35_spill] sm:$0xff] %v4662_v2 }
 0x232   :  { %v4664_v39 = vpop.permute.xlu1 %2992 }
 0x233   :  { %6652 = vst [vmem:[#allocation36_spill] sm:$0xff] %v4664_v39 }
 0x234   :  { %v4666_v1 = vpop.permute.xlu0 %3363 }
 0x235   :  { %6653 = vst [vmem:[#allocation37_spill] sm:$0xff] %v4666_v1 }
 0x236   :  { %v4668_v24 = vpop.permute.xlu1 %3375 }
 0x237   :  { %6654 = vst [vmem:[#allocation38_spill] sm:$0xff] %v4668_v24 }
 0x238   :  { %v4670_v46 = vpop.permute.xlu0 %3372 }
 0x239   :  { %6655 = vst [vmem:[#allocation39_spill] sm:$0xff] %v4670_v46 }
 0x23a   :  { %v4672_v38 = vpop.permute.xlu1 %3378 }
 0x23b   :  { %6656 = vst [vmem:[#allocation40_spill] sm:$0xff] %v4672_v38 }
 0x23c   :  { %v1612_v4 = vpop.xlane.xlu0 %1611 }
 0x23d   :  { %v1640_v27 = vmul.f32 0.0015432099, %v1612_v4 }
 0x23e   :  { %v4674_v42 = vpop.permute.xlu1 %2998 }
 0x23f   :  { %6657 = vst [vmem:[#allocation41_spill] sm:$0xff] %v4674_v42  ;;  %v1644_v52 = vmul.f32 %v1640_v27, %v1640_v27  ;;  %v1657_v45 = vsub.f32 %v4186_v32, %v1640_v27  ;;  %v1658_v43 = vsub.f32 %v4188_v36, %v1640_v27  ;;  %v1660_v24 = vsub.f32 %v4194_v41, %v1640_v27 }
 0x240   :  { %v1661_v46 = vsub.f32 %v4354_v19, %v1640_v27  ;;  %v1659_v39 = vsub.f32 %v4192_v28, %v1640_v27  ;;  %v1662_v4 = vsub.f32 %v4360_v31, %v1640_v27 }
 0x26e   :  { %v1638_v33 = vpop.xlane.xlu1 %1637 }
 0x26f   :  { %v1642_v60 = vmul.f32 0.0015432099, %v1638_v33 }
 0x271   :  { %v1646_v62 = vsub.f32 %v1642_v60, %v1644_v52 }
 0x273   :  { %v1648_v47 = vadd.f32 1e-05, %v1646_v62  ;;  %v4683_v62 = vand.u32 127, %v6587_v26 }
 0x275   :  { %3873 = vrsqrt.f32 %v1648_v47  ;;  %vm2244_vm2 = vcmp.lt.s32.totalorder %v4683_v62, %v4329_v15  ;;  %vm2247_vm4 = vcmp.lt.s32.totalorder %v4683_v62, %v4334_v16  ;;  %vm2614_vm6 = vcmp.lt.s32.totalorder %v4683_v62, %v4618_v5 }
 0x276   :  { %vm2617_vm8 = vcmp.lt.s32.totalorder %v4683_v62, %v4380_v12  ;;  %vm2650_vm9 = vcmp.lt.s32.totalorder %v4683_v62, %v4554_v18  ;;  %vm3000_vm10 = vcmp.lt.s32.totalorder %v4683_v62, %v4587_v14  ;;  %vm3003_vm12 = vcmp.lt.s32.totalorder %v4683_v62, %v4638_v48 }
 0x277   :  { %vm3389_vm0 = vcmp.lt.s32.totalorder %v4683_v62, %v4654_v58  ;;  %vm3386_vm1 = vcmp.lt.s32.totalorder %v4683_v62, %v4632_v9  ;;  %vm3036_vm15 = vcmp.lt.s32.totalorder %v4683_v62, %v4660_v23  ;;  %vm2620_vm14 = vcmp.lt.s32.totalorder %v4683_v62, %v4383_v35 }
 0x278   :  { %vm3006_vm13 = vcmp.lt.s32.totalorder %v4683_v62, %v4599_v63 }
 0x282   :  { %v3874_v38 = vpop.eup %3873 }
 0x283   :  { %v1669_v42 = vmul.f32 %v3874_v38, %v1657_v45  ;;  %v1670_v33 = vmul.f32 %v3874_v38, %v1658_v43  ;;  %v1672_v1 = vmul.f32 %v3874_v38, %v1660_v24  ;;  %v1673_v52 = vmul.f32 %v3874_v38, %v1661_v46 }
 0x284   :  { %v1674_v47 = vmul.f32 %v3874_v38, %v1662_v4  ;;  %v1671_v32 = vmul.f32 %v3874_v38, %v1659_v39 }
 0x285   :  { %v1723_v36 = vmul.f32 %v4318_v7, %v1669_v42  ;;  %v1724_v41 = vmul.f32 %v4318_v7, %v1670_v33  ;;  %v1726_v19 = vmul.f32 %v4318_v7, %v1672_v1  ;;  %v1727_v60 = vmul.f32 %v4318_v7, %v1673_v52  ;;  %v4773_v33 = vpop.permute.xlu1 %3384 }
 0x286   :  { %v1728_v28 = vmul.f32 %v4318_v7, %v1674_v47  ;;  %v1725_v31 = vmul.f32 %v4318_v7, %v1671_v32  ;;  %v4710_v7 = vadd.s32 128, %v4683_v62  ;;  %6659 = vst [vmem:[#allocation43_spill] sm:$0xff] %v4773_v33 }
 0x287   :  { %v4692_v43 = vadd.f32 %v4324_v50, %v1723_v36  ;;  %v4695_v46 = vadd.f32 %v4324_v50, %v1724_v41  ;;  %v4698_v39 = vadd.f32 %v4324_v50, %v1726_v19  ;;  %v4701_v42 = vadd.f32 %v4324_v50, %v1727_v60 }
 0x288   :  { %v4704_v1 = vadd.f32 %v4324_v50, %v1728_v28  ;;  %v4707_v45 = vadd.f32 %v4324_v50, %v1725_v31  ;;  %v4737_v50 = vadd.s32 256, %v4683_v62  ;;  %vm2245_vm3 = vcmp.lt.s32.totalorder %v4710_v7, %v4329_v15 }
 0x289   :  { %1751 = vst [vmem:[%s6563_s7 + $0x60] sm:$0xff] %v4692_v43  ;;  %1752 = vst [vmem:[%s6563_s7 + $0x68] sm:$0xff] %v4695_v46  ;;  %vm2615_vm7 = vcmp.lt.s32.totalorder %v4710_v7, %v4618_v5  ;;  %vm3001_vm11 = vcmp.lt.s32.totalorder %v4710_v7, %v4587_v14  ;;  %vm2251_vm5 = vcmp.lt.s32.totalorder %v4710_v7, %v4339_v56 }
 0x28a   :  { %1754 = vst [vmem:[%s6563_s7 + $0x78] sm:$0xff] %v4698_v39  ;;  %1755 = vst [vmem:[%s6563_s7 + $0x80] sm:$0xff] %v4701_v42 }
 0x28b   :  { %1756 = vst [vmem:[%s6563_s7 + $0x88] sm:$0xff] %v4704_v1  ;;  %1753 = vst [vmem:[%s6563_s7 + $0x70] sm:$0xff] %v4707_v45 }
 0x28e   :  { %v1888_v24 = vpop.f32.mrf.mxu0  ;;  %v1960_v38 = vpop.f32.mrf.mxu1 }
 0x28f   :  { %v2128_v27 = vmul.f32 %v1888_v24, %v4692_v43  ;;  %v4771_v4 = vmul.f32 %v1960_v38, %v4692_v43 }
 0x290   :  { %v1890_v52 = vpop.f32.mrf.mxu0  ;;  %v1962_v47 = vpop.f32.mrf.mxu1 }
 0x291   :  { %6658 = vst [vmem:[#allocation42_spill] sm:$0xff] %v4771_v4  ;;  %v2129_v32 = vmul.f32 %v1890_v52, %v4695_v46  ;;  %v4787_v36 = vmul.f32 %v1962_v47, %v4695_v46  ;;  %v2292_v41 = vsel %vm2244_vm2, %v2128_v27, 0.0  ;;  %v2662_v19 = vsel %vm2614_vm6, %v2128_v27, 0.0 }
 0x292   :  { %v1894_v60 = vpop.f32.mrf.mxu0  ;;  %v3048_v28 = vsel %vm3000_vm10, %v2128_v27, 0.0  ;;  %v3434_v31 = vsel %vm3386_vm1, %v2128_v27, 0.0  ;;  %vm2621_vm2 = vcmp.lt.s32.totalorder %v4710_v7, %v4383_v35  ;;  %vm3007_vm6 = vcmp.lt.s32.totalorder %v4710_v7, %v4599_v63 }
 0x293   :  { %6660 = vst [vmem:[#allocation44_spill] sm:$0xff] %v4787_v36  ;;  %v4812_v24 = vsel %vm2650_vm9, %v4771_v4, 0.0  ;;  %v4818_v38 = vsel %vm3036_vm15, %v4771_v4, 0.0  ;;  %v2131_v27 = vmul.f32 %v1894_v60, %v4698_v39  ;;  %v1966_v52 = vpop.f32.mrf.mxu1  ;;  %vm3431_vm10 = vcmp.lt.s32.totalorder %v4683_v62, %v4773_v33 }
 0x294   :  { %6661 = vst [vmem:[#allocation45_spill] sm:$0xff] %v4812_v24  ;;  %6662 = vst [vmem:[#allocation46_spill] sm:$0xff] %v4818_v38  ;;  %v2293_v47 = vsel %vm2245_vm3, %v2129_v32, 0.0  ;;  %v2663_v26 = vsel %vm2615_vm7, %v2129_v32, 0.0  ;;  %v3049_v24 = vsel %vm3001_vm11, %v2129_v32, 0.0  ;;  %vm2253_vm9 = vcmp.lt.s32.totalorder %v4683_v62, %v4560_v25  ;;  %v1896_v4 = vpop.f32.mrf.mxu0 }
 0x295   :  { %vm3395_vm15 = vcmp.lt.s32.totalorder %v4683_v62, %v4640_v11  ;;  %v4837_v60 = vmul.f32 %v1966_v52, %v4698_v39  ;;  %v4839_v38 = vadd.f32 %v2293_v47, %v2292_v41  ;;  %v4841_v36 = vadd.f32 %v2663_v26, %v2662_v19  ;;  %v1968_v52 = vpop.f32.mrf.mxu1 }
 0x296   :  { %v4843_v23 = vadd.f32 %v3049_v24, %v3048_v28  ;;  %vm2623_vm3 = vcmp.lt.s32.totalorder %v4683_v62, %v4395_v54  ;;  %vm3009_vm7 = vcmp.lt.s32.totalorder %v4683_v62, %v4604_v21  ;;  %v2132_v18 = vmul.f32 %v1896_v4, %v4701_v42  ;;  %v1900_v28 = vpop.f32.mrf.mxu0 }
 0x297   :  { %6663 = vst [vmem:[#allocation47_spill] sm:$0xff] %v4837_v60  ;;  %v2295_v41 = vsel %vm2247_vm4, %v2131_v27, 0.0  ;;  %v2665_v26 = vsel %vm2617_vm8, %v2131_v27, 0.0  ;;  %v3051_v19 = vsel %vm3003_vm12, %v2131_v27, 0.0  ;;  %v4866_v4 = vmul.f32 %v1968_v52, %v4701_v42 }
 0x298   :  { %v3437_v24 = vsel %vm3389_vm0, %v2131_v27, 0.0  ;;  %vm6665_vm4 = vcmp.lt.s32.totalorder %v4710_v7, %v4632_v9  ;;  %vm6666_vm12 = vcmp.lt.s32.totalorder %v4683_v62, %v4610_v10  ;;  %v2134_v52 = vmul.f32 %v1900_v28, %v4692_v43 }
 0x299   :  { %6664 = vst [vmem:[#allocation48_spill] sm:$0xff] %v4866_v4  ;;  %v3435_v47 = vsel %vm6665_vm4, %v2129_v32, 0.0  ;;  %v4880_v57 = vsel %vm6666_vm12, %v4837_v60, 0.0  ;;  %v1972_v4 = vpop.f32.mrf.mxu1  ;;  %vm6668_vm11 = vcmp.lt.s32.totalorder %v4710_v7, %v4334_v16  ;;  %vm6669_vm0 = vcmp.lt.s32.totalorder %v4710_v7, %v4380_v12  ;;  %v1902_v60 = vpop.f32.mrf.mxu0 }
 0x29a   :  { %6667 = vst [vmem:[#allocation49_spill] sm:$0xff] %v4880_v57  ;;  %v2296_v27 = vsel %vm6668_vm11, %v2132_v18, 0.0  ;;  %v2666_v32 = vsel %vm6669_vm0, %v2132_v18, 0.0  ;;  %vm6670_vm4 = vcmp.lt.s32.totalorder %v4710_v7, %v4638_v48  ;;  %vm3010_vm12 = vcmp.lt.s32.totalorder %v4710_v7, %v4604_v21 }
 0x29b   :  { %v3052_v20 = vsel %vm6670_vm4, %v2132_v18, 0.0  ;;  %v4899_v28 = vmul.f32 %v1972_v4, %v4692_v43  ;;  %v4901_v57 = vadd.f32 %v2296_v27, %v2295_v41  ;;  %v4903_v10 = vadd.f32 %v2666_v32, %v2665_v26  ;;  %v1974_v22 = vpop.f32.mrf.mxu1 }
 0x29c   :  { %v4905_v8 = vadd.f32 %v3052_v20, %v3051_v19  ;;  %v2135_v40 = vmul.f32 %v1902_v60, %v4695_v46  ;;  %vm2249_vm11 = vcmp.lt.s32.totalorder %v4737_v50, %v4334_v16  ;;  %vm2619_vm0 = vcmp.lt.s32.totalorder %v4737_v50, %v4380_v12  ;;  %v1906_v19 = vpop.f32.mrf.mxu0 }
 0x29d   :  { %6671 = vst [vmem:[#allocation50_spill] sm:$0xff] %v4899_v28  ;;  %vm6672_vm8 = vcmp.lt.s32.totalorder %v4710_v7, %v4654_v58  ;;  %v4917_v26 = vadd.f32 %v3435_v47, %v3434_v31  ;;  %vm6673_vm1 = vcmp.lt.s32.totalorder %v4683_v62, %v4339_v56  ;;  %v4923_v60 = vmul.f32 %v1974_v22, %v4695_v46  ;;  %v1978_v31 = vpop.f32.mrf.mxu1 }
 0x29e   :  { %v3438_v41 = vsel %vm6672_vm8, %v2132_v18, 0.0  ;;  %v2298_v20 = vsel %vm6673_vm1, %v2134_v52, 0.0  ;;  %v2668_v27 = vsel %vm2620_vm14, %v2134_v52, 0.0  ;;  %v3054_v18 = vsel %vm3006_vm13, %v2134_v52, 0.0 }
 0x29f   :  { %6674 = vst [vmem:[#allocation51_spill] sm:$0xff] %v4923_v60  ;;  %v4925_v4 = vadd.f32 %v3438_v41, %v3437_v24  ;;  %vm2246_vm8 = vcmp.lt.s32.totalorder %v4737_v50, %v4329_v15  ;;  %vm3002_vm1 = vcmp.lt.s32.totalorder %v4737_v50, %v4587_v14  ;;  %vm2616_vm4 = vcmp.lt.s32.totalorder %v4737_v50, %v4618_v5  ;;  %v1908_v60 = vpop.f32.mrf.mxu0  ;;  %v1980_v37 = vpop.f32.mrf.mxu1 }
 0x2a0   :  { %v2137_v22 = vmul.f32 %v1906_v19, %v4698_v39  ;;  %v2299_v24 = vsel %vm2251_vm5, %v2135_v40, 0.0  ;;  %v2669_v47 = vsel %vm2621_vm2, %v2135_v40, 0.0  ;;  %v3055_v32 = vsel %vm3007_vm6, %v2135_v40, 0.0 }
 0x2a1   :  { %v4950_v41 = vmul.f32 %v1978_v31, %v4698_v39  ;;  %v4952_v28 = vadd.f32 %v2299_v24, %v2298_v20  ;;  %v4954_v19 = vadd.f32 %v2669_v47, %v2668_v27  ;;  %v4956_v13 = vadd.f32 %v3055_v32, %v3054_v18  ;;  %v1912_v24 = vpop.f32.mrf.mxu0 }
 0x2a2   :  { %vm3388_vm5 = vcmp.lt.s32.totalorder %v4737_v50, %v4632_v9  ;;  %v2138_v2 = vmul.f32 %v1908_v60, %v4701_v42  ;;  %vm3391_vm13 = vcmp.lt.s32.totalorder %v4737_v50, %v4654_v58  ;;  %vm2625_vm14 = vcmp.lt.s32.totalorder %v4737_v50, %v4395_v54 }
 0x2a3   :  { %6675 = vst [vmem:[#allocation52_spill] sm:$0xff] %v4950_v41  ;;  %v2671_v20 = vsel %vm2623_vm3, %v2137_v22, 0.0  ;;  %v2301_v27 = vsel %vm2253_vm9, %v2137_v22, 0.0  ;;  %v3443_v18 = vsel %vm3395_vm15, %v2137_v22, 0.0  ;;  %v4978_v60 = vsel %vm3431_vm10, %v4950_v41, 0.0 }
 0x2a4   :  { %6676 = vst [vmem:[#allocation53_spill] sm:$0xff] %v4978_v60  ;;  %v4981_v31 = vmul.f32 %v1980_v37, %v4701_v42  ;;  %v4986_v47 = vsel %vm3009_vm7, %v2137_v22, 0.0  ;;  %vm6678_vm2 = vcmp.lt.s32.totalorder %v4683_v62, %v4636_v55  ;;  %vm2255_vm6 = vcmp.lt.s32.totalorder %v4737_v50, %v4560_v25  ;;  %v3821_v60 = vpop.f32.mrf.mxu1 }
 0x2a5   :  { %v4991_v32 = vsel %vm6678_vm2, %v2134_v52, 0.0  ;;  %vm3011_vm10 = vcmp.lt.s32.totalorder %v4737_v50, %v4604_v21  ;;  %v4998_v37 = vmul.f32 %v1912_v24, %v4692_v43  ;;  %vm6680_vm9 = vcmp.lt.s32.totalorder %v4710_v7, %v4395_v54  ;;  %v1914_v24 = vpop.f32.mrf.mxu0 }
 0x2a6   :  { %6677 = vst [vmem:[#allocation54_spill] sm:$0xff] %v4981_v31  ;;  %6679 = vst [vmem:[#allocation55_spill] sm:$0xff] %v4991_v32  ;;  %v2672_v22 = vsel %vm6680_vm9, %v2138_v2, 0.0  ;;  %vm6681_vm15 = vcmp.lt.s32.totalorder %v4710_v7, %v4560_v25  ;;  %vm3397_vm3 = vcmp.lt.s32.totalorder %v4737_v50, %v4640_v11  ;;  %vm6682_vm7 = vcmp.lt.s32.totalorder %v4710_v7, %v4640_v11  ;;  %v2049_v44 = vpop.f32.mrf.mxu1 }
 0x2a7   :  { %v2302_v33 = vsel %vm6681_vm15, %v2138_v2, 0.0  ;;  %v3444_v52 = vsel %vm6682_vm7, %v2138_v2, 0.0  ;;  %v2133_v31 = vmul.f32 %v3821_v60, %v4704_v1  ;;  %v2722_v41 = vadd.f32 %v2672_v22, %v2671_v20 }
 0x2a8   :  { %v2352_v61 = vadd.f32 %v2302_v33, %v2301_v27  ;;  %v3494_v6 = vadd.f32 %v3444_v52, %v3443_v18  ;;  %v5017_v30 = vmul.f32 %v1914_v24, %v4695_v46  ;;  %v3058_v32 = vsel %vm3010_vm12, %v2138_v2, 0.0  ;;  %v1918_v2 = vpop.f32.mrf.mxu0 }
 0x2a9   :  { %vm2252_vm15 = vcmp.lt.s32.totalorder %v4737_v50, %v4339_v56  ;;  %vm6683_vm7 = vcmp.lt.s32.totalorder %v4683_v62, %v4403_v49  ;;  %vm6684_vm9 = vcmp.lt.s32.totalorder %v4710_v7, %v4636_v55  ;;  %vm2261_vm2 = vcmp.lt.s32.totalorder %v4737_v50, %v4580_v3 }
 0x2aa   :  { %v5028_v33 = vsel %vm6683_vm7, %v4998_v37, 0.0  ;;  %v5033_v20 = vsel %vm6684_vm9, %v2135_v40, 0.0  ;;  %v2130_v27 = vmul.f32 %v2049_v44, %v4707_v45  ;;  %v2297_v18 = vsel %vm2249_vm11, %v2133_v31, 0.0  ;;  %v3824_v44 = vpop.f32.mrf.mxu1 }
 0x2ab   :  { %v2667_v60 = vsel %vm2619_vm0, %v2133_v31, 0.0  ;;  %vm6685_vm12 = vcmp.lt.s32.totalorder %v4737_v50, %v4638_v48  ;;  %vm3015_vm9 = vcmp.lt.s32.totalorder %v4683_v62, %v4612_v0  ;;  %v5050_v40 = vmul.f32 %v1918_v2, %v4698_v39  ;;  %v1920_v48 = vpop.f32.mrf.mxu0 }
 0x2ac   :  { %v3053_v22 = vsel %vm6685_vm12, %v2133_v31, 0.0  ;;  %v2345_v52 = vadd.f32 %v4901_v57, %v2297_v18  ;;  %v2715_v16 = vadd.f32 %v4903_v10, %v2667_v60  ;;  %vm2622_vm11 = vcmp.lt.s32.totalorder %v4737_v50, %v4383_v35  ;;  %v2059_v18 = vpop.f32.mrf.mxu1 }
 0x2ad   :  { %v5055_v24 = vadd.f32 %v4905_v8, %v3053_v22  ;;  %vm3016_vm0 = vcmp.lt.s32.totalorder %v4710_v7, %v4612_v0  ;;  %vm3017_vm7 = vcmp.lt.s32.totalorder %v4737_v50, %v4612_v0  ;;  %v2139_v12 = vmul.f32 %v3824_v44, %v4704_v1  ;;  %v1924_v5 = vpop.f32.mrf.mxu0 }
 0x2ae   :  { %v2294_v57 = vsel %vm2246_vm8, %v2130_v27, 0.0  ;;  %v2664_v10 = vsel %vm2616_vm4, %v2130_v27, 0.0  ;;  %v3050_v8 = vsel %vm3002_vm1, %v2130_v27, 0.0  ;;  %v5074_v2 = vmul.f32 %v1920_v48, %v4701_v42  ;;  %2346 = vadd.xlane.f32.xlu0 %v2345_v52  ;;  %v3827_v52 = vpop.f32.mrf.mxu1 }
 0x2af   :  { %v2341_v60 = vadd.f32 %v4839_v38, %v2294_v57  ;;  %v2711_v22 = vadd.f32 %v4841_v36, %v2664_v10  ;;  %v5079_v15 = vadd.f32 %v4843_v23, %v3050_v8  ;;  %vm3008_vm8 = vcmp.lt.s32.totalorder %v4737_v50, %v4599_v63  ;;  %v1926_v9 = vpop.f32.mrf.mxu0 }
 0x2b0   :  { %vm2627_vm4 = vcmp.lt.s32.totalorder %v4710_v7, %v4403_v49  ;;  %vm2628_vm1 = vcmp.lt.s32.totalorder %v4737_v50, %v4403_v49  ;;  %v5088_v14 = vmul.f32 %v2059_v18, %v4707_v45  ;;  %v3439_v36 = vsel %vm3391_vm13, %v2133_v31, 0.0 }
 0x2b1   :  { %v3436_v23 = vsel %vm3388_vm5, %v2130_v27, 0.0  ;;  %v2673_v38 = vsel %vm2625_vm14, %v2139_v12, 0.0  ;;  %v5100_v44 = vmul.f32 %v1924_v5, %v4692_v43  ;;  %2342 = vadd.xlane.f32.xlu1 %v2341_v60  ;;  %v5103_v48 = vadd.f32 %v4925_v4, %v3439_v36  ;;  %v2069_v27 = vpop.f32.mrf.mxu1  ;;  %v1930_v18 = vpop.f32.mrf.mxu0 }
 0x2b2   :  { %v5106_v57 = vadd.f32 %v4917_v26, %v3436_v23  ;;  %v5108_v58 = vadd.f32 %v2722_v41, %v2673_v38  ;;  %vm3394_vm5 = vcmp.lt.s32.totalorder %v4737_v50, %v4636_v55  ;;  %vm3012_vm13 = vcmp.lt.s32.totalorder %v4683_v62, %v4608_v51  ;;  %2716 = vadd.xlane.f32.xlu0 %v2715_v16 }
 0x2b3   :  { %vm3013_vm14 = vcmp.lt.s32.totalorder %v4710_v7, %v4608_v51  ;;  %v5117_v54 = vmul.f32 %v3827_v52, %v4704_v1  ;;  %v2303_v26 = vsel %vm2255_vm6, %v2139_v12, 0.0  ;;  %v3445_v4 = vsel %vm3397_vm3, %v2139_v12, 0.0  ;;  %v3830_v56 = vpop.f32.mrf.mxu1  ;;  %v1932_v60 = vpop.f32.mrf.mxu0 }
 0x2b4   :  { %v3059_v41 = vsel %vm3011_vm10, %v2139_v12, 0.0  ;;  %v5131_v31 = vmul.f32 %v1926_v9, %v4695_v46  ;;  %v5133_v10 = vadd.f32 %v2352_v61, %v2303_v26  ;;  %v5135_v25 = vadd.f32 %v3494_v6, %v3445_v4 }
 0x2b5   :  { %v3108_v8 = vadd.f32 %v3058_v32, %v4986_v47  ;;  %v5139_v11 = vmul.f32 %v2069_v27, %v4707_v45  ;;  %v2300_v21 = vsel %vm2252_vm15, %v5088_v14, 0.0  ;;  %vm6686_vm6 = vcmp.lt.s32.totalorder %v4683_v62, %v4580_v3  ;;  %2712 = vadd.xlane.f32.xlu1 %v2711_v22  ;;  %v2079_v23 = vpop.f32.mrf.mxu1 }
 0x2b6   :  { %v2307_v16 = vsel %vm6686_vm6, %v5050_v40, 0.0  ;;  %vm6687_vm10 = vcmp.lt.s32.totalorder %v4710_v7, %v4580_v3  ;;  %vm2629_vm3 = vcmp.lt.s32.totalorder %v4683_v62, %v4423_v34  ;;  %v5158_v6 = vmul.f32 %v1930_v18, %v4698_v39  ;;  %3102 = vadd.xlane.f32.xlu0 %v5055_v24 }
 0x2b7   :  { %v2308_v61 = vsel %vm6687_vm10, %v5074_v2, 0.0  ;;  %v5160_v47 = vadd.f32 %v3108_v8, %v3059_v41  ;;  %v5163_v32 = vadd.f32 %v4952_v28, %v2300_v21  ;;  %v2309_v12 = vsel %vm2261_vm2, %v5117_v54, 0.0  ;;  %v3833_v41 = vpop.f32.mrf.mxu1 }
 0x2b8   :  { %vm2631_vm15 = vcmp.lt.s32.totalorder %v4737_v50, %v4423_v34  ;;  %vm2632_vm6 = vcmp.lt.s32.totalorder %v4683_v62, %v4475_v53  ;;  %vm2633_vm10 = vcmp.lt.s32.totalorder %v4710_v7, %v4475_v53  ;;  %vm2634_vm12 = vcmp.lt.s32.totalorder %v4737_v50, %v4475_v53 }
 0x2b9   :  { %v5178_v28 = vmul.f32 %v3830_v56, %v4704_v1  ;;  %v2360_v22 = vadd.f32 %v2308_v61, %v2307_v16  ;;  %v2670_v3 = vsel %vm2622_vm11, %v5088_v14, 0.0  ;;  %v3063_v5 = vsel %vm3015_vm9, %v5050_v40, 0.0  ;;  %3098 = vadd.xlane.f32.xlu1 %v5079_v15  ;;  %v2089_v61 = vpop.f32.mrf.mxu1  ;;  %v6688_v56 = vld [vmem:[#allocation55_spill] sm:$0xff] }
 0x2ba   :  { %vm3401_vm2 = vcmp.lt.s32.totalorder %v4683_v62, %v4644_v17  ;;  %v5191_v36 = vmul.f32 %v1932_v60, %v4701_v42  ;;  %v5195_v38 = vadd.f32 %v4954_v19, %v2670_v3  ;;  %v3064_v35 = vsel %vm3016_vm0, %v5074_v2, 0.0  ;;  %v1936_v19 = vpop.f32.mrf.mxu0  ;;  %3488 = vadd.xlane.f32.xlu0 %v5103_v48 }
 0x2bb   :  { %v3065_v52 = vsel %vm3017_vm7, %v5117_v54, 0.0  ;;  %vm3018_vm9 = vcmp.lt.s32.totalorder %v4683_v62, %v4616_v29  ;;  %vm3402_vm11 = vcmp.lt.s32.totalorder %v4710_v7, %v4644_v17  ;;  %v5210_v24 = vmul.f32 %v2079_v23, %v4707_v45 }
 0x2bc   :  { %v5212_v9 = vadd.f32 %v2360_v22, %v2309_v12  ;;  %v3116_v26 = vadd.f32 %v3064_v35, %v3063_v5  ;;  %v3056_v4 = vsel %vm3008_vm8, %v5088_v14, 0.0  ;;  %vm3403_vm0 = vcmp.lt.s32.totalorder %v4737_v50, %v4644_v17  ;;  %v1938_v15 = vpop.f32.mrf.mxu0  ;;  %v6691_v5 = vld [vmem:[#allocation33_spill] sm:$0xff]  ;;  %v3836_v35 = vpop.f32.mrf.mxu1 }
 0x2bd   :  { %vm3019_vm7 = vcmp.lt.s32.totalorder %v4710_v7, %v4616_v29  ;;  %v5223_v0 = vmul.f32 %v1936_v19, %v4692_v43  ;;  %v5227_v27 = vadd.f32 %v4956_v13, %v3056_v4  ;;  %v2675_v63 = vsel %vm2627_vm4, %v5017_v30, 0.0  ;;  %3484 = vadd.xlane.f32.xlu1 %v5106_v57 }
 0x2be   :  { %v2676_v8 = vsel %vm2628_vm1, %v5139_v11, 0.0  ;;  %vm3020_vm8 = vcmp.lt.s32.totalorder %v4737_v50, %v4616_v29  ;;  %v5240_v18 = vmul.f32 %v3833_v41, %v4704_v1  ;;  %v5242_v21 = vadd.f32 %v3116_v26, %v3065_v52  ;;  %v1942_v48 = vpop.f32.mrf.mxu0  ;;  %2724 = vadd.xlane.f32.xlu0 %v5108_v58 }
 0x2bf   :  { %v2726_v13 = vadd.f32 %v2675_v63, %v5028_v33  ;;  %v3442_v16 = vsel %vm3394_vm5, %v5088_v14, 0.0  ;;  %v5252_v49 = vmul.f32 %v1938_v15, %v4695_v46  ;;  %v3490_v12 = vadd.f32 %v5033_v20, %v6688_v56  ;;  %v6689_v14 = vld [vmem:[#allocation15_spill] sm:$0xff] }
 0x2c0   :  { %v3060_v33 = vsel %vm3012_vm13, %v4998_v37, 0.0  ;;  %v3061_v55 = vsel %vm3013_vm14, %v5017_v30, 0.0  ;;  %vm2257_vm1 = vcmp.lt.s32.totalorder %v4710_v7, %v4342_v59  ;;  %v5272_v20 = vmul.f32 %v2089_v61, %v4707_v45  ;;  %v1944_v4 = vpop.f32.mrf.mxu0 }
 0x2c1   :  { %v5274_v60 = vadd.f32 %v2726_v13, %v2676_v8  ;;  %vm6690_vm13 = vcmp.lt.s32.totalorder %v4737_v50, %v4608_v51  ;;  %v3112_v3 = vadd.f32 %v3061_v55, %v3060_v33  ;;  %vm2266_vm14 = vcmp.lt.s32.totalorder %v4710_v7, %v6689_v14  ;;  %v6693_v8 = vld [vmem:[#allocation20_spill] sm:$0xff]  ;;  %v2099_v13 = vpop.f32.mrf.mxu1  ;;  %v6694_v55 = vld [vmem:[#allocation5_spill] sm:$0xff]  ;;  %2354 = vadd.xlane.f32.xlu1 %v5133_v10 }
 0x2c2   :  { %v3062_v22 = vsel %vm6690_vm13, %v5139_v11, 0.0  ;;  %vm2267_vm5 = vcmp.lt.s32.totalorder %v4737_v50, %v6689_v14  ;;  %v5287_v23 = vmul.f32 %v1942_v48, %v4698_v39  ;;  %v5290_v52 = vadd.f32 %v3490_v12, %v3442_v16  ;;  %v1948_v56 = vpop.f32.mrf.mxu0  ;;  %3496 = vadd.xlane.f32.xlu0 %v5135_v25 }
 0x2c3   :  { %v2677_v51 = vsel %vm2629_vm3, %v5050_v40, 0.0  ;;  %vm6692_vm13 = vcmp.lt.s32.totalorder %v4710_v7, %v4423_v34  ;;  %vm3399_vm4 = vcmp.lt.s32.totalorder %v4710_v7, %v6691_v5  ;;  %v5303_v26 = vmul.f32 %v3836_v35, %v4704_v1 }
 0x2c4   :  { %v2678_v19 = vsel %vm6692_vm13, %v5074_v2, 0.0  ;;  %v5305_v57 = vadd.f32 %v3112_v3, %v3062_v22  ;;  %v2679_v41 = vsel %vm2631_vm15, %v5117_v54, 0.0  ;;  %v5314_v15 = vmul.f32 %v1944_v4, %v4701_v42  ;;  %v3839_v22 = vpop.f32.mrf.mxu1 }
 0x2c5   :  { %v2730_v63 = vadd.f32 %v2678_v19, %v2677_v51  ;;  %v2680_v16 = vsel %vm2632_vm6, %v5100_v44, 0.0  ;;  %v2681_v34 = vsel %vm2633_vm10, %v5131_v31, 0.0  ;;  %v2682_v61 = vsel %vm2634_vm12, %v5210_v24, 0.0  ;;  %v6696_v19 = vld [vmem:[#allocation35_spill] sm:$0xff]  ;;  %3110 = vadd.xlane.f32.xlu1 %v5160_v47 }
 0x2c6   :  { %vm3400_vm15 = vcmp.lt.s32.totalorder %v4737_v50, %v6691_v5  ;;  %vm3022_vm13 = vcmp.lt.s32.totalorder %v4710_v7, %v6693_v8  ;;  %vm3023_vm3 = vcmp.lt.s32.totalorder %v4737_v50, %v6693_v8  ;;  %v5336_v58 = vmul.f32 %v2099_v13, %v4707_v45  ;;  %2350 = vadd.xlane.f32.xlu0 %v5163_v32 }
 0x2c7   :  { %v5338_v12 = vadd.f32 %v2730_v63, %v2679_v41  ;;  %v2734_v33 = vadd.f32 %v2681_v34, %v2680_v16  ;;  %v3449_v53 = vsel %vm3401_vm2, %v5050_v40, 0.0  ;;  %vm2262_vm12 = vcmp.lt.s32.totalorder %v4683_v62, %v6694_v55  ;;  %v2109_v41 = vpop.f32.mrf.mxu1  ;;  %v6698_v34 = vld [vmem:[#allocation22_spill] sm:$0xff] }
 0x2c8   :  { %v5347_v48 = vmul.f32 %v1948_v56, %v4692_v43  ;;  %v3450_v3 = vsel %vm3402_vm11, %v5074_v2, 0.0  ;;  %v3451_v35 = vsel %vm3403_vm0, %v5117_v54, 0.0  ;;  %v3066_v40 = vsel %vm3018_vm9, %v5100_v44, 0.0  ;;  %v6695_v43 = vld [vmem:[#allocation11_spill] sm:$0xff]  ;;  %v1950_v2 = vpop.f32.mrf.mxu0 }
 0x2c9   :  { %vm2263_vm6 = vcmp.lt.s32.totalorder %v4710_v7, %v6694_v55  ;;  %vm2264_vm10 = vcmp.lt.s32.totalorder %v4737_v50, %v6694_v55  ;;  %vm2638_vm2 = vcmp.lt.s32.totalorder %v4683_v62, %v6695_v43  ;;  %vm2640_vm0 = vcmp.lt.s32.totalorder %v4737_v50, %v6695_v43  ;;  %2362 = vadd.xlane.f32.xlu1 %v5212_v9 }
 0x2ca   :  { %v5373_v17 = vmul.f32 %v3839_v22, %v4704_v1  ;;  %v5375_v54 = vadd.f32 %v2734_v33, %v2682_v61  ;;  %v3502_v10 = vadd.f32 %v3450_v3, %v3449_v53  ;;  %v3067_v51 = vsel %vm3019_vm7, %v5131_v31, 0.0  ;;  %v1954_v61 = vpop.f32.mrf.mxu0  ;;  %v3842_v53 = vpop.f32.mrf.mxu1  ;;  %2720 = vadd.xlane.f32.xlu0 %v5195_v38 }
 0x2cb   :  { %v5386_v4 = vmul.f32 %v1950_v2, %v4695_v46  ;;  %v3068_v63 = vsel %vm3020_vm8, %v5210_v24, 0.0  ;;  %v3120_v13 = vadd.f32 %v3067_v51, %v3066_v40  ;;  %vm6697_vm7 = vcmp.lt.s32.totalorder %v4683_v62, %v4342_v59 }
 0x2cc   :  { %v2304_v16 = vsel %vm6697_vm7, %v4998_v37, 0.0  ;;  %v5400_v46 = vmul.f32 %v2109_v41, %v4707_v45  ;;  %v5402_v56 = vadd.f32 %v3502_v10, %v3451_v35  ;;  %v2305_v29 = vsel %vm2257_vm1, %v5017_v30, 0.0  ;;  %v6701_v35 = vld [vmem:[#allocation10_spill] sm:$0xff]  ;;  %v1956_v2 = vpop.f32.mrf.mxu0  ;;  %v2119_v51 = vpop.f32.mrf.mxu1 }
 0x2cd   :  { %vm6699_vm8 = vcmp.lt.s32.totalorder %v4737_v50, %v4342_v59  ;;  %vm3406_vm7 = vcmp.lt.s32.totalorder %v4737_v50, %v6696_v19  ;;  %v5419_v33 = vmul.f32 %v1954_v61, %v4698_v39  ;;  %v5422_v22 = vadd.f32 %v3120_v13, %v3068_v63  ;;  %v6704_v13 = vld [vmem:[#allocation29_spill] sm:$0xff]  ;;  %v6706_v61 = vld [vmem:[#allocation18_spill] sm:$0xff]  ;;  %3118 = vadd.xlane.f32.xlu1 %v5242_v21 }
 0x2ce   :  { %v2306_v25 = vsel %vm6699_vm8, %v5139_v11, 0.0  ;;  %v2356_v3 = vadd.f32 %v2305_v29, %v2304_v16  ;;  %vm6700_vm1 = vcmp.lt.s32.totalorder %v4683_v62, %v6689_v14  ;;  %v5431_v40 = vmul.f32 %v3842_v53, %v4704_v1  ;;  %v6703_v1 = vld [vmem:[#allocation16_spill] sm:$0xff]  ;;  %3106 = vadd.xlane.f32.xlu0 %v5227_v27 }
 0x2cf   :  { %v2313_v59 = vsel %vm6700_vm1, %v5158_v6, 0.0  ;;  %v2314_v39 = vsel %vm2266_vm14, %v5191_v36, 0.0  ;;  %v2315_v47 = vsel %vm2267_vm5, %v5178_v28, 0.0  ;;  %vm6702_vm1 = vcmp.lt.s32.totalorder %v4683_v62, %v6691_v5 }
 0x2d0   :  { %v3446_v10 = vsel %vm6702_vm1, %v4998_v37, 0.0  ;;  %vm2636_vm8 = vcmp.lt.s32.totalorder %v4710_v7, %v6701_v35  ;;  %vm2637_vm9 = vcmp.lt.s32.totalorder %v4737_v50, %v6701_v35  ;;  %vm2271_vm11 = vcmp.lt.s32.totalorder %v4683_v62, %v6703_v1 }
 0x2d1   :  { %v5456_v14 = vmul.f32 %v1956_v2, %v4701_v42  ;;  %v5459_v37 = vadd.f32 %v2356_v3, %v2306_v25  ;;  %v2368_v41 = vadd.f32 %v2314_v39, %v2313_v59  ;;  %v3447_v63 = vsel %vm3399_vm4, %v5017_v30, 0.0  ;;  %v6707_v3 = vld [vmem:[#allocation6_spill] sm:$0xff]  ;;  %v6708_v59 = vld [vmem:[#allocation24_spill] sm:$0xff]  ;;  %2728 = vadd.xlane.f32.xlu1 %v5274_v60 }
 0x2d2   :  { %vm3407_vm1 = vcmp.lt.s32.totalorder %v4683_v62, %v6704_v13  ;;  %vm3408_vm5 = vcmp.lt.s32.totalorder %v4710_v7, %v6704_v13  ;;  %v5470_v42 = vmul.f32 %v2119_v51, %v4707_v45  ;;  %v3448_v32 = vsel %vm3400_vm15, %v5139_v11, 0.0  ;;  %v6723_v60 = vld [vmem:[#allocation34_spill] sm:$0xff]  ;;  %3492 = vadd.xlane.f32.xlu0 %v5290_v52 }
 0x2d3   :  { %v3498_v16 = vadd.f32 %v3447_v63, %v3446_v10  ;;  %vm6705_vm14 = vcmp.lt.s32.totalorder %v4683_v62, %v6693_v8  ;;  %vm2284_vm4 = vcmp.lt.s32.totalorder %v4710_v7, %v6706_v61  ;;  %v5483_v29 = vadd.f32 %v2368_v41, %v2315_v47  ;;  %v6712_v41 = vld [vmem:[#allocation37_spill] sm:$0xff] }
 0x2d4   :  { %v3069_v30 = vsel %vm6705_vm14, %v5158_v6, 0.0  ;;  %v3070_v45 = vsel %vm3022_vm13, %v5191_v36, 0.0  ;;  %v3071_v11 = vsel %vm3023_vm3, %v5178_v28, 0.0  ;;  %v2310_v5 = vsel %vm2262_vm12, %v5100_v44, 0.0 }
 0x2d5   :  { %vm3409_vm15 = vcmp.lt.s32.totalorder %v4737_v50, %v6704_v13  ;;  %vm2285_vm14 = vcmp.lt.s32.totalorder %v4737_v50, %v6706_v61  ;;  %v5501_v9 = vadd.f32 %v3498_v16, %v3448_v32  ;;  %v3124_v25 = vadd.f32 %v3070_v45, %v3069_v30  ;;  %v6714_v16 = vld [vmem:[#allocation36_spill] sm:$0xff]  ;;  %v6718_v45 = vld [vmem:[#allocation21_spill] sm:$0xff]  ;;  %3114 = vadd.xlane.f32.xlu1 %v5305_v57 }
 0x2d6   :  { %v2311_v8 = vsel %vm2263_vm6, %v5131_v31, 0.0  ;;  %v2312_v53 = vsel %vm2264_vm10, %v5210_v24, 0.0  ;;  %vm2268_vm3 = vcmp.lt.s32.totalorder %v4683_v62, %v6707_v3  ;;  %v2686_v39 = vsel %vm2638_vm2, %v5223_v0, 0.0  ;;  %v6725_v13 = vld [vmem:[#allocation49_spill] sm:$0xff]  ;;  %2732 = vadd.xlane.f32.xlu0 %v5338_v12 }
 0x2d7   :  { %v2364_v2 = vadd.f32 %v2311_v8, %v2310_v5  ;;  %vm6709_vm12 = vcmp.lt.s32.totalorder %v4710_v7, %v6695_v43  ;;  %v2688_v47 = vsel %vm2640_vm0, %v5272_v20, 0.0  ;;  %vm2269_vm6 = vcmp.lt.s32.totalorder %v4710_v7, %v6707_v3  ;;  %v6719_v8 = vld [vmem:[#allocation13_spill] sm:$0xff] }
 0x2d8   :  { %v2687_v55 = vsel %vm6709_vm12, %v5252_v49, 0.0  ;;  %vm3029_vm2 = vcmp.lt.s32.totalorder %v4737_v50, %v6708_v59  ;;  %v5536_v38 = vadd.f32 %v3124_v25, %v3071_v11  ;;  %vm6710_vm12 = vcmp.lt.s32.totalorder %v4683_v62, %v6696_v19 }
 0x2d9   :  { %v2742_v10 = vadd.f32 %v2687_v55, %v2686_v39  ;;  %v3452_v43 = vsel %vm6710_vm12, %v5100_v44, 0.0  ;;  %vm6711_vm0 = vcmp.lt.s32.totalorder %v4710_v7, %v6696_v19  ;;  %v5551_v63 = vadd.f32 %v2364_v2, %v2312_v53  ;;  %2736 = vadd.xlane.f32.xlu1 %v5375_v54 }
 0x2da   :  { %v3453_v51 = vsel %vm6711_vm0, %v5131_v31, 0.0  ;;  %v3454_v44 = vsel %vm3406_vm7, %v5210_v24, 0.0  ;;  %vm6713_vm12 = vcmp.lt.s32.totalorder %v4683_v62, %v6698_v34  ;;  %vm6715_vm7 = vcmp.lt.s32.totalorder %v4710_v7, %v6698_v34  ;;  %3504 = vadd.xlane.f32.xlu0 %v5402_v56 }
 0x2db   :  { %v3506_v32 = vadd.f32 %v3453_v51, %v3452_v43  ;;  %v3072_v31 = vsel %vm6713_vm12, %v5223_v0, 0.0  ;;  %v5567_v21 = vadd.f32 %v2742_v10, %v2688_v47  ;;  %v3073_v24 = vsel %vm6715_vm7, %v5252_v49, 0.0  ;;  %v6722_v10 = vld [vmem:[#allocation25_spill] sm:$0xff] }
 0x2dc   :  { %vm6716_vm12 = vcmp.lt.s32.totalorder %v4737_v50, %v6698_v34  ;;  %vm6717_vm0 = vcmp.lt.s32.totalorder %v4683_v62, %v6701_v35  ;;  %vm2641_vm10 = vcmp.lt.s32.totalorder %v4683_v62, %v6718_v45  ;;  %vm3041_vm13 = vcmp.lt.s32.totalorder %v4737_v50, %v6714_v16 }
 0x2dd   :  { %v3074_v19 = vsel %vm6716_vm12, %v5272_v20, 0.0  ;;  %v2683_v30 = vsel %vm6717_vm0, %v5158_v6, 0.0  ;;  %v5586_v11 = vadd.f32 %v3506_v32, %v3454_v44  ;;  %v3128_v5 = vadd.f32 %v3073_v24, %v3072_v31  ;;  %v6724_v44 = vld [vmem:[#allocation48_spill] sm:$0xff]  ;;  %3122 = vadd.xlane.f32.xlu1 %v5422_v22 }
 0x2de   :  { %v2684_v34 = vsel %vm2636_vm8, %v5191_v36, 0.0  ;;  %v2685_v25 = vsel %vm2637_vm9, %v5178_v28, 0.0  ;;  %vm2642_vm7 = vcmp.lt.s32.totalorder %v4710_v7, %v6718_v45  ;;  %v2319_v53 = vsel %vm2271_vm11, %v5287_v23, 0.0  ;;  %2358 = vadd.xlane.f32.xlu0 %v5459_v37 }
 0x2df   :  { %v2738_v27 = vadd.f32 %v2684_v34, %v2683_v30  ;;  %vm6720_vm8 = vcmp.lt.s32.totalorder %v4710_v7, %v6703_v1  ;;  %vm6721_vm9 = vcmp.lt.s32.totalorder %v4737_v50, %v6703_v1  ;;  %vm2643_vm12 = vcmp.lt.s32.totalorder %v4737_v50, %v6718_v45  ;;  %v6729_v34 = vld [vmem:[#allocation19_spill] sm:$0xff] }
 0x2e0   :  { %v2320_v2 = vsel %vm6720_vm8, %v5314_v15, 0.0  ;;  %v2321_v35 = vsel %vm6721_vm9, %v5240_v18, 0.0  ;;  %vm2652_vm0 = vcmp.lt.s32.totalorder %v4737_v50, %v6719_v8  ;;  %v5617_v39 = vadd.f32 %v3128_v5, %v3074_v19  ;;  %v6726_v19 = vld [vmem:[#allocation31_spill] sm:$0xff] }
 0x2e1   :  { %v2376_v55 = vadd.f32 %v2320_v2, %v2319_v53  ;;  %v3455_v47 = vsel %vm3407_vm1, %v5158_v6, 0.0  ;;  %v3456_v1 = vsel %vm3408_vm5, %v5191_v36, 0.0  ;;  %vm2653_vm11 = vcmp.lt.s32.totalorder %v4683_v62, %v6722_v10  ;;  %2370 = vadd.xlane.f32.xlu1 %v5483_v29 }
 0x2e2   :  { %vm2654_vm8 = vcmp.lt.s32.totalorder %v4710_v7, %v6722_v10  ;;  %vm3037_vm9 = vcmp.lt.s32.totalorder %v4710_v7, %v6723_v60  ;;  %v5633_v43 = vadd.f32 %v2738_v27, %v2685_v25  ;;  %v3457_v6 = vsel %vm3409_vm15, %v5178_v28, 0.0  ;;  %3500 = vadd.xlane.f32.xlu0 %v5501_v9 }
 0x2e3   :  { %v3510_v51 = vadd.f32 %v3456_v1, %v3455_v47  ;;  %v2332_v36 = vsel %vm2284_vm4, %v6724_v44, 0.0  ;;  %vm2655_vm5 = vcmp.lt.s32.totalorder %v4737_v50, %v6722_v10  ;;  %v5648_v32 = vadd.f32 %v2376_v55, %v2321_v35  ;;  %v6734_v55 = vld [vmem:[#allocation8_spill] sm:$0xff] }
 0x2e4   :  { %v2333_v28 = vsel %vm2285_vm14, %v5373_v17, 0.0  ;;  %v2392_v31 = vadd.f32 %v2332_v36, %v6725_v13  ;;  %v2316_v24 = vsel %vm2268_vm3, %v5223_v0, 0.0  ;;  %v2317_v61 = vsel %vm2269_vm6, %v5252_v49, 0.0  ;;  %v6735_v47 = vld [vmem:[#allocation12_spill] sm:$0xff] }
 0x2e5   :  { %v5663_v52 = vadd.f32 %v3510_v51, %v3457_v6  ;;  %vm6727_vm14 = vcmp.lt.s32.totalorder %v4737_v50, %v6707_v3  ;;  %vm6728_vm3 = vcmp.lt.s32.totalorder %v4683_v62, %v6708_v59  ;;  %vm3415_vm15 = vcmp.lt.s32.totalorder %v4737_v50, %v6726_v19  ;;  %v6736_v6 = vld [vmem:[#allocation47_spill] sm:$0xff]  ;;  %3126 = vadd.xlane.f32.xlu1 %v5536_v38  ;;  %v6770_v38 = vld [vmem:[#allocation41_spill] sm:$0xff] }
 0x2e6   :  { %v2318_v30 = vsel %vm6727_vm14, %v5272_v20, 0.0  ;;  %v3075_v5 = vsel %vm6728_vm3, %v5287_v23, 0.0  ;;  %v5684_v25 = vadd.f32 %v2392_v31, %v2333_v28  ;;  %v2372_v3 = vadd.f32 %v2317_v61, %v2316_v24  ;;  %v6739_v28 = vld [vmem:[#allocation38_spill] sm:$0xff]  ;;  %v6740_v24 = vld [vmem:[#allocation44_spill] sm:$0xff]  ;;  %2366 = vadd.xlane.f32.xlu0 %v5551_v63 }
 0x2e7   :  { %vm6730_vm6 = vcmp.lt.s32.totalorder %v4710_v7, %v6708_v59  ;;  %v3077_v53 = vsel %vm3029_vm2, %v5240_v18, 0.0  ;;  %vm6731_vm3 = vcmp.lt.s32.totalorder %v4683_v62, %v6712_v41  ;;  %vm6732_vm1 = vcmp.lt.s32.totalorder %v4710_v7, %v6712_v41 }
 0x2e8   :  { %v3076_v27 = vsel %vm6730_vm6, %v5314_v15, 0.0  ;;  %v3458_v57 = vsel %vm6731_vm3, %v5223_v0, 0.0  ;;  %v3459_v35 = vsel %vm6732_vm1, %v5252_v49, 0.0  ;;  %vm6733_vm6 = vcmp.lt.s32.totalorder %v4737_v50, %v6712_v41 }
 0x2e9   :  { %v3132_v2 = vadd.f32 %v3076_v27, %v3075_v5  ;;  %v3460_v59 = vsel %vm6733_vm6, %v5272_v20, 0.0  ;;  %v5713_v1 = vadd.f32 %v2372_v3, %v2318_v30  ;;  %v3514_v0 = vadd.f32 %v3459_v35, %v3458_v57  ;;  %v6742_v30 = vld [vmem:[#allocation27_spill] sm:$0xff]  ;;  %v6743_v3 = vld [vmem:[#allocation45_spill] sm:$0xff]  ;;  %v6745_v35 = vld [vmem:[#allocation14_spill] sm:$0xff]  ;;  %2744 = vadd.xlane.f32.xlu1 %v5567_v21 }
 0x2ea   :  { %vm6737_vm1 = vcmp.lt.s32.totalorder %v4683_v62, %v6714_v16  ;;  %vm6738_vm3 = vcmp.lt.s32.totalorder %v4710_v7, %v6714_v16  ;;  %vm2281_vm6 = vcmp.lt.s32.totalorder %v4710_v7, %v6734_v55  ;;  %vm2282_vm14 = vcmp.lt.s32.totalorder %v4737_v50, %v6734_v55  ;;  %3508 = vadd.xlane.f32.xlu0 %v5586_v11 }
 0x2eb   :  { %v3087_v49 = vsel %vm6737_vm1, %v6736_v6, 0.0  ;;  %v3088_v20 = vsel %vm6738_vm3, %v6724_v44, 0.0  ;;  %vm2645_vm2 = vcmp.lt.s32.totalorder %v4710_v7, %v6735_v47  ;;  %v5731_v12 = vadd.f32 %v3132_v2, %v3077_v53  ;;  %v6744_v53 = vld [vmem:[#allocation7_spill] sm:$0xff] }
 0x2ec   :  { %v3089_v41 = vsel %vm3041_vm13, %v5373_v17, 0.0  ;;  %v3148_v51 = vadd.f32 %v3088_v20, %v3087_v49  ;;  %v2689_v36 = vsel %vm2641_vm10, %v5287_v23, 0.0  ;;  %vm3422_vm1 = vcmp.lt.s32.totalorder %v4683_v62, %v6739_v28  ;;  %v6747_v20 = vld [vmem:[#allocation46_spill] sm:$0xff] }
 0x2ed   :  { %vm3423_vm3 = vcmp.lt.s32.totalorder %v4710_v7, %v6739_v28  ;;  %v5748_v13 = vadd.f32 %v3514_v0, %v3460_v59  ;;  %v2690_v16 = vsel %vm2642_vm7, %v5314_v15, 0.0  ;;  %v2691_v31 = vsel %vm2643_vm12, %v5240_v18, 0.0  ;;  %3130 = vadd.xlane.f32.xlu1 %v5617_v39 }
 0x2ee   :  { %vm6741_vm13 = vcmp.lt.s32.totalorder %v4710_v7, %v6719_v8  ;;  %vm3030_vm10 = vcmp.lt.s32.totalorder %v4683_v62, %v6742_v30  ;;  %vm3031_vm4 = vcmp.lt.s32.totalorder %v4710_v7, %v6742_v30  ;;  %v5766_v54 = vadd.f32 %v3148_v51, %v3089_v41  ;;  %2740 = vadd.xlane.f32.xlu0 %v5633_v43 }
 0x2ef   :  { %v2699_v61 = vsel %vm6741_vm13, %v6740_v24, 0.0  ;;  %v2746_v5 = vadd.f32 %v2690_v16, %v2689_v36  ;;  %v2700_v45 = vsel %vm2652_vm0, %v5400_v46, 0.0  ;;  %vm2274_vm7 = vcmp.lt.s32.totalorder %v4683_v62, %v6744_v53  ;;  %v6750_v16 = vld [vmem:[#allocation26_spill] sm:$0xff] }
 0x2f0   :  { %v2758_v27 = vadd.f32 %v2699_v61, %v6743_v3  ;;  %vm3032_vm12 = vcmp.lt.s32.totalorder %v4737_v50, %v6742_v30  ;;  %v2701_v2 = vsel %vm2653_vm11, %v6736_v6, 0.0  ;;  %v2702_v8 = vsel %vm2654_vm8, %v6724_v44, 0.0  ;;  %v6753_v61 = vld [vmem:[#allocation54_spill] sm:$0xff] }
 0x2f1   :  { %v2703_v57 = vsel %vm2655_vm5, %v5373_v17, 0.0  ;;  %v3085_v56 = vsel %vm3037_vm9, %v6740_v24, 0.0  ;;  %vm2275_vm0 = vcmp.lt.s32.totalorder %v4710_v7, %v6744_v53  ;;  %v5800_v59 = vadd.f32 %v2746_v5, %v2691_v31  ;;  %v6751_v31 = vld [vmem:[#allocation52_spill] sm:$0xff]  ;;  %2378 = vadd.xlane.f32.xlu1 %v5648_v32 }
 0x2f2   :  { %v5802_v0 = vadd.f32 %v2758_v27, %v2700_v45  ;;  %v2762_v10 = vadd.f32 %v2702_v8, %v2701_v2  ;;  %vm6746_vm8 = vcmp.lt.s32.totalorder %v4737_v50, %v6723_v60  ;;  %v3144_v41 = vadd.f32 %v3085_v56, %v6747_v20  ;;  %v6757_v27 = vld [vmem:[#allocation42_spill] sm:$0xff]  ;;  %v6759_v8 = vld [vmem:[#allocation32_spill] sm:$0xff]  ;;  %3512 = vadd.xlane.f32.xlu0 %v5663_v52 }
 0x2f3   :  { %v3086_v49 = vsel %vm6746_vm8, %v5400_v46, 0.0  ;;  %vm6748_vm13 = vcmp.lt.s32.totalorder %v4683_v62, %v6726_v19  ;;  %vm6749_vm11 = vcmp.lt.s32.totalorder %v4710_v7, %v6726_v19  ;;  %v3463_v36 = vsel %vm3415_vm15, %v5240_v18, 0.0  ;;  %v6755_v19 = vld [vmem:[#allocation17_spill] sm:$0xff] }
 0x2f4   :  { %v3461_v51 = vsel %vm6748_vm13, %v5287_v23, 0.0  ;;  %v3462_v60 = vsel %vm6749_vm11, %v5314_v15, 0.0  ;;  %vm2659_vm8 = vcmp.lt.s32.totalorder %v4683_v62, %v6750_v16  ;;  %v5832_v23 = vadd.f32 %v2762_v10, %v2703_v57  ;;  %v6761_v10 = vld [vmem:[#allocation28_spill] sm:$0xff] }
 0x2f5   :  { %v3518_v22 = vadd.f32 %v3462_v60, %v3461_v51  ;;  %vm6752_vm11 = vcmp.lt.s32.totalorder %v4683_v62, %v6729_v34  ;;  %vm6754_vm15 = vcmp.lt.s32.totalorder %v4710_v7, %v6729_v34  ;;  %vm2277_vm13 = vcmp.lt.s32.totalorder %v4683_v62, %v6755_v19  ;;  %2394 = vadd.xlane.f32.xlu1 %v5684_v25  ;;  %v2404_v25 = vld [vmem:[#allocation2] sm:$0xff] }
 0x2f6   :  { %v2337_v15 = vsel %vm6752_vm11, %v6751_v31, 0.0  ;;  %v2338_v18 = vsel %vm6754_vm15, %v6753_v61, 0.0  ;;  %v5847_v5 = vadd.f32 %v3144_v41, %v3086_v49  ;;  %vm6756_vm9 = vcmp.lt.s32.totalorder %v4737_v50, %v6729_v34  ;;  %2374 = vadd.xlane.f32.xlu0 %v5713_v1  ;;  %v2405_v1 = vld [vmem:[#allocation2 + $0x8] sm:$0xff] }
 0x2f7   :  { %v2339_v45 = vsel %vm6756_vm9, %v5431_v40, 0.0  ;;  %v2400_v3 = vadd.f32 %v2338_v18, %v2337_v15  ;;  %vm6758_vm11 = vcmp.lt.s32.totalorder %v4683_v62, %v6734_v55  ;;  %v5861_v37 = vadd.f32 %v3518_v22, %v3463_v36  ;;  %v6764_v36 = vld [vmem:[#allocation9_spill] sm:$0xff] }
 0x2f8   :  { %v2328_v2 = vsel %vm6758_vm11, %v6757_v27, 0.0  ;;  %v2329_v34 = vsel %vm2281_vm6, %v6740_v24, 0.0  ;;  %v2330_v57 = vsel %vm2282_vm14, %v5400_v46, 0.0  ;;  %vm6760_vm9 = vcmp.lt.s32.totalorder %v4683_v62, %v6735_v47 }
 0x2f9   :  { %v2692_v56 = vsel %vm6760_vm9, %v5347_v48, 0.0  ;;  %vm3033_vm11 = vcmp.lt.s32.totalorder %v4683_v62, %v6761_v10  ;;  %vm3417_vm5 = vcmp.lt.s32.totalorder %v4710_v7, %v6759_v8  ;;  %vm3418_vm15 = vcmp.lt.s32.totalorder %v4737_v50, %v6759_v8  ;;  %3134 = vadd.xlane.f32.xlu1 %v5731_v12  ;;  %v2406_v12 = vld [vmem:[#allocation2 + $0x10] sm:$0xff] }
 0x2fa   :  { %v5882_v49 = vadd.f32 %v2400_v3, %v2339_v45  ;;  %v2388_v55 = vadd.f32 %v2329_v34, %v2328_v2  ;;  %v2693_v20 = vsel %vm2645_vm2, %v5386_v4, 0.0  ;;  %vm6762_vm14 = vcmp.lt.s32.totalorder %v4737_v50, %v6735_v47  ;;  %3516 = vadd.xlane.f32.xlu0 %v5748_v13 }
 0x2fb   :  { %v2694_v41 = vsel %vm6762_vm14, %v5336_v58, 0.0  ;;  %v2750_v29 = vadd.f32 %v2693_v20, %v2692_v56  ;;  %v3470_v51 = vsel %vm3422_vm1, %v6757_v27, 0.0  ;;  %v3471_v60 = vsel %vm3423_vm3, %v6740_v24, 0.0  ;;  %v6765_v24 = vld [vmem:[#allocation30_spill] sm:$0xff]  ;;  %v6766_v27 = vld [vmem:[#allocation23_spill] sm:$0xff] }
 0x2fc   :  { %vm6763_vm2 = vcmp.lt.s32.totalorder %v4737_v50, %v6739_v28  ;;  %vm2286_vm14 = vcmp.lt.s32.totalorder %v4683_v62, %v6764_v36  ;;  %vm2287_vm9 = vcmp.lt.s32.totalorder %v4710_v7, %v6764_v36  ;;  %vm2288_vm6 = vcmp.lt.s32.totalorder %v4737_v50, %v6764_v36 }
 0x2fd   :  { %v3472_v47 = vsel %vm6763_vm2, %v5400_v46, 0.0  ;;  %v5915_v22 = vadd.f32 %v2388_v55, %v2330_v57  ;;  %v3530_v15 = vadd.f32 %v3471_v60, %v3470_v51  ;;  %v3078_v28 = vsel %vm3030_vm10, %v5347_v48, 0.0  ;;  %v6768_v57 = vld [vmem:[#allocation50_spill] sm:$0xff]  ;;  %v6774_v51 = vld [vmem:[#allocation43_spill] sm:$0xff]  ;;  %3150 = vadd.xlane.f32.xlu1 %v5766_v54 }
 0x2fe   :  { %v3079_v46 = vsel %vm3031_vm4, %v5386_v4, 0.0  ;;  %vm3042_vm1 = vcmp.lt.s32.totalorder %v4683_v62, %v6765_v24  ;;  %vm3043_vm3 = vcmp.lt.s32.totalorder %v4710_v7, %v6765_v24  ;;  %v5929_v9 = vadd.f32 %v2750_v29, %v2694_v41  ;;  %v6771_v41 = vld [vmem:[#allocation51_spill] sm:$0xff]  ;;  %2748 = vadd.xlane.f32.xlu0 %v5800_v59 }
 0x2ff   :  { %v3080_v18 = vsel %vm3032_vm12, %v5336_v58, 0.0  ;;  %v3136_v45 = vadd.f32 %v3079_v46, %v3078_v28  ;;  %v2322_v3 = vsel %vm2274_vm7, %v5347_v48, 0.0  ;;  %v5944_v2 = vadd.f32 %v3530_v15, %v3472_v47  ;;  %v6777_v28 = vld [vmem:[#allocation39_spill] sm:$0xff] }
 0x300   :  { %v2323_v30 = vsel %vm2275_vm0, %v5386_v4, 0.0  ;;  %vm6767_vm12 = vcmp.lt.s32.totalorder %v4737_v50, %v6744_v53  ;;  %vm6769_vm7 = vcmp.lt.s32.totalorder %v4683_v62, %v6745_v35  ;;  %vm6772_vm0 = vcmp.lt.s32.totalorder %v4710_v7, %v6745_v35 }
 0x301   :  { %v2324_v34 = vsel %vm6767_vm12, %v5336_v58, 0.0  ;;  %v2704_v56 = vsel %vm6769_vm7, %v6768_v57, 0.0  ;;  %v5964_v55 = vadd.f32 %v3136_v45, %v3080_v18  ;;  %v2380_v20 = vadd.f32 %v2323_v30, %v2322_v3  ;;  %v6011_v45 = vpop.permute.xlu0 %3381  ;;  %2760 = vadd.xlane.f32.xlu1 %v5802_v0 }
 0x302   :  { %v2705_v53 = vsel %vm6772_vm0, %v6771_v41, 0.0  ;;  %vm6773_vm12 = vcmp.lt.s32.totalorder %v4737_v50, %v6745_v35  ;;  %vm3046_vm7 = vcmp.lt.s32.totalorder %v4710_v7, %v6770_v38  ;;  %v2707_v35 = vsel %vm2659_vm8, %v6751_v31, 0.0  ;;  %2764 = vadd.xlane.f32.xlu0 %v5832_v23 }
 0x303   :  { %v2706_v29 = vsel %vm6773_vm12, %v5470_v42, 0.0  ;;  %v2766_v60 = vadd.f32 %v2705_v53, %v2704_v56  ;;  %vm6775_vm0 = vcmp.lt.s32.totalorder %v4710_v7, %v6750_v16  ;;  %vm6776_vm12 = vcmp.lt.s32.totalorder %v4737_v50, %v6750_v16 }
 0x304   :  { %v2708_v47 = vsel %vm6775_vm0, %v6753_v61, 0.0  ;;  %v2709_v15 = vsel %vm6776_vm12, %v5431_v40, 0.0  ;;  %vm3419_vm2 = vcmp.lt.s32.totalorder %v4683_v62, %v6777_v28  ;;  %vm3420_vm10 = vcmp.lt.s32.totalorder %v4710_v7, %v6777_v28 }
 0x305   :  { %vm3421_vm4 = vcmp.lt.s32.totalorder %v4737_v50, %v6777_v28  ;;  %v6001_v63 = vadd.f32 %v2380_v20, %v2324_v34  ;;  %v2770_v46 = vadd.f32 %v2708_v47, %v2707_v35  ;;  %v2325_v18 = vsel %vm2277_vm13, %v5419_v33, 0.0  ;;  %v6781_v20 = vld [vmem:[#allocation40_spill] sm:$0xff]  ;;  %3146 = vadd.xlane.f32.xlu1 %v5847_v5 }
 0x306   :  { %vm6778_vm8 = vcmp.lt.s32.totalorder %v4710_v7, %v6755_v19  ;;  %v6014_v3 = vadd.f32 %v2766_v60, %v2706_v29  ;;  %vm6779_vm0 = vcmp.lt.s32.totalorder %v4737_v50, %v6755_v19  ;;  %vm6780_vm13 = vcmp.lt.s32.totalorder %v4683_v62, %v6759_v8  ;;  %3520 = vadd.xlane.f32.xlu0 %v5861_v37 }
 0x307   :  { %v2326_v16 = vsel %vm6778_vm8, %v5456_v14, 0.0  ;;  %v2327_v30 = vsel %vm6779_vm0, %v5303_v26, 0.0  ;;  %v3464_v56 = vsel %vm6780_vm13, %v5347_v48, 0.0  ;;  %vm3425_vm12 = vcmp.lt.s32.totalorder %v4683_v62, %v6781_v20 }
 0x308   :  { %v2384_v34 = vadd.f32 %v2326_v16, %v2325_v18  ;;  %vm3426_vm8 = vcmp.lt.s32.totalorder %v4710_v7, %v6781_v20  ;;  %v6028_v21 = vadd.f32 %v2770_v46, %v2709_v15  ;;  %v3465_v19 = vsel %vm3417_vm5, %v5386_v4, 0.0 }
 0x309   :  { %v3466_v53 = vsel %vm3418_vm15, %v5336_v58, 0.0  ;;  %v3081_v48 = vsel %vm3033_vm11, %v5419_v33, 0.0  ;;  %vm3427_vm0 = vcmp.lt.s32.totalorder %v4737_v50, %v6781_v20  ;;  %v3522_v60 = vadd.f32 %v3465_v19, %v3464_v56  ;;  %2402 = vadd.xlane.f32.xlu1 %v5882_v49  ;;  %v2792_v20 = vld [vmem:[#allocation2 + $0x190] sm:$0xff] }
 0x30a   :  { %v6045_v29 = vadd.f32 %v2384_v34, %v2327_v30  ;;  %vm6782_vm5 = vcmp.lt.s32.totalorder %v4710_v7, %v6761_v10  ;;  %vm6783_vm15 = vcmp.lt.s32.totalorder %v4737_v50, %v6761_v10  ;;  %vm3428_vm11 = vcmp.lt.s32.totalorder %v4683_v62, %v6011_v45  ;;  %2390 = vadd.xlane.f32.xlu0 %v5915_v22 }
 0x30b   :  { %v3082_v4 = vsel %vm6782_vm5, %v5456_v14, 0.0  ;;  %v3083_v58 = vsel %vm6783_vm15, %v5303_v26, 0.0  ;;  %vm3429_vm13 = vcmp.lt.s32.totalorder %v4710_v7, %v6011_v45  ;;  %v2334_v8 = vsel %vm2286_vm14, %v6768_v57, 0.0 }
 0x30c   :  { %v3140_v11 = vadd.f32 %v3082_v4, %v3081_v48  ;;  %v2335_v35 = vsel %vm2287_vm9, %v6771_v41, 0.0  ;;  %v2336_v10 = vsel %vm2288_vm6, %v5470_v42, 0.0  ;;  %v3523_v47 = vadd.f32 %v3522_v60, %v3466_v53 }
 0x30d   :  { %v2396_v15 = vadd.f32 %v2335_v35, %v2334_v8  ;;  %v3090_v46 = vsel %vm3042_vm1, %v6768_v57, 0.0  ;;  %v3091_v18 = vsel %vm3043_vm3, %v6771_v41, 0.0  ;;  %vm6784_vm9 = vcmp.lt.s32.totalorder %v4737_v50, %v6765_v24  ;;  %v6792_v8 = vld [vmem:[#allocation53_spill] sm:$0xff]  ;;  %2752 = vadd.xlane.f32.xlu1 %v5929_v9 }
 0x30e   :  { %v3141_v16 = vadd.f32 %v3140_v11, %v3083_v58  ;;  %v3092_v36 = vsel %vm6784_vm9, %v5470_v42, 0.0  ;;  %v3152_v30 = vadd.f32 %v3091_v18, %v3090_v46  ;;  %vm6785_vm6 = vcmp.lt.s32.totalorder %v4683_v62, %v6766_v27  ;;  %3532 = vadd.xlane.f32.xlu0 %v5944_v2 }
 0x30f   :  { %v2695_v39 = vsel %vm6785_vm6, %v5419_v33, 0.0  ;;  %v2397_v34 = vadd.f32 %v2396_v15, %v2336_v10  ;;  %vm6786_vm14 = vcmp.lt.s32.totalorder %v4710_v7, %v6766_v27  ;;  %vm6787_vm1 = vcmp.lt.s32.totalorder %v4737_v50, %v6766_v27 }
 0x310   :  { %v2696_v56 = vsel %vm6786_vm14, %v5456_v14, 0.0  ;;  %v2697_v24 = vsel %vm6787_vm1, %v5303_v26, 0.0  ;;  %vm6788_vm3 = vcmp.lt.s32.totalorder %v4683_v62, %v6770_v38  ;;  %v3153_v53 = vadd.f32 %v3152_v30, %v3092_v36  ;;  %v2407_v62 = vld [vmem:[#allocation2 + $0x18] sm:$0xff] }
 0x311   :  { %v3093_v19 = vsel %vm6788_vm3, %v6751_v31, 0.0  ;;  %v2754_v48 = vadd.f32 %v2696_v56, %v2695_v39  ;;  %v3094_v43 = vsel %vm3046_vm7, %v6753_v61, 0.0  ;;  %vm6789_vm5 = vcmp.lt.s32.totalorder %v4737_v50, %v6770_v38  ;;  %3138 = vadd.xlane.f32.xlu1 %v5964_v55  ;;  %v2794_v55 = vld [vmem:[#allocation2 + $0x1a0] sm:$0xff] }
 0x312   :  { %v3095_v60 = vsel %vm6789_vm5, %v5431_v40, 0.0  ;;  %v3156_v27 = vadd.f32 %v3094_v43, %v3093_v19  ;;  %v3467_v31 = vsel %vm3419_vm2, %v5419_v33, 0.0  ;;  %v3468_v4 = vsel %vm3420_vm10, %v5456_v14, 0.0  ;;  %2382 = vadd.xlane.f32.xlu0 %v6001_v63  ;;  %v3180_v19 = vld [vmem:[#allocation2 + $0x320] sm:$0xff] }
 0x313   :  { %v3469_v58 = vsel %vm3421_vm4, %v5303_v26, 0.0  ;;  %v2755_v38 = vadd.f32 %v2754_v48, %v2697_v24  ;;  %v3526_v11 = vadd.f32 %v3468_v4, %v3467_v31  ;;  %vm6790_vm7 = vcmp.lt.s32.totalorder %v4710_v7, %v6774_v51  ;;  %v2408_v7 = vld [vmem:[#allocation2 + $0x20] sm:$0xff]  ;;  %v3179_v24 = vld [vmem:[#allocation2 + $0x318] sm:$0xff]  ;;  %v3177_v4 = vld [vmem:[#allocation2 + $0x308] sm:$0xff] }
 0x314   :  { %v3480_v32 = vsel %vm6790_vm7, %v6753_v61, 0.0  ;;  %vm6791_vm2 = vcmp.lt.s32.totalorder %v4737_v50, %v6774_v51  ;;  %v3157_v14 = vadd.f32 %v3156_v27, %v3095_v60  ;;  %v3473_v26 = vsel %vm3425_vm12, %v6736_v6, 0.0  ;;  %v3176_v31 = vld [vmem:[#allocation2 + $0x300] sm:$0xff] }
 0x315   :  { %v3481_v33 = vsel %vm6791_vm2, %v5431_v40, 0.0  ;;  %v3542_v35 = vadd.f32 %v3480_v32, %v6792_v8  ;;  %v3474_v61 = vsel %vm3426_vm8, %v6724_v44, 0.0  ;;  %vm3430_vm4 = vcmp.lt.s32.totalorder %v4737_v50, %v6011_v45  ;;  %2768 = vadd.xlane.f32.xlu1 %v6014_v3  ;;  %v2790_v45 = vld [vmem:[#allocation2 + $0x180] sm:$0xff]  ;;  %v2791_v3 = vld [vmem:[#allocation2 + $0x188] sm:$0xff] }
 0x316   :  { %v3527_v51 = vadd.f32 %v3526_v11, %v3469_v58  ;;  %v3475_v40 = vsel %vm3427_vm0, %v5373_v17, 0.0  ;;  %v3534_v52 = vadd.f32 %v3474_v61, %v3473_v26  ;;  %v3476_v6 = vsel %vm3428_vm11, %v6768_v57, 0.0  ;;  %2772 = vadd.xlane.f32.xlu0 %v6028_v21  ;;  %v2409_v17 = vld [vmem:[#allocation2 + $0x28] sm:$0xff]  ;;  %v2793_v57 = vld [vmem:[#allocation2 + $0x198] sm:$0xff]  ;;  %v3178_v58 = vld [vmem:[#allocation2 + $0x310] sm:$0xff] }
 0x317   :  { %v3543_v28 = vadd.f32 %v3542_v35, %v3481_v33  ;;  %v3477_v44 = vsel %vm3429_vm13, %v6771_v41, 0.0  ;;  %v3478_v10 = vsel %vm3430_vm4, %v5470_v42, 0.0  ;;  %v2795_v41 = vld [vmem:[#allocation2 + $0x1a8] sm:$0xff]  ;;  %v3565_v11 = vld [vmem:[#allocation2 + $0x498] sm:$0xff]  ;;  %v3566_v8 = vld [vmem:[#allocation2 + $0x4a0] sm:$0xff] }
 0x318   :  { %v3535_v15 = vadd.f32 %v3534_v52, %v3475_v40  ;;  %v3538_v46 = vadd.f32 %v3477_v44, %v3476_v6  ;;  %v3567_v35 = vld [vmem:[#allocation2 + $0x4a8] sm:$0xff]  ;;  %v3564_v44 = vld [vmem:[#allocation2 + $0x490] sm:$0xff] }
 0x319   :  { %2386 = vadd.xlane.f32.xlu1 %v6045_v29  ;;  %v3563_v6 = vld [vmem:[#allocation2 + $0x488] sm:$0xff] }
 0x31a   :  { %v3539_v50 = vadd.f32 %v3538_v46, %v3478_v10  ;;  %3524 = vadd.xlane.f32.xlu0 %v3523_v47 }
 0x31d   :  { %3142 = vadd.xlane.f32.xlu1 %v3141_v16 }
 0x31e   :  { %2398 = vadd.xlane.f32.xlu0 %v2397_v34 }
 0x321   :  { %3154 = vadd.xlane.f32.xlu1 %v3153_v53  ;;  %v3181_v53 = vld [vmem:[#allocation2 + $0x328] sm:$0xff] }
 0x322   :  { %2756 = vadd.xlane.f32.xlu0 %v2755_v38 }
 0x325   :  { %3158 = vadd.xlane.f32.xlu1 %v3157_v14 }
 0x326   :  { %3528 = vadd.xlane.f32.xlu0 %v3527_v51 }
 0x329   :  { %3544 = vadd.xlane.f32.xlu1 %v3543_v28  ;;  %v3562_v28 = vld [vmem:[#allocation2 + $0x480] sm:$0xff] }
 0x32a   :  { %3536 = vadd.xlane.f32.xlu0 %v3535_v15 }
 0x32e   :  { %3540 = vadd.xlane.f32.xlu0 %v3539_v50 }
 0x337   :  { %v2347_v42 = vpop.xlane.xlu0 %2346 }
 0x338   :  { %v2455_v13 = vmul.f32 %v2407_v62, %v2347_v42  ;;  %v2456_v54 = vmul.f32 %v2408_v7, %v2347_v42  ;;  %v2457_v0 = vmul.f32 %v2409_v17, %v2347_v42 }
 0x33a   :  { %v2343_v59 = vpop.xlane.xlu1 %2342 }
 0x33b   :  { %v2452_v23 = vmul.f32 %v2404_v25, %v2343_v59  ;;  %v2453_v5 = vmul.f32 %v2405_v1, %v2343_v59  ;;  %v2454_v37 = vmul.f32 %v2406_v12, %v2343_v59  ;;  %v2717_v49 = vpop.xlane.xlu0 %2716 }
 0x33c   :  { %v2775_v63 = vsub.f32 %v2717_v49, %v2347_v42 }
 0x33d   :  { %v6174_v22 = vadd.f32 %v2455_v13, %v2452_v23  ;;  %v6176_v9 = vadd.f32 %v2456_v54, %v2453_v5  ;;  %v6178_v2 = vadd.f32 %v2457_v0, %v2454_v37 }
 0x33e   :  { %v2713_v21 = vpop.xlane.xlu1 %2712  ;;  %v2841_v47 = vmul.f32 %v2793_v57, %v2775_v63  ;;  %v2842_v18 = vmul.f32 %v2794_v55, %v2775_v63  ;;  %v2843_v16 = vmul.f32 %v2795_v41, %v2775_v63  ;;  %v2410_v41 = vld [vmem:[#allocation2 + $0x30] sm:$0xff]  ;;  %v2411_v63 = vld [vmem:[#allocation2 + $0x38] sm:$0xff] }
 0x33f   :  { %v2774_v29 = vsub.f32 %v2713_v21, %v2343_v59  ;;  %v3103_v36 = vpop.xlane.xlu0 %3102 }
 0x340   :  { %v3161_v56 = vsub.f32 %v3103_v36, %v2717_v49 }
 0x341   :  { %v2838_v30 = vmul.f32 %v2790_v45, %v2774_v29  ;;  %v2839_v39 = vmul.f32 %v2791_v3, %v2774_v29  ;;  %v2840_v34 = vmul.f32 %v2792_v20, %v2774_v29  ;;  %v2412_v45 = vld [vmem:[#allocation2 + $0x40] sm:$0xff]  ;;  %v2413_v20 = vld [vmem:[#allocation2 + $0x48] sm:$0xff]  ;;  %v2415_v29 = vld [vmem:[#allocation2 + $0x58] sm:$0xff] }
 0x342   :  { %v3099_v48 = vpop.xlane.xlu1 %3098  ;;  %v3227_v33 = vmul.f32 %v3179_v24, %v3161_v56  ;;  %v3228_v14 = vmul.f32 %v3180_v19, %v3161_v56  ;;  %v3229_v61 = vmul.f32 %v3181_v53, %v3161_v56  ;;  %v2796_v24 = vld [vmem:[#allocation2 + $0x1b0] sm:$0xff]  ;;  %v2797_v19 = vld [vmem:[#allocation2 + $0x1b8] sm:$0xff]  ;;  %v2798_v53 = vld [vmem:[#allocation2 + $0x1c0] sm:$0xff] }
 0x343   :  { %v6180_v43 = vadd.f32 %v2841_v47, %v2838_v30  ;;  %v6182_v60 = vadd.f32 %v2842_v18, %v2839_v39  ;;  %v6184_v27 = vadd.f32 %v2843_v16, %v2840_v34  ;;  %v3160_v38 = vsub.f32 %v3099_v48, %v2713_v21  ;;  %v3489_v32 = vpop.xlane.xlu0 %3488  ;;  %v2414_v21 = vld [vmem:[#allocation2 + $0x50] sm:$0xff] }
 0x344   :  { %v3547_v26 = vsub.f32 %v3489_v32, %v3103_v36 }
 0x345   :  { %v3224_v51 = vmul.f32 %v3176_v31, %v3160_v38  ;;  %v3225_v40 = vmul.f32 %v3177_v4, %v3160_v38  ;;  %v3226_v52 = vmul.f32 %v3178_v58, %v3160_v38  ;;  %v2799_v31 = vld [vmem:[#allocation2 + $0x1c8] sm:$0xff]  ;;  %v2800_v4 = vld [vmem:[#allocation2 + $0x1d0] sm:$0xff]  ;;  %v2801_v58 = vld [vmem:[#allocation2 + $0x1d8] sm:$0xff] }
 0x346   :  { %v3485_v10 = vpop.xlane.xlu1 %3484  ;;  %v3613_v15 = vmul.f32 %v3565_v11, %v3547_v26  ;;  %v3614_v17 = vmul.f32 %v3566_v8, %v3547_v26  ;;  %v3615_v25 = vmul.f32 %v3567_v35, %v3547_v26 }
 0x347   :  { %v3546_v46 = vsub.f32 %v3485_v10, %v3099_v48  ;;  %v6186_v50 = vadd.f32 %v3227_v33, %v3224_v51  ;;  %v6188_v62 = vadd.f32 %v3228_v14, %v3225_v40  ;;  %v6190_v7 = vadd.f32 %v3229_v61, %v3226_v52  ;;  %v2725_v42 = vpop.xlane.xlu0 %2724  ;;  %v3182_v52 = vld [vmem:[#allocation2 + $0x330] sm:$0xff] }
 0x349   :  { %v3610_v1 = vmul.f32 %v3562_v28, %v3546_v46  ;;  %v3611_v12 = vmul.f32 %v3563_v6, %v3546_v46  ;;  %v3612_v13 = vmul.f32 %v3564_v44, %v3546_v46  ;;  %v3185_v6 = vld [vmem:[#allocation2 + $0x348] sm:$0xff]  ;;  %v3184_v46 = vld [vmem:[#allocation2 + $0x340] sm:$0xff] }
 0x34a   :  { %v2355_v54 = vpop.xlane.xlu1 %2354 }
 0x34b   :  { %v6192_v59 = vadd.f32 %v3613_v15, %v3610_v1  ;;  %v6194_v0 = vadd.f32 %v3614_v17, %v3611_v12  ;;  %v6196_v23 = vadd.f32 %v3615_v25, %v3612_v13  ;;  %v2777_v5 = vsub.f32 %v2725_v42, %v2355_v54  ;;  %v3497_v37 = vpop.xlane.xlu0 %3496  ;;  %v3183_v15 = vld [vmem:[#allocation2 + $0x338] sm:$0xff]  ;;  %v3571_v12 = vld [vmem:[#allocation2 + $0x4c8] sm:$0xff]  ;;  %v3572_v13 = vld [vmem:[#allocation2 + $0x4d0] sm:$0xff] }
 0x34c   :  { %v2461_v30 = vmul.f32 %v2413_v20, %v2355_v54  ;;  %v2462_v39 = vmul.f32 %v2414_v21, %v2355_v54  ;;  %v2463_v38 = vmul.f32 %v2415_v29, %v2355_v54  ;;  %v3187_v25 = vld [vmem:[#allocation2 + $0x358] sm:$0xff] }
 0x34d   :  { %v2847_v61 = vmul.f32 %v2799_v31, %v2777_v5  ;;  %v2848_v51 = vmul.f32 %v2800_v4, %v2777_v5  ;;  %v2849_v40 = vmul.f32 %v2801_v58, %v2777_v5  ;;  %v3573_v20 = vld [vmem:[#allocation2 + $0x4d8] sm:$0xff]  ;;  %v3189_v31 = vld [vmem:[#allocation2 + $0x368] sm:$0xff]  ;;  %v3190_v4 = vld [vmem:[#allocation2 + $0x370] sm:$0xff] }
 0x34e   :  { %v3111_v49 = vpop.xlane.xlu1 %3110 }
 0x34f   :  { %v6198_v57 = vsub.f32 %v3111_v49, %v2725_v42  ;;  %v6200_v55 = vsub.f32 %v3497_v37, %v3111_v49  ;;  %v2351_v3 = vpop.xlane.xlu0 %2350  ;;  %v3186_v42 = vld [vmem:[#allocation2 + $0x350] sm:$0xff] }
 0x350   :  { %v2458_v47 = vmul.f32 %v2410_v41, %v2351_v3  ;;  %v2459_v18 = vmul.f32 %v2411_v63, %v2351_v3  ;;  %v2460_v36 = vmul.f32 %v2412_v45, %v2351_v3  ;;  %v3568_v41 = vld [vmem:[#allocation2 + $0x4b0] sm:$0xff]  ;;  %v3569_v63 = vld [vmem:[#allocation2 + $0x4b8] sm:$0xff]  ;;  %v3570_v45 = vld [vmem:[#allocation2 + $0x4c0] sm:$0xff] }
 0x351   :  { %v3234_v21 = vmul.f32 %v3186_v42, %v6198_v57  ;;  %v3235_v29 = vmul.f32 %v3187_v25, %v6198_v57 }
 0x352   :  { %v6202_v16 = vpop.xlane.xlu1 %2362  ;;  %v2501_v34 = vadd.f32 %v6174_v22, %v2458_v47  ;;  %v2522_v56 = vadd.f32 %v6176_v9, %v2459_v18  ;;  %v2543_v11 = vadd.f32 %v6178_v2, %v2460_v36  ;;  %v3619_v36 = vmul.f32 %v3571_v12, %v6200_v55 }
 0x353   :  { %v2721_v48 = vpop.xlane.xlu0 %2720 }
 0x354   :  { %v2776_v32 = vsub.f32 %v2721_v48, %v2351_v3  ;;  %v6209_v14 = vadd.f32 %v2501_v34, %v2461_v30  ;;  %v6211_v8 = vadd.f32 %v2522_v56, %v2462_v39  ;;  %v6213_v26 = vadd.f32 %v2543_v11, %v2463_v38  ;;  %v3188_v56 = vld [vmem:[#allocation2 + $0x360] sm:$0xff] }
 0x355   :  { %v3620_v30 = vmul.f32 %v3572_v13, %v6200_v55  ;;  %v2416_v13 = vld [vmem:[#allocation2 + $0x60] sm:$0xff] }
 0x356   :  { %v6207_v33 = vpop.xlane.xlu1 %3118  ;;  %v2844_v22 = vmul.f32 %v2796_v24, %v2776_v32  ;;  %v2845_v35 = vmul.f32 %v2797_v19, %v2776_v32  ;;  %v2846_v9 = vmul.f32 %v2798_v53, %v2776_v32 }
 0x357   :  { %v3107_v28 = vpop.xlane.xlu0 %3106 }
 0x358   :  { %v2887_v2 = vadd.f32 %v6180_v43, %v2844_v22  ;;  %v2908_v44 = vadd.f32 %v6182_v60, %v2845_v35  ;;  %v2929_v10 = vadd.f32 %v6184_v27, %v2846_v9  ;;  %v3162_v17 = vsub.f32 %v3107_v28, %v2721_v48 }
 0x359   :  { %v3233_v60 = vmul.f32 %v3185_v6, %v6198_v57  ;;  %v3621_v57 = vmul.f32 %v3573_v20, %v6200_v55  ;;  %v2802_v20 = vld [vmem:[#allocation2 + $0x1e0] sm:$0xff] }
 0x35a   :  { %v6218_v1 = vpop.xlane.xlu1 %2728  ;;  %v6220_v54 = vadd.f32 %v2887_v2, %v2847_v61  ;;  %v6222_v5 = vadd.f32 %v2908_v44, %v2848_v51  ;;  %v6224_v37 = vadd.f32 %v2929_v10, %v2849_v40  ;;  %v3230_v43 = vmul.f32 %v3182_v52, %v3162_v17  ;;  %v3191_v51 = vld [vmem:[#allocation2 + $0x378] sm:$0xff]  ;;  %v3192_v40 = vld [vmem:[#allocation2 + $0x380] sm:$0xff]  ;;  %v3193_v52 = vld [vmem:[#allocation2 + $0x388] sm:$0xff] }
 0x35b   :  { %v3231_v49 = vmul.f32 %v3183_v15, %v3162_v17  ;;  %v3232_v27 = vmul.f32 %v3184_v46, %v3162_v17  ;;  %v3493_v3 = vpop.xlane.xlu0 %3492 }
 0x35c   :  { %v3273_v47 = vadd.f32 %v6186_v50, %v3230_v43  ;;  %v3548_v18 = vsub.f32 %v3493_v3, %v3107_v28  ;;  %v2420_v3 = vld [vmem:[#allocation2 + $0x80] sm:$0xff] }
 0x35d   :  { %v3294_v39 = vadd.f32 %v6188_v62, %v3231_v49  ;;  %v3315_v34 = vadd.f32 %v6190_v7, %v3232_v27  ;;  %v2417_v27 = vld [vmem:[#allocation2 + $0x68] sm:$0xff] }
 0x35e   :  { %v6234_v24 = vpop.xlane.xlu1 %3114  ;;  %v3616_v19 = vmul.f32 %v3568_v41, %v3548_v18  ;;  %v3617_v53 = vmul.f32 %v3569_v63, %v3548_v18  ;;  %v3618_v48 = vmul.f32 %v3570_v45, %v3548_v18  ;;  %v3274_v58 = vadd.f32 %v3273_v47, %v3233_v60  ;;  %v2418_v41 = vld [vmem:[#allocation2 + $0x70] sm:$0xff]  ;;  %v2419_v63 = vld [vmem:[#allocation2 + $0x78] sm:$0xff]  ;;  %v2421_v47 = vld [vmem:[#allocation2 + $0x88] sm:$0xff] }
 0x35f   :  { %v3164_v50 = vsub.f32 %v6234_v24, %v6218_v1  ;;  %v3295_v38 = vadd.f32 %v3294_v39, %v3234_v21  ;;  %v3316_v11 = vadd.f32 %v3315_v34, %v3235_v29  ;;  %v2733_v32 = vpop.xlane.xlu0 %2732  ;;  %v2803_v21 = vld [vmem:[#allocation2 + $0x1e8] sm:$0xff]  ;;  %v2805_v18 = vld [vmem:[#allocation2 + $0x1f8] sm:$0xff] }
 0x360   :  { %v3659_v62 = vadd.f32 %v6192_v59, %v3616_v19  ;;  %v3680_v7 = vadd.f32 %v6194_v0, %v3617_v53  ;;  %v3701_v22 = vadd.f32 %v6196_v23, %v3618_v48  ;;  %v6243_v28 = vsub.f32 %v2733_v32, %v6202_v16  ;;  %v2806_v53 = vld [vmem:[#allocation2 + $0x200] sm:$0xff] }
 0x361   :  { %v3236_v35 = vmul.f32 %v3188_v56, %v3164_v50  ;;  %v3237_v9 = vmul.f32 %v3189_v31, %v3164_v50  ;;  %v3238_v61 = vmul.f32 %v3190_v4, %v3164_v50  ;;  %v3165_v55 = vsub.f32 %v6207_v33, %v2733_v32  ;;  %v3574_v32 = vld [vmem:[#allocation2 + $0x4e0] sm:$0xff] }
 0x362   :  { %v6246_v6 = vpop.xlane.xlu1 %2736  ;;  %v6248_v44 = vadd.f32 %v3659_v62, %v3619_v36  ;;  %v6250_v59 = vadd.f32 %v3680_v7, %v3620_v30  ;;  %v6252_v0 = vadd.f32 %v3701_v22, %v3621_v57  ;;  %v2467_v56 = vmul.f32 %v2419_v63, %v6202_v16  ;;  %v3575_v62 = vld [vmem:[#allocation2 + $0x4e8] sm:$0xff]  ;;  %v3576_v7 = vld [vmem:[#allocation2 + $0x4f0] sm:$0xff]  ;;  %v3577_v22 = vld [vmem:[#allocation2 + $0x4f8] sm:$0xff] }
 0x363   :  { %v3275_v2 = vadd.f32 %v3274_v58, %v3236_v35  ;;  %v3296_v23 = vadd.f32 %v3295_v38, %v3237_v9  ;;  %v3317_v10 = vadd.f32 %v3316_v11, %v3238_v61  ;;  %v3505_v15 = vpop.xlane.xlu0 %3504  ;;  %v3239_v46 = vmul.f32 %v3191_v51, %v3165_v55 }
 0x364   :  { %v3240_v17 = vmul.f32 %v3192_v40, %v3165_v55  ;;  %v3241_v42 = vmul.f32 %v3193_v52, %v3165_v55  ;;  %v3551_v25 = vsub.f32 %v3505_v15, %v6207_v33  ;;  %v2804_v33 = vld [vmem:[#allocation2 + $0x1f0] sm:$0xff]  ;;  %v2468_v58 = vmul.f32 %v2420_v3, %v6202_v16  ;;  %v2807_v52 = vld [vmem:[#allocation2 + $0x208] sm:$0xff] }
 0x365   :  { %v6257_v43 = vadd.f32 %v3275_v2, %v3239_v46  ;;  %v2469_v38 = vmul.f32 %v2421_v47, %v6202_v16  ;;  %v2854_v51 = vmul.f32 %v2806_v53, %v6243_v28  ;;  %v3579_v55 = vld [vmem:[#allocation2 + $0x508] sm:$0xff]  ;;  %v2855_v63 = vmul.f32 %v2807_v52, %v6243_v28  ;;  %v3196_v53 = vld [vmem:[#allocation2 + $0x3a0] sm:$0xff] }
 0x366   :  { %v6255_v12 = vpop.xlane.xlu1 %3122  ;;  %v6259_v60 = vadd.f32 %v3296_v23, %v3240_v17  ;;  %v6261_v49 = vadd.f32 %v3317_v10, %v3241_v42 }
 0x367   :  { %v2359_v45 = vpop.xlane.xlu0 %2358 }
 0x368   :  { %v2464_v29 = vmul.f32 %v2416_v13, %v2359_v45  ;;  %v2465_v36 = vmul.f32 %v2417_v27, %v2359_v45  ;;  %v2466_v30 = vmul.f32 %v2418_v41, %v2359_v45  ;;  %v2778_v39 = vsub.f32 %v6218_v1, %v2359_v45 }
 0x369   :  { %v2853_v1 = vmul.f32 %v2805_v18, %v6243_v28  ;;  %v3627_v45 = vmul.f32 %v3579_v55, %v3551_v25  ;;  %v3194_v18 = vld [vmem:[#allocation2 + $0x390] sm:$0xff] }
 0x36a   :  { %v6264_v34 = vpop.xlane.xlu1 %2370  ;;  %v2503_v19 = vadd.f32 %v6209_v14, %v2464_v29  ;;  %v2524_v48 = vadd.f32 %v6211_v8, %v2465_v36  ;;  %v2545_v31 = vadd.f32 %v6213_v26, %v2466_v30  ;;  %v2850_v4 = vmul.f32 %v2802_v20, %v2778_v39  ;;  %v3578_v14 = vld [vmem:[#allocation2 + $0x500] sm:$0xff]  ;;  %v2422_v28 = vld [vmem:[#allocation2 + $0x90] sm:$0xff]  ;;  %v3195_v30 = vld [vmem:[#allocation2 + $0x398] sm:$0xff] }
 0x36b   :  { %v2851_v50 = vmul.f32 %v2803_v21, %v2778_v39  ;;  %v3501_v57 = vpop.xlane.xlu0 %3500  ;;  %v2852_v11 = vmul.f32 %v2804_v33, %v2778_v39  ;;  %v3626_v17 = vmul.f32 %v3578_v14, %v3551_v25  ;;  %v2424_v33 = vld [vmem:[#allocation2 + $0xa0] sm:$0xff]  ;;  %v2426_v14 = vld [vmem:[#allocation2 + $0xb0] sm:$0xff] }
 0x36c   :  { %v2889_v35 = vadd.f32 %v6220_v54, %v2850_v4  ;;  %v3550_v26 = vsub.f32 %v3501_v57, %v6234_v24  ;;  %v2504_v61 = vadd.f32 %v2503_v19, %v2467_v56  ;;  %v2525_v16 = vadd.f32 %v2524_v48, %v2468_v58  ;;  %v2425_v48 = vld [vmem:[#allocation2 + $0xa8] sm:$0xff]  ;;  %v2809_v58 = vld [vmem:[#allocation2 + $0x218] sm:$0xff] }
 0x36d   :  { %v2910_v8 = vadd.f32 %v6222_v5, %v2851_v50  ;;  %v2546_v40 = vadd.f32 %v2545_v31, %v2469_v38  ;;  %v3625_v54 = vmul.f32 %v3577_v22, %v3551_v25  ;;  %v2931_v5 = vadd.f32 %v6224_v37, %v2852_v11  ;;  %v2423_v25 = vld [vmem:[#allocation2 + $0x98] sm:$0xff]  ;;  %v2808_v31 = vld [vmem:[#allocation2 + $0x210] sm:$0xff] }
 0x36e   :  { %v6276_v9 = vpop.xlane.xlu1 %3126  ;;  %v3622_v2 = vmul.f32 %v3574_v32, %v3550_v26  ;;  %v3623_v23 = vmul.f32 %v3575_v62, %v3550_v26  ;;  %v3624_v10 = vmul.f32 %v3576_v7, %v3550_v26  ;;  %v6279_v46 = vadd.f32 %v2889_v35, %v2853_v1  ;;  %v2810_v32 = vld [vmem:[#allocation2 + $0x220] sm:$0xff]  ;;  %v3580_v62 = vld [vmem:[#allocation2 + $0x510] sm:$0xff]  ;;  %v3581_v7 = vld [vmem:[#allocation2 + $0x518] sm:$0xff] }
 0x36f   :  { %v2367_v15 = vpop.xlane.xlu0 %2366  ;;  %v6287_v41 = vadd.f32 %v2910_v8, %v2854_v51  ;;  %v6296_v37 = vadd.f32 %v2931_v5, %v2855_v63  ;;  %v2427_v35 = vld [vmem:[#allocation2 + $0xb8] sm:$0xff]  ;;  %v2473_v8 = vmul.f32 %v2425_v48, %v6264_v34  ;;  %v3582_v51 = vld [vmem:[#allocation2 + $0x520] sm:$0xff] }
 0x370   :  { %v3661_v24 = vadd.f32 %v6248_v44, %v3622_v2  ;;  %v3682_v42 = vadd.f32 %v6250_v59, %v3623_v23  ;;  %v3703_v13 = vadd.f32 %v6252_v0, %v3624_v10  ;;  %v3166_v0 = vsub.f32 %v6255_v12, %v6246_v6 }
 0x371   :  { %v2780_v56 = vsub.f32 %v6246_v6, %v2367_v15  ;;  %v2470_v4 = vmul.f32 %v2422_v28, %v2367_v15  ;;  %v2471_v50 = vmul.f32 %v2423_v25, %v2367_v15  ;;  %v2472_v57 = vmul.f32 %v2424_v33, %v2367_v15 }
 0x372   :  { %v6285_v27 = vpop.xlane.xlu1 %2744  ;;  %v6290_v3 = vadd.f32 %v3661_v24, %v3625_v54  ;;  %v6292_v20 = vadd.f32 %v3682_v42, %v3626_v17  ;;  %v6294_v29 = vadd.f32 %v3703_v13, %v3627_v45  ;;  %v3242_v39 = vmul.f32 %v3194_v18, %v3166_v0  ;;  %v3200_v13 = vld [vmem:[#allocation2 + $0x3c0] sm:$0xff]  ;;  %v3201_v45 = vld [vmem:[#allocation2 + $0x3c8] sm:$0xff] }
 0x373   :  { %v3509_v21 = vpop.xlane.xlu0 %3508  ;;  %v3243_v11 = vmul.f32 %v3195_v30, %v3166_v0  ;;  %v3244_v22 = vmul.f32 %v3196_v53, %v3166_v0  ;;  %v2856_v26 = vmul.f32 %v2808_v31, %v2780_v56  ;;  %v2505_v55 = vadd.f32 %v2504_v61, %v2470_v4  ;;  %v2811_v61 = vld [vmem:[#allocation2 + $0x228] sm:$0xff]  ;;  %v2812_v0 = vld [vmem:[#allocation2 + $0x230] sm:$0xff] }
 0x374   :  { %v3552_v38 = vsub.f32 %v3509_v21, %v6255_v12  ;;  %v6313_v6 = vadd.f32 %v6257_v43, %v3242_v39  ;;  %v2526_v12 = vadd.f32 %v2525_v16, %v2471_v50  ;;  %v2547_v2 = vadd.f32 %v2546_v40, %v2472_v57  ;;  %v3202_v21 = vld [vmem:[#allocation2 + $0x3d0] sm:$0xff]  ;;  %v3197_v30 = vld [vmem:[#allocation2 + $0x3a8] sm:$0xff]  ;;  %v2432_v50 = vld [vmem:[#allocation2 + $0xe0] sm:$0xff] }
 0x375   :  { %v2857_v23 = vmul.f32 %v2809_v58, %v2780_v56  ;;  %v2858_v10 = vmul.f32 %v2810_v32, %v2780_v56  ;;  %v2474_v43 = vmul.f32 %v2426_v14, %v6264_v34  ;;  %v2475_v24 = vmul.f32 %v2427_v35, %v6264_v34  ;;  %v3198_v39 = vld [vmem:[#allocation2 + $0x3b0] sm:$0xff]  ;;  %v3583_v14 = vld [vmem:[#allocation2 + $0x528] sm:$0xff] }
 0x376   :  { %v6298_v44 = vpop.xlane.xlu1 %3130  ;;  %v3628_v15 = vmul.f32 %v3580_v62, %v3552_v38  ;;  %v3629_v54 = vmul.f32 %v3581_v7, %v3552_v38  ;;  %v3630_v42 = vmul.f32 %v3582_v51, %v3552_v38  ;;  %v3298_v16 = vadd.f32 %v6259_v60, %v3243_v11  ;;  %v2433_v11 = vld [vmem:[#allocation2 + $0xe8] sm:$0xff]  ;;  %v2428_v62 = vld [vmem:[#allocation2 + $0xc0] sm:$0xff]  ;;  %v3584_v35 = vld [vmem:[#allocation2 + $0x530] sm:$0xff] }
 0x377   :  { %v2741_v59 = vpop.xlane.xlu0 %2740  ;;  %v3168_v63 = vsub.f32 %v6298_v44, %v6285_v27  ;;  %v3319_v40 = vadd.f32 %v6261_v49, %v3244_v22  ;;  %v2891_v18 = vadd.f32 %v6279_v46, %v2856_v26  ;;  %v2912_v33 = vadd.f32 %v6287_v41, %v2857_v23  ;;  %v3199_v46 = vld [vmem:[#allocation2 + $0x3b8] sm:$0xff]  ;;  %v2444_v23 = vld [vmem:[#allocation2 + $0x140] sm:$0xff] }
 0x378   :  { %v2781_v17 = vsub.f32 %v2741_v59, %v6264_v34  ;;  %v3167_v28 = vsub.f32 %v6276_v9, %v2741_v59  ;;  %v2813_v34 = vld [vmem:[#allocation2 + $0x238] sm:$0xff]  ;;  %v2506_v56 = vadd.f32 %v2505_v55, %v2473_v8  ;;  %v2527_v53 = vadd.f32 %v2526_v12, %v2474_v43 }
 0x379   :  { %v6332_v48 = vadd.f32 %v2547_v2, %v2475_v24  ;;  %v3663_v60 = vadd.f32 %v6290_v3, %v3628_v15  ;;  %v3684_v49 = vadd.f32 %v6292_v20, %v3629_v54  ;;  %v2933_v31 = vadd.f32 %v6296_v37, %v2858_v10  ;;  %v2431_v59 = vld [vmem:[#allocation2 + $0xd8] sm:$0xff]  ;;  %v2429_v3 = vld [vmem:[#allocation2 + $0xc8] sm:$0xff]  ;;  %v2430_v10 = vld [vmem:[#allocation2 + $0xd0] sm:$0xff] }
 0x37a   :  { %v6302_v47 = vpop.xlane.xlu1 %2378  ;;  %v2859_v4 = vmul.f32 %v2811_v61, %v2781_v17  ;;  %v3705_v41 = vadd.f32 %v6294_v29, %v3630_v42  ;;  %v3248_v58 = vmul.f32 %v3200_v13, %v3168_v63  ;;  %v2860_v38 = vmul.f32 %v2812_v0, %v2781_v17  ;;  %v3585_v12 = vld [vmem:[#allocation2 + $0x538] sm:$0xff]  ;;  %v2445_v13 = vld [vmem:[#allocation2 + $0x148] sm:$0xff] }
 0x37b   :  { %v6304_v36 = vpop.xlane.xlu0 %3512  ;;  %v3249_v7 = vmul.f32 %v3201_v45, %v3168_v63  ;;  %v2861_v20 = vmul.f32 %v2813_v34, %v2781_v17  ;;  %v3245_v22 = vmul.f32 %v3197_v30, %v3167_v28  ;;  %v3246_v37 = vmul.f32 %v3198_v39, %v3167_v28 }
 0x37c   :  { %v3553_v32 = vsub.f32 %v6304_v36, %v6276_v9  ;;  %v3250_v26 = vmul.f32 %v3202_v21, %v3168_v63  ;;  %v3247_v51 = vmul.f32 %v3199_v46, %v3167_v28  ;;  %v2479_v29 = vmul.f32 %v2431_v59, %v6302_v47  ;;  %v2443_v36 = vld [vmem:[#allocation2 + $0x138] sm:$0xff] }
 0x37d   :  { %v2480_v55 = vmul.f32 %v2432_v50, %v6302_v47  ;;  %v2892_v2 = vadd.f32 %v2891_v18, %v2859_v4  ;;  %v6347_v9 = vmul.f32 %v2433_v11, %v6302_v47  ;;  %v2913_v43 = vadd.f32 %v2912_v33, %v2860_v38  ;;  %v2814_v18 = vld [vmem:[#allocation2 + $0x240] sm:$0xff] }
 0x37e   :  { %v6307_v19 = vpop.xlane.xlu1 %2394  ;;  %v3631_v24 = vmul.f32 %v3583_v14, %v3553_v32  ;;  %v3632_v42 = vmul.f32 %v3584_v35, %v3553_v32  ;;  %v2934_v61 = vadd.f32 %v2933_v31, %v2861_v20  ;;  %v3278_v45 = vadd.f32 %v6313_v6, %v3245_v22  ;;  %v2816_v31 = vld [vmem:[#allocation2 + $0x250] sm:$0xff]  ;;  %v3586_v11 = vld [vmem:[#allocation2 + $0x540] sm:$0xff]  ;;  %v2817_v20 = vld [vmem:[#allocation2 + $0x258] sm:$0xff] }
 0x37f   :  { %v6310_v1 = vpop.xlane.xlu0 %2374  ;;  %v3299_v21 = vadd.f32 %v3298_v16, %v3246_v37  ;;  %v3633_v0 = vmul.f32 %v3585_v12, %v3553_v32  ;;  %v3320_v34 = vadd.f32 %v3319_v40, %v3247_v51  ;;  %v6359_v30 = vmul.f32 %v2443_v36, %v6307_v19  ;;  %v3587_v32 = vld [vmem:[#allocation2 + $0x548] sm:$0xff]  ;;  %v2818_v22 = vld [vmem:[#allocation2 + $0x260] sm:$0xff]  ;;  %v3203_v35 = vld [vmem:[#allocation2 + $0x3d8] sm:$0xff] }
 0x380   :  { %v2476_v15 = vmul.f32 %v2428_v62, %v6310_v1  ;;  %v2477_v54 = vmul.f32 %v2429_v3, %v6310_v1  ;;  %v2782_v63 = vsub.f32 %v6285_v27, %v6310_v1  ;;  %v6362_v33 = vmul.f32 %v2444_v23, %v6307_v19  ;;  %v2815_v27 = vld [vmem:[#allocation2 + $0x248] sm:$0xff]  ;;  %v3588_v62 = vld [vmem:[#allocation2 + $0x550] sm:$0xff]  ;;  %v3204_v51 = vld [vmem:[#allocation2 + $0x3e0] sm:$0xff] }
 0x381   :  { %v2478_v39 = vmul.f32 %v2430_v10, %v6310_v1  ;;  %v6366_v46 = vmul.f32 %v2445_v13, %v6307_v19  ;;  %v3664_v40 = vadd.f32 %v3663_v60, %v3631_v24  ;;  %v3685_v50 = vadd.f32 %v3684_v49, %v3632_v42  ;;  %v2819_v37 = vld [vmem:[#allocation2 + $0x268] sm:$0xff] }
 0x382   :  { %v6316_v52 = vpop.xlane.xlu1 %3134  ;;  %v2507_v6 = vadd.f32 %v2506_v56, %v2476_v15  ;;  %v2528_v16 = vadd.f32 %v2527_v53, %v2477_v54  ;;  %v2862_v38 = vmul.f32 %v2814_v18, %v2782_v63  ;;  %v3706_v3 = vadd.f32 %v3705_v41, %v3633_v0  ;;  %v3205_v12 = vld [vmem:[#allocation2 + $0x3e8] sm:$0xff]  ;;  %v2830_v0 = vld [vmem:[#allocation2 + $0x2c0] sm:$0xff] }
 0x383   :  { %v6319_v5 = vpop.xlane.xlu0 %3516  ;;  %v3279_v14 = vadd.f32 %v3278_v45, %v3248_v58  ;;  %v3300_v56 = vadd.f32 %v3299_v21, %v3249_v7  ;;  %v2863_v60 = vmul.f32 %v2815_v27, %v2782_v63  ;;  %v2864_v49 = vmul.f32 %v2816_v31, %v2782_v63  ;;  %v2829_v21 = vld [vmem:[#allocation2 + $0x2b8] sm:$0xff]  ;;  %v2831_v18 = vld [vmem:[#allocation2 + $0x2c8] sm:$0xff]  ;;  %v3216_v27 = vld [vmem:[#allocation2 + $0x440] sm:$0xff] }
 0x384   :  { %v3554_v4 = vsub.f32 %v6319_v5, %v6298_v44  ;;  %v2549_v5 = vadd.f32 %v6332_v48, %v2478_v39  ;;  %v3321_v36 = vadd.f32 %v3320_v34, %v3250_v26  ;;  %v6379_v10 = vadd.f32 %v2507_v6, %v2479_v29  ;;  %v3215_v39 = vld [vmem:[#allocation2 + $0x438] sm:$0xff] }
 0x385   :  { %v6381_v58 = vadd.f32 %v2528_v16, %v2480_v55  ;;  %v2914_v45 = vadd.f32 %v2913_v43, %v2863_v60  ;;  %v2935_v26 = vadd.f32 %v2934_v61, %v2864_v49  ;;  %v3589_v6 = vld [vmem:[#allocation2 + $0x558] sm:$0xff]  ;;  %v2450_v60 = vld [vmem:[#allocation2 + $0x170] sm:$0xff] }
 0x386   :  { %v6329_v25 = vpop.xlane.xlu1 %3150  ;;  %v3635_v41 = vmul.f32 %v3587_v32, %v3554_v4  ;;  %v3636_v7 = vmul.f32 %v3588_v62, %v3554_v4  ;;  %v6391_v43 = vadd.f32 %v2549_v5, %v6347_v9  ;;  %v3212_v9 = vld [vmem:[#allocation2 + $0x420] sm:$0xff]  ;;  %v3213_v62 = vld [vmem:[#allocation2 + $0x428] sm:$0xff] }
 0x387   :  { %6793 = vst [vmem:[#allocation55_spill] sm:$0xff] %v6329_v25  ;;  %v6337_v57 = vpop.xlane.xlu0 %2748  ;;  %v2449_v5 = vld [vmem:[#allocation2 + $0x168] sm:$0xff] }
 0x388   :  { %v2783_v1 = vsub.f32 %v6337_v57, %v6302_v47  ;;  %v3169_v53 = vsub.f32 %v6316_v52, %v6337_v57  ;;  %v3634_v47 = vmul.f32 %v3586_v11, %v3554_v4  ;;  %v2893_v57 = vadd.f32 %v2892_v2, %v2862_v38 }
 0x389   :  { %v3686_v2 = vadd.f32 %v3685_v50, %v3635_v41  ;;  %v3707_v61 = vadd.f32 %v3706_v3, %v3636_v7 }
 0x38a   :  { %v6342_v8 = vpop.xlane.xlu1 %2760  ;;  %v2865_v15 = vmul.f32 %v2817_v20, %v2783_v1  ;;  %v2866_v54 = vmul.f32 %v2818_v22, %v2783_v1  ;;  %v2867_v24 = vmul.f32 %v2819_v37, %v2783_v1  ;;  %v3251_v48 = vmul.f32 %v3203_v35, %v3169_v53  ;;  %v3214_v1 = vld [vmem:[#allocation2 + $0x430] sm:$0xff] }
 0x38b   :  { %v6351_v17 = vpop.xlane.xlu0 %2764  ;;  %v3252_v42 = vmul.f32 %v3204_v51, %v3169_v53  ;;  %v3253_v13 = vmul.f32 %v3205_v12, %v3169_v53  ;;  %v3665_v34 = vadd.f32 %v3664_v40, %v3634_v47  ;;  %v3591_v40 = vld [vmem:[#allocation2 + $0x568] sm:$0xff]  ;;  %v2451_v51 = vld [vmem:[#allocation2 + $0x178] sm:$0xff]  ;;  %v2434_v12 = vld [vmem:[#allocation2 + $0xf0] sm:$0xff] }
 0x38c   :  { %v2787_v29 = vsub.f32 %v6351_v17, %v6307_v19  ;;  %v3173_v31 = vsub.f32 %v6329_v25, %v6351_v17  ;;  %v6393_v4 = vadd.f32 %v2893_v57, %v2865_v15  ;;  %v6395_v38 = vadd.f32 %v2914_v45, %v2866_v54  ;;  %v3217_v19 = vld [vmem:[#allocation2 + $0x448] sm:$0xff]  ;;  %v2440_v54 = vld [vmem:[#allocation2 + $0x120] sm:$0xff]  ;;  %v2442_v45 = vld [vmem:[#allocation2 + $0x130] sm:$0xff] }
 0x38d   :  { %v6399_v50 = vadd.f32 %v2935_v26, %v2867_v24  ;;  %v6401_v11 = vadd.f32 %v3279_v14, %v3251_v48  ;;  %v6403_v17 = vadd.f32 %v3300_v56, %v3252_v42  ;;  %v6405_v32 = vadd.f32 %v3321_v36, %v3253_v13  ;;  %v2435_v36 = vld [vmem:[#allocation2 + $0xf8] sm:$0xff]  ;;  %v2436_v24 = vld [vmem:[#allocation2 + $0x100] sm:$0xff]  ;;  %v2441_v13 = vld [vmem:[#allocation2 + $0x128] sm:$0xff] }
 0x38e   :  { %v6356_v28 = vpop.xlane.xlu1 %3146  ;;  %v6409_v20 = vmul.f32 %v2829_v21, %v2787_v29  ;;  %v6411_v22 = vmul.f32 %v2830_v0, %v2787_v29  ;;  %v6413_v37 = vmul.f32 %v2831_v18, %v2787_v29  ;;  %v6415_v14 = vmul.f32 %v3215_v39, %v3173_v31  ;;  %v2826_v26 = vld [vmem:[#allocation2 + $0x2a0] sm:$0xff]  ;;  %v2827_v39 = vld [vmem:[#allocation2 + $0x2a8] sm:$0xff] }
 0x38f   :  { %v3521_v59 = vpop.xlane.xlu0 %3520  ;;  %v6417_v56 = vmul.f32 %v3216_v27, %v3173_v31  ;;  %v6419_v41 = vmul.f32 %v3217_v19, %v3173_v31  ;;  %v3206_v27 = vld [vmem:[#allocation2 + $0x3f0] sm:$0xff]  ;;  %v3207_v31 = vld [vmem:[#allocation2 + $0x3f8] sm:$0xff] }
 0x390   :  { %v3555_v55 = vsub.f32 %v3521_v59, %v6316_v52  ;;  %v3172_v52 = vsub.f32 %v6356_v28, %v6342_v8  ;;  %v3590_v59 = vld [vmem:[#allocation2 + $0x560] sm:$0xff] }
 0x391   :  { %6794 = vst [vmem:[#allocation15_spill] sm:$0xff] %v6419_v41 }
 0x392   :  { %v6374_v44 = vpop.xlane.xlu1 %2402  ;;  %v3637_v53 = vmul.f32 %v3589_v6, %v3555_v55  ;;  %v3638_v49 = vmul.f32 %v3590_v59, %v3555_v55  ;;  %v3639_v35 = vmul.f32 %v3591_v40, %v3555_v55  ;;  %v6421_v7 = vmul.f32 %v3212_v9, %v3172_v52 }
 0x393   :  { %v6377_v23 = vpop.xlane.xlu0 %2390  ;;  %v6423_v57 = vmul.f32 %v3213_v62, %v3172_v52  ;;  %v6425_v15 = vmul.f32 %v3214_v1, %v3172_v52  ;;  %v6428_v48 = vmul.f32 %v2449_v5, %v6374_v44  ;;  %v6431_v42 = vmul.f32 %v2450_v60, %v6374_v44 }
 0x394   :  { %v2786_v21 = vsub.f32 %v6342_v8, %v6377_v23  ;;  %v6439_v29 = vadd.f32 %v3665_v34, %v3637_v53  ;;  %v6442_v55 = vmul.f32 %v2451_v51, %v6374_v44  ;;  %v6444_v52 = vadd.f32 %v3686_v2, %v3638_v49  ;;  %v3208_v8 = vld [vmem:[#allocation2 + $0x400] sm:$0xff]  ;;  %v2437_v34 = vld [vmem:[#allocation2 + $0x108] sm:$0xff]  ;;  %v2820_v2 = vld [vmem:[#allocation2 + $0x270] sm:$0xff] }
 0x395   :  { %v6446_v59 = vadd.f32 %v3707_v61, %v3639_v35  ;;  %v2488_v1 = vmul.f32 %v2440_v54, %v6377_v23  ;;  %v2489_v53 = vmul.f32 %v2441_v13, %v6377_v23  ;;  %v2490_v5 = vmul.f32 %v2442_v45, %v6377_v23  ;;  %v2438_v49 = vld [vmem:[#allocation2 + $0x110] sm:$0xff]  ;;  %v2439_v61 = vld [vmem:[#allocation2 + $0x118] sm:$0xff] }
 0x396   :  { %v6383_v63 = vpop.xlane.xlu1 %2752  ;;  %v2828_v35 = vld [vmem:[#allocation2 + $0x2b0] sm:$0xff]  ;;  %v6457_v51 = vmul.f32 %v2826_v26, %v2786_v21 }
 0x397   :  { %v3533_v16 = vpop.xlane.xlu0 %3532 }
 0x398   :  { %v6455_v60 = vsub.f32 %v3533_v16, %v6356_v28  ;;  %v2821_v16 = vld [vmem:[#allocation2 + $0x278] sm:$0xff] }
 0x39a   :  { %v6407_v3 = vpop.xlane.xlu1 %3138 }
 0x39b   :  { %v2383_v47 = vpop.xlane.xlu0 %2382  ;;  %v3170_v0 = vsub.f32 %v6407_v3, %v6383_v63 }
 0x39c   :  { %v2482_v6 = vmul.f32 %v2434_v12, %v2383_v47  ;;  %v2483_v19 = vmul.f32 %v2435_v36, %v2383_v47  ;;  %v2484_v40 = vmul.f32 %v2436_v24, %v2383_v47  ;;  %v2784_v9 = vsub.f32 %v6383_v63, %v2383_v47  ;;  %v3598_v63 = vld [vmem:[#allocation2 + $0x5a0] sm:$0xff] }
 0x39d   :  { %v6459_v12 = vmul.f32 %v2827_v39, %v2786_v21  ;;  %v3254_v36 = vmul.f32 %v3206_v27, %v3170_v0  ;;  %v3255_v47 = vmul.f32 %v3207_v31, %v3170_v0  ;;  %v3256_v54 = vmul.f32 %v3208_v8, %v3170_v0  ;;  %v2822_v0 = vld [vmem:[#allocation2 + $0x280] sm:$0xff] }
 0x39e   :  { %v6437_v18 = vpop.xlane.xlu1 %2768  ;;  %v2509_v13 = vadd.f32 %v6379_v10, %v2482_v6  ;;  %v2530_v23 = vadd.f32 %v6381_v58, %v2483_v19  ;;  %v2551_v45 = vadd.f32 %v6391_v43, %v2484_v40  ;;  %v2868_v25 = vmul.f32 %v2820_v2, %v2784_v9  ;;  %v3592_v40 = vld [vmem:[#allocation2 + $0x570] sm:$0xff]  ;;  %v3594_v2 = vld [vmem:[#allocation2 + $0x580] sm:$0xff] }
 0x39f   :  { %v6449_v62 = vpop.xlane.xlu0 %2772  ;;  %v6469_v27 = vmul.f32 %v2828_v35, %v2786_v21  ;;  %v6472_v31 = vmul.f32 %v3598_v63, %v6455_v60  ;;  %v6476_v6 = vadd.f32 %v6401_v11, %v3254_v36  ;;  %v6479_v43 = vadd.f32 %v6403_v17, %v3255_v47  ;;  %v2446_v11 = vld [vmem:[#allocation2 + $0x150] sm:$0xff]  ;;  %v2447_v35 = vld [vmem:[#allocation2 + $0x158] sm:$0xff]  ;;  %v2835_v17 = vld [vmem:[#allocation2 + $0x2e8] sm:$0xff] }
 0x3a0   :  { %v2870_v63 = vmul.f32 %v2822_v0, %v2784_v9 }
 0x3a2   :  { %v6461_v24 = vpop.xlane.xlu1 %2386 }
 0x3a3   :  { %v2485_v28 = vmul.f32 %v2437_v34, %v6461_v24  ;;  %v2486_v26 = vmul.f32 %v2438_v49, %v6461_v24  ;;  %v2487_v39 = vmul.f32 %v2439_v61, %v6461_v24  ;;  %v3525_v41 = vpop.xlane.xlu0 %3524  ;;  %v3593_v34 = vld [vmem:[#allocation2 + $0x578] sm:$0xff]  ;;  %v6484_v49 = vadd.f32 %v6405_v32, %v3256_v54 }
 0x3a4   :  { %v3556_v58 = vsub.f32 %v3525_v41, %v6407_v3  ;;  %v2869_v61 = vmul.f32 %v2821_v16, %v2784_v9  ;;  %v2789_v3 = vsub.f32 %v6449_v62, %v6374_v44 }
 0x3a5   :  { %v2510_v10 = vadd.f32 %v2509_v13, %v2485_v28  ;;  %v2531_v19 = vadd.f32 %v2530_v23, %v2486_v26  ;;  %v2552_v8 = vadd.f32 %v2551_v45, %v2487_v39  ;;  %v2448_v13 = vld [vmem:[#allocation2 + $0x160] sm:$0xff]  ;;  %v2895_v28 = vadd.f32 %v6393_v4, %v2868_v25  ;;  %v2836_v45 = vld [vmem:[#allocation2 + $0x2f0] sm:$0xff]  ;;  %v2837_v26 = vld [vmem:[#allocation2 + $0x2f8] sm:$0xff] }
 0x3a6   :  { %v6481_v21 = vpop.xlane.xlu1 %3142  ;;  %v3640_v39 = vmul.f32 %v3592_v40, %v3556_v58  ;;  %v3641_v32 = vmul.f32 %v3593_v34, %v3556_v58  ;;  %v3642_v54 = vmul.f32 %v3594_v2, %v3556_v58  ;;  %v6492_v0 = vmul.f32 %v2835_v17, %v2789_v3  ;;  %v2833_v2 = vld [vmem:[#allocation2 + $0x2d8] sm:$0xff] }
 0x3a7   :  { %v2511_v41 = vadd.f32 %v2510_v10, %v2488_v1  ;;  %v2532_v36 = vadd.f32 %v2531_v19, %v2489_v53  ;;  %v2553_v47 = vadd.f32 %v2552_v8, %v2490_v5  ;;  %v2399_v23 = vpop.xlane.xlu0 %2398  ;;  %v2916_v25 = vadd.f32 %v6395_v38, %v2869_v61 }
 0x3a8   :  { %v2494_v10 = vmul.f32 %v2446_v11, %v2399_v23  ;;  %v2495_v9 = vmul.f32 %v2447_v35, %v2399_v23  ;;  %v2496_v53 = vmul.f32 %v2448_v13, %v2399_v23  ;;  %v2788_v5 = vsub.f32 %v6437_v18, %v2399_v23  ;;  %v3209_v23 = vld [vmem:[#allocation2 + $0x408] sm:$0xff] }
 0x3a9   :  { %v2512_v16 = vadd.f32 %v2511_v41, %v6359_v30  ;;  %v2533_v44 = vadd.f32 %v2532_v36, %v6362_v33  ;;  %v2554_v1 = vadd.f32 %v2553_v47, %v6366_v46  ;;  %v6498_v4 = vmul.f32 %v2836_v45, %v2789_v3  ;;  %v2832_v30 = vld [vmem:[#allocation2 + $0x2d0] sm:$0xff]  ;;  %v2834_v41 = vld [vmem:[#allocation2 + $0x2e0] sm:$0xff]  ;;  %v2825_v47 = vld [vmem:[#allocation2 + $0x298] sm:$0xff] }
 0x3aa   :  { %v6495_v19 = vpop.xlane.xlu1 %3154  ;;  %v6500_v58 = vmul.f32 %v2837_v26, %v2789_v3  ;;  %v6503_v46 = vadd.f32 %v6439_v29, %v3640_v39  ;;  %v6506_v34 = vadd.f32 %v6444_v52, %v3641_v32  ;;  %v2937_v35 = vadd.f32 %v6399_v50, %v2870_v63  ;;  %v2823_v29 = vld [vmem:[#allocation2 + $0x288] sm:$0xff]  ;;  %v2824_v36 = vld [vmem:[#allocation2 + $0x290] sm:$0xff]  ;;  %v3211_v32 = vld [vmem:[#allocation2 + $0x418] sm:$0xff] }
 0x3ab   :  { %v2513_v8 = vadd.f32 %v2512_v16, %v2494_v10  ;;  %v2534_v33 = vadd.f32 %v2533_v44, %v2495_v9  ;;  %v2757_v40 = vpop.xlane.xlu0 %2756  ;;  %v2555_v11 = vadd.f32 %v2554_v1, %v2496_v53  ;;  %v6510_v38 = vadd.f32 %v6446_v59, %v3642_v54  ;;  %v3210_v45 = vld [vmem:[#allocation2 + $0x410] sm:$0xff] }
 0x3ac   :  { %v3174_v17 = vsub.f32 %v6495_v19, %v6437_v18  ;;  %v2880_v13 = vmul.f32 %v2832_v30, %v2788_v5  ;;  %v2785_v50 = vsub.f32 %v2757_v40, %v6461_v24  ;;  %v3171_v59 = vsub.f32 %v6481_v21, %v2757_v40  ;;  %v3218_v53 = vld [vmem:[#allocation2 + $0x450] sm:$0xff] }
 0x3ad   :  { %v2514_v61 = vadd.f32 %v2513_v8, %v6428_v48  ;;  %v2535_v3 = vadd.f32 %v2534_v33, %v6431_v42  ;;  %v2556_v52 = vadd.f32 %v2555_v11, %v6442_v55  ;;  %v2881_v48 = vmul.f32 %v2833_v2, %v2788_v5 }
 0x3ae   :  { %v2882_v39 = vmul.f32 %v2834_v41, %v2788_v5  ;;  %v2871_v54 = vmul.f32 %v2823_v29, %v2785_v50  ;;  %v2872_v18 = vmul.f32 %v2824_v36, %v2785_v50  ;;  %v2873_v16 = vmul.f32 %v2825_v47, %v2785_v50 }
 0x3af   :  { %v2515_v63 = vrot.slane %v2514_v61, 4  ;;  %v2536_v26 = vrot.slane %v2535_v3, 4  ;;  %v2557_v42 = vrot.slane %v2556_v52, 4  ;;  %v3257_v10 = vmul.f32 %v3209_v23, %v3171_v59  ;;  %v3220_v23 = vld [vmem:[#allocation2 + $0x460] sm:$0xff] }
 0x3b0   :  { %v3258_v55 = vmul.f32 %v3210_v45, %v3171_v59  ;;  %v2896_v30 = vadd.f32 %v2895_v28, %v2871_v54  ;;  %v2917_v8 = vadd.f32 %v2916_v25, %v2872_v18  ;;  %v2938_v24 = vadd.f32 %v2937_v35, %v2873_v16  ;;  %v3222_v54 = vld [vmem:[#allocation2 + $0x470] sm:$0xff] }
 0x3b1   :  { %v2516_v44 = vadd.f32 %v2515_v63, %v2514_v61  ;;  %v2537_v1 = vadd.f32 %v2536_v26, %v2535_v3  ;;  %v2558_v9 = vadd.f32 %v2557_v42, %v2556_v52  ;;  %v3259_v11 = vmul.f32 %v3211_v32, %v3171_v59  ;;  %v6523_v3 = vpop.xlane.xlu1 %3158  ;;  %v3219_v52 = vld [vmem:[#allocation2 + $0x458] sm:$0xff]  ;;  %v3221_v32 = vld [vmem:[#allocation2 + $0x468] sm:$0xff] }
 0x3b2   :  { %v3282_v2 = vadd.f32 %v6476_v6, %v3257_v10  ;;  %v2897_v41 = vadd.f32 %v2896_v30, %v6457_v51  ;;  %v2918_v29 = vadd.f32 %v2917_v8, %v6459_v12  ;;  %v2939_v61 = vadd.f32 %v2938_v24, %v6469_v27 }
 0x3b3   :  { %v2517_v33 = vrot.slane %v2516_v44, 2  ;;  %v2538_v40 = vrot.slane %v2537_v1, 2  ;;  %v2559_v5 = vrot.slane %v2558_v9, 2  ;;  %v3266_v28 = vmul.f32 %v3218_v53, %v3174_v17 }
 0x3b4   :  { %v3303_v25 = vadd.f32 %v6479_v43, %v3258_v55  ;;  %v2898_v45 = vadd.f32 %v2897_v41, %v6409_v20  ;;  %v2919_v6 = vadd.f32 %v2918_v29, %v6411_v22  ;;  %v2940_v51 = vadd.f32 %v2939_v61, %v6413_v37 }
 0x3b5   :  { %v2518_v36 = vadd.f32 %v2517_v33, %v2516_v44  ;;  %v2539_v47 = vadd.f32 %v2538_v40, %v2537_v1  ;;  %v2560_v35 = vadd.f32 %v2559_v5, %v2558_v9  ;;  %v3283_v12 = vadd.f32 %v3282_v2, %v6421_v7  ;;  %v3223_v44 = vld [vmem:[#allocation2 + $0x478] sm:$0xff]  ;;  %v6795_v9 = vld [vmem:[#allocation15_spill] sm:$0xff]  ;;  %v3595_v40 = vld [vmem:[#allocation2 + $0x588] sm:$0xff] }
 0x3b6   :  { %v3304_v27 = vadd.f32 %v3303_v25, %v6423_v57  ;;  %v3324_v50 = vadd.f32 %v6484_v49, %v3259_v11  ;;  %v3175_v59 = vsub.f32 %v6523_v3, %v6449_v62  ;;  %v3267_v63 = vmul.f32 %v3219_v52, %v3174_v17  ;;  %v3529_v62 = vpop.xlane.xlu0 %3528  ;;  %v3596_v11 = vld [vmem:[#allocation2 + $0x590] sm:$0xff]  ;;  %v3597_v25 = vld [vmem:[#allocation2 + $0x598] sm:$0xff] }
 0x3b7   :  { %v2899_v26 = vadd.f32 %v2898_v45, %v2880_v13  ;;  %v2920_v43 = vadd.f32 %v2919_v6, %v2881_v48  ;;  %v2941_v42 = vadd.f32 %v2940_v51, %v2882_v39  ;;  %v2519_v20 = vrot.slane %v2518_v36, 1 }
 0x3b8   :  { %v2540_v18 = vrot.slane %v2539_v47, 1  ;;  %v3268_v22 = vmul.f32 %v3220_v23, %v3174_v17  ;;  %v3325_v37 = vadd.f32 %v3324_v50, %v6425_v15  ;;  %v2561_v16 = vrot.slane %v2560_v35, 1 }
 0x3b9   :  { %v2900_v7 = vadd.f32 %v2899_v26, %v6492_v0  ;;  %v2921_v57 = vadd.f32 %v2920_v43, %v6498_v4  ;;  %v2942_v49 = vadd.f32 %v2941_v42, %v6500_v58  ;;  %v3269_v1 = vmul.f32 %v3221_v32, %v3175_v59  ;;  %v3599_v26 = vld [vmem:[#allocation2 + $0x5a8] sm:$0xff] }
 0x3ba   :  { %v3270_v13 = vmul.f32 %v3222_v54, %v3175_v59  ;;  %v3284_v48 = vadd.f32 %v3283_v12, %v6415_v14  ;;  %v3305_v39 = vadd.f32 %v3304_v27, %v6417_v56  ;;  %v3326_v15 = vadd.f32 %v3325_v37, %v6795_v9  ;;  %v3545_v9 = vpop.xlane.xlu1 %3544 }
 0x3bb   :  { %v2901_v10 = vrot.slane %v2900_v7, 4  ;;  %v2922_v55 = vrot.slane %v2921_v57, 4  ;;  %v2943_v17 = vrot.slane %v2942_v49, 4  ;;  %v3271_v53 = vmul.f32 %v3223_v44, %v3175_v59 }
 0x3bc   :  { %v3285_v30 = vadd.f32 %v3284_v48, %v3266_v28  ;;  %v3306_v0 = vadd.f32 %v3305_v39, %v3267_v63  ;;  %v3557_v4 = vsub.f32 %v3529_v62, %v6481_v21  ;;  %v3327_v33 = vadd.f32 %v3326_v15, %v3268_v22  ;;  %v3537_v21 = vpop.xlane.xlu0 %3536 }
 0x3bd   :  { %v2902_v8 = vadd.f32 %v2901_v10, %v2900_v7  ;;  %v2923_v58 = vadd.f32 %v2922_v55, %v2921_v57  ;;  %v2944_v24 = vadd.f32 %v2943_v17, %v2942_v49  ;;  %v2520_v2 = vadd.f32 %v2519_v20, %v2518_v36  ;;  %v3600_v7 = vld [vmem:[#allocation2 + $0x5b0] sm:$0xff] }
 0x3be   :  { %v2541_v14 = vadd.f32 %v2540_v18, %v2539_v47  ;;  %v3286_v5 = vadd.f32 %v3285_v30, %v3269_v1  ;;  %v3307_v56 = vadd.f32 %v3306_v0, %v3270_v13  ;;  %v3328_v52 = vadd.f32 %v3327_v33, %v3271_v53  ;;  %v3601_v53 = vld [vmem:[#allocation2 + $0x5b8] sm:$0xff]  ;;  %v3602_v30 = vld [vmem:[#allocation2 + $0x5c0] sm:$0xff]  ;;  %v3603_v0 = vld [vmem:[#allocation2 + $0x5c8] sm:$0xff] }
 0x3bf   :  { %v2903_v41 = vrot.slane %v2902_v8, 2  ;;  %v2924_v29 = vrot.slane %v2923_v58, 2  ;;  %v2945_v61 = vrot.slane %v2944_v24, 2  ;;  %v3643_v45 = vmul.f32 %v3595_v40, %v3557_v4  ;;  %v3605_v40 = vld [vmem:[#allocation2 + $0x5d8] sm:$0xff] }
 0x3c0   :  { %v3287_v23 = vrot.slane %v3286_v5, 4  ;;  %v3308_v28 = vrot.slane %v3307_v56, 4  ;;  %v3644_v6 = vmul.f32 %v3596_v11, %v3557_v4  ;;  %v3329_v50 = vrot.slane %v3328_v52, 4  ;;  %v3541_v48 = vpop.xlane.xlu0 %3540 }
 0x3c1   :  { %v2904_v51 = vadd.f32 %v2903_v41, %v2902_v8  ;;  %v2925_v12 = vadd.f32 %v2924_v29, %v2923_v58  ;;  %v2946_v27 = vadd.f32 %v2945_v61, %v2944_v24  ;;  %v2562_v59 = vadd.f32 %v2561_v16, %v2560_v35  ;;  %v6796_v24 = vld [vmem:[#allocation55_spill] sm:$0xff] }
 0x3c2   :  { %v3288_v63 = vadd.f32 %v3287_v23, %v3286_v5  ;;  %v3309_v36 = vadd.f32 %v3308_v28, %v3307_v56  ;;  %v3645_v47 = vmul.f32 %v3597_v25, %v3557_v4  ;;  %v3330_v54 = vadd.f32 %v3329_v50, %v3328_v52  ;;  %v3606_v52 = vld [vmem:[#allocation2 + $0x5e0] sm:$0xff]  ;;  %v3607_v23 = vld [vmem:[#allocation2 + $0x5e8] sm:$0xff]  ;;  %v3608_v28 = vld [vmem:[#allocation2 + $0x5f0] sm:$0xff] }
 0x3c3   :  { %v2905_v43 = vrot.slane %v2904_v51, 1  ;;  %v2926_v42 = vrot.slane %v2925_v12, 1  ;;  %v2947_v32 = vrot.slane %v2946_v27, 1  ;;  %v3668_v22 = vadd.f32 %v6503_v46, %v3643_v45 }
 0x3c4   :  { %v3289_v20 = vrot.slane %v3288_v63, 2  ;;  %v3310_v18 = vrot.slane %v3309_v36, 2  ;;  %v3689_v37 = vadd.f32 %v6506_v34, %v3644_v6  ;;  %v3331_v62 = vrot.slane %v3330_v54, 2 }
 0x3c5   :  { %v2906_v57 = vadd.f32 %v2905_v43, %v2904_v51  ;;  %v2927_v49 = vadd.f32 %v2926_v42, %v2925_v12  ;;  %v2948_v44 = vadd.f32 %v2947_v32, %v2946_v27  ;;  %v3647_v35 = vmul.f32 %v3599_v26, %v6455_v60  ;;  %v3609_v51 = vld [vmem:[#allocation2 + $0x5f8] sm:$0xff] }
 0x3c6   :  { %v3290_v16 = vadd.f32 %v3289_v20, %v3288_v63  ;;  %v3311_v1 = vadd.f32 %v3310_v18, %v3309_v36  ;;  %v3710_v13 = vadd.f32 %v6510_v38, %v3645_v47  ;;  %v3332_v17 = vadd.f32 %v3331_v62, %v3330_v54  ;;  %v3604_v38 = vld [vmem:[#allocation2 + $0x5d0] sm:$0xff] }
 0x3c7   :  { %v2949_v39 = vadd.f32 %v2906_v57, %v2520_v2  ;;  %v2950_v10 = vadd.f32 %v2927_v49, %v2541_v14  ;;  %v2951_v55 = vadd.f32 %v2948_v44, %v2562_v59  ;;  %v3648_v46 = vmul.f32 %v3600_v7, %v6455_v60 }
 0x3c8   :  { %v3291_v34 = vrot.slane %v3290_v16, 1  ;;  %v3312_v15 = vrot.slane %v3311_v1, 1  ;;  %v3669_v4 = vadd.f32 %v3668_v22, %v6472_v31  ;;  %v3333_v8 = vrot.slane %v3332_v17, 1 }
 0x3c9   :  { %v3690_v58 = vadd.f32 %v3689_v37, %v3647_v35  ;;  %v3559_v33 = vsub.f32 %v3537_v21, %v6796_v24  ;;  %v3560_v11 = vsub.f32 %v3541_v48, %v6495_v19  ;;  %v3561_v5 = vsub.f32 %v3545_v9, %v6523_v3 }
 0x3ca   :  { %v3292_v2 = vadd.f32 %v3291_v34, %v3290_v16  ;;  %v3313_v14 = vadd.f32 %v3312_v15, %v3311_v1  ;;  %v3711_v60 = vadd.f32 %v3710_v13, %v3648_v46  ;;  %v3334_v56 = vadd.f32 %v3333_v8, %v3332_v17 }
 0x3cb   :  { %v3649_v41 = vmul.f32 %v3601_v53, %v3559_v33  ;;  %v3650_v29 = vmul.f32 %v3602_v30, %v3559_v33  ;;  %v3651_v61 = vmul.f32 %v3603_v0, %v3559_v33  ;;  %v3652_v45 = vmul.f32 %v3604_v38, %v3560_v11 }
 0x3cc   :  { %v3335_v25 = vadd.f32 %v3292_v2, %v2949_v39  ;;  %v3336_v31 = vadd.f32 %v3313_v14, %v2950_v10  ;;  %v3653_v6 = vmul.f32 %v3605_v40, %v3560_v11  ;;  %v3337_v21 = vadd.f32 %v3334_v56, %v2951_v55 }
 0x3cd   :  { %v3670_v12 = vadd.f32 %v3669_v4, %v3649_v41  ;;  %v3691_v19 = vadd.f32 %v3690_v58, %v3650_v29  ;;  %v3712_v27 = vadd.f32 %v3711_v60, %v3651_v61  ;;  %v3654_v50 = vmul.f32 %v3606_v52, %v3560_v11 }
 0x3ce   :  { %v3655_v59 = vmul.f32 %v3607_v23, %v3561_v5  ;;  %v3656_v3 = vmul.f32 %v3608_v28, %v3561_v5  ;;  %v3657_v47 = vmul.f32 %v3609_v51, %v3561_v5  ;;  %v3905_v57 = vmov 1966171168  }
 0x3cf   :  { %v3671_v63 = vadd.f32 %v3670_v12, %v3652_v45  ;;  %v3692_v36 = vadd.f32 %v3691_v19, %v3653_v6  ;;  %v3713_v26 = vadd.f32 %v3712_v27, %v3654_v50  ;;  %v3729_v49 = vunpack.c.l.s4 %v3905_v57 }
 0x3d0   :  { %v6797_v39 = vlaneseq }
 0x3d1   :  { %v3672_v43 = vadd.f32 %v3671_v63, %v3655_v59  ;;  %v3693_v42 = vadd.f32 %v3692_v36, %v3656_v3  ;;  %v3714_v32 = vadd.f32 %v3713_v26, %v3657_v47  ;;  %v3730_v48 = vunpack.c.0.s8 %v3729_v49 }
 0x3d2   :  { %v3732_v10 = vshrl.u32 %v6797_v39, 7  ;;  %vm3753_vm10 = vcmp.lt.s32.totalorder %v6797_v39, 384 }
 0x3d3   :  { %v3673_v54 = vrot.slane %v3672_v43, 4  ;;  %v3694_v20 = vrot.slane %v3693_v42, 4  ;;  %v3715_v18 = vrot.slane %v3714_v32, 4 }
 0x3d4   :  { %v3733_v53 = vsub.s32 %v3730_v48, %v3732_v10 }
 0x3d5   :  { %v3674_v22 = vadd.f32 %v3673_v54, %v3672_v43  ;;  %v3695_v37 = vadd.f32 %v3694_v20, %v3693_v42  ;;  %v3716_v7 = vadd.f32 %v3715_v18, %v3714_v32 }
 0x3d7   :  { %v3675_v44 = vrot.slane %v3674_v22, 2  ;;  %v3696_v62 = vrot.slane %v3695_v37, 2  ;;  %v3717_v35 = vrot.slane %v3716_v7, 2 }
 0x3d9   :  { %v3676_v16 = vadd.f32 %v3675_v44, %v3674_v22  ;;  %v3697_v1 = vadd.f32 %v3696_v62, %v3695_v37  ;;  %v3718_v13 = vadd.f32 %v3717_v35, %v3716_v7 }
 0x3db   :  { %v3677_v55 = vrot.slane %v3676_v16, 1  ;;  %v3698_v17 = vrot.slane %v3697_v1, 1  ;;  %v3719_v9 = vrot.slane %v3718_v13, 1 }
 0x3dd   :  { %v3678_v46 = vadd.f32 %v3677_v55, %v3676_v16  ;;  %v3699_v34 = vadd.f32 %v3698_v17, %v3697_v1  ;;  %v3720_v15 = vadd.f32 %v3719_v9, %v3718_v13 }
 0x3df   :  { %v3721_v30 = vadd.f32 %v3678_v46, %v3335_v25  ;;  %v3722_v0 = vadd.f32 %v3699_v34, %v3336_v31  ;;  %v3723_v4 = vadd.f32 %v3720_v15, %v3337_v21 }
 0x3e1   :  { %v3727_v8 = vcombine.low %v3721_v30, %v3722_v0  ;;  %v3741_v24 = vrot.slane %v3723_v4, %v3733_v53 }
 0x3e3   :  { %v3734_v58 = vrot.slane %v3727_v8, %v3733_v53 }
 0x3e5   :  { %v3742_v33 = vcombine.low %v3734_v58, %v3741_v24 }
 0x3e7   :  { %v3749_v38 = vrot.slane %v3742_v33, %v3733_v53 }
 0x3e9   :  { %3755 = vst.msk [vmem:[%s6564_s8] sm:$0x7] %vm3753_vm10, %v3749_v38 }
 0x3ea   :  { %3764 = vsyncpa [#allocation3], 1 }

</bundles_post_ra>
